<compile_context>
chip_gen: v5e
topology: v5e:2x2
jax: 0.10.0
libtpu: 0.0.40
codegen_flags: <defaults>
</compile_context>

<pallas_src>
import functools

import jax
import jax.numpy as jnp
import numpy as np
from jax import lax
from jax.experimental import pallas as pl
from jax.experimental.pallas import tpu as pltpu

EPS = 1e-5


def _vmem_limit_bytes():
    """Generation-aware VMEM limit: physical capacity minus headroom."""
    cap = 64 << 20                      # conservative fallback (v7x-sized)
    try:
        info_cap = int(pltpu.get_tpu_info().vmem_capacity_bytes)
        if info_cap > 0:
            cap = info_cap
    except Exception:
        pass
    # v7x (64 MiB)  -> ~52 MiB;  v5e/v6e (128 MiB) -> 100 MiB.
    return max(16 << 20, min(cap - (12 << 20), 100 << 20))


def _pick_d_tile(d, max_td):
    """Largest legal D tile (multiple of 8, or full D) with td <= max_td.

    Prefers a divisor of D (even grid).  If D has no suitable divisor under the
    budget, returns a bounded multiple-of-8 tile and the caller uses a cdiv grid
    with a masked partial last tile -- the tile never blows past the budget.
    """
    max_td = max(1, int(max_td))
    if d <= max_td:
        return d                      # full D always legal and within budget
    if d < 8:
        return d                      # cannot split below the full dim
    best = 0
    t = 8
    while t <= min(max_td, d):
        if d % t == 0:
            best = t
        t += 8
    if best:
        return best
    return max(8, (min(max_td, d) // 8) * 8)


# ---------------------------------------------------------------------------
# Pass 1: pooling + (BN-folded) conv1 + h_swish + conv_{d,h,w} + sigmoid.
# ---------------------------------------------------------------------------
def _pool_kernel(x_ref, w1_ref, b1_ref, wd_ref, bd_ref, wh_ref, bh_ref,
                 ww_ref, bw_ref, eh_ref, ew_ref, sd_ref, shw_ref, acc_ref,
                 *, d, h, w):
    """Grid = (N, cdiv(D, td)).  x_ref block: (C, td, H*W)."""
    k = pl.program_id(1)
    hw = h * w
    td = x_ref.shape[1]

    xb = x_ref[...]                                    # (C, td, HW), x dtype
    w1 = w1_ref[...]                                   # (MIP, C) -- BN folded
    b1 = b1_ref[...]                                   # (MIP, 1)

    def branch(pooled, wt, bias):
        # 1x1x1 conv1 (+ folded eval-mode BN) -> h_swish -> 1x1x1 conv -> sigmoid
        z = jnp.dot(w1, pooled, preferred_element_type=jnp.float32) + b1
        z = z * (jnp.clip(z + 3.0, 0.0, 6.0) * (1.0 / 6.0))
        return jax.nn.sigmoid(
            jnp.dot(wt, z, preferred_element_type=jnp.float32) + bias)

    # --- d branch: the (H, W) pool is local to this D tile -> emit now. ---
    # f32 accumulation without a block-wide .astype copy of x.
    pooled_d = jnp.sum(xb, axis=2, dtype=jnp.float32) * (1.0 / hw)   # (C, td)
    sd = branch(pooled_d, wd_ref[...], bd_ref[...])                  # (OUP, td)
    sd_ref[...] = sd.T                                               # (td, OUP)

    # --- h / w branches need the sum over all of D: accumulate in VMEM. ---
    @pl.when(k == 0)
    def _init():
        acc_ref[...] = jnp.zeros_like(acc_ref)

    if d % td != 0:
        # Static guard: only emitted for awkward D (cdiv grid, partial last
        # tile).  OOB rows of the padded block must not pollute the sum.
        row = lax.broadcasted_iota(jnp.int32, (1, td, 1), 1)
        xb_acc = jnp.where(k * td + row < d, xb, 0.0)
    else:
        xb_acc = xb
    acc_ref[...] += jnp.sum(xb_acc, axis=1, dtype=jnp.float32)       # (C, HW)

    @pl.when(k == pl.num_programs(1) - 1)
    def _finish():
        s_hw = acc_ref[...]                            # (C, HW): sum over D
        e_h = eh_ref[...]                              # (HW, H): one-hot of l//W
        e_w = ew_ref[...]                              # (HW, W): one-hot of l%W
        # Segmented reductions over the flattened H*W lane axis, as MXU matmuls.
        pooled_h = jnp.dot(
            s_hw, e_h, preferred_element_type=jnp.float32) * (1.0 / (d * w))
        pooled_w = jnp.dot(
            s_hw, e_w, preferred_element_type=jnp.float32) * (1.0 / (d * h))
        sh = branch(pooled_h, wh_ref[...], bh_ref[...])    # (OUP, H)
        sw = branch(pooled_w, ww_ref[...], bw_ref[...])    # (OUP, W)
        # Expand back onto the H*W lane axis with the same one-hots
        # (sh_exp[c, l] = sh[c, l//W], sw_exp[c, l] = sw[c, l%W]) and pre-fuse.
        dn = (((1,), (1,)), ((), ()))
        sh_exp = lax.dot_general(sh, e_h, dn, preferred_element_type=jnp.float32)
        sw_exp = lax.dot_general(sw, e_w, dn, preferred_element_type=jnp.float32)
        shw_ref[...] = sh_exp * sw_exp                 # (OUP, HW)


# ---------------------------------------------------------------------------
# Pass 2: lane-dense broadcast-multiply writeback, tiled over (N, D).
# ---------------------------------------------------------------------------
def _apply_kernel(sd_ref, shw_ref, o_ref):
    """Grid = (N, cdiv(D, td)).  o_ref block: (C, td, H*W) -- lane dim = H*W."""
    od = o_ref.dtype
    sd_t = sd_ref[...].T                               # (td, C) -> (C, td), f32
    shw = shw_ref[...]                                 # (C, HW), f32
    if jnp.dtype(od).itemsize < 4:
        # Cast BEFORE the broadcast multiply so the (C, td, HW) temp lives in
        # the narrow output dtype rather than f32.
        sd_t = sd_t.astype(od)
        shw = shw.astype(od)
        o_ref[...] = sd_t[:, :, None] * shw[:, None, :]
    else:
        o_ref[...] = (sd_t[:, :, None] * shw[:, None, :]).astype(od)


def coord_att_3d(x, params, *, out_dtype=None, vmem_limit_bytes=None):
    """CoordAtt3D forward (eval-mode BN).  x: (N, C, D, H, W) NCDHW.

    NOTE: out_dtype=jnp.bfloat16 is strongly recommended on all TPU generations
    (both passes are HBM-bound; bf16 halves the dominant pass-2 write stream)
    when downstream tolerates rounded attention weights.
    """
    n, c, d, h, w = x.shape
    hw = h * w
    mip = params["w1"].shape[0]
    oup = params["wd"].shape[0]
    out_dtype = x.dtype if out_dtype is None else out_dtype
    f32 = jnp.float32

    vmem_limit = (_vmem_limit_bytes() if vmem_limit_bytes is None
                  else int(vmem_limit_bytes))

    # --- fold eval-mode BatchNorm3d into conv1 (exact with running stats). ---
    s_bn = (params["gamma"] * lax.rsqrt(params["var"] + EPS)).astype(f32)
    w1f = (params["w1"] * s_bn).astype(f32)                            # (mip, c)
    b1f = (params["b1"] * s_bn + params["beta"]
           - params["mean"] * s_bn).astype(f32)                        # (mip, 1)

    # Constant one-hot segment matrices for the flattened H*W lane axis.
    l_idx = np.arange(hw)
    e_h = jnp.asarray(l_idx[:, None] // w == np.arange(h)[None, :], dtype=f32)
    e_w = jnp.asarray(l_idx[:, None] % w == np.arange(w)[None, :], dtype=f32)

    x4 = x.reshape(n, c, d, hw)                    # free view: lane dim = H*W

    def _full(shape):
        zeros = (0,) * len(shape)
        return pl.BlockSpec(shape, lambda i, k, _z=zeros: _z)

    # ----------------------- pass 1: pooling / s-vectors ---------------------
    x_itemsize = jnp.dtype(x.dtype).itemsize
    const_bytes = 4 * (mip * c + mip + 3 * (oup * mip + oup) + hw * (h + w))
    pool_persistent = (c * hw * 4                  # acc scratch
                       + 2 * oup * hw * 4          # shw out block (2 buffers)
                       + 2 * const_bytes           # constants (2 buffers)
                       + (2 << 20))                # slack for Mosaic internals
    pool_per_d = 2 * c * hw * x_itemsize + 2 * oup * 4   # x + sd blocks (2 bufs)
    if x_itemsize < 4:
        pool_per_d += c * hw * 4                   # worst-case f32 reduce temp
    td1 = _pick_d_tile(d, (vmem_limit - pool_persistent) // max(1, pool_per_d))
    grid1 = (n, pl.cdiv(d, td1))

    pool_in_specs = [
        pl.BlockSpec((None, c, td1, hw), lambda i, k: (i, 0, k, 0)),
        _full((mip, c)), _full((mip, 1)),
        _full((oup, mip)), _full((oup, 1)),
        _full((oup, mip)), _full((oup, 1)),
        _full((oup, mip)), _full((oup, 1)),
        _full((hw, h)), _full((hw, w)),
    ]
    pool_out_specs = [
        pl.BlockSpec((None, td1, oup), lambda i, k: (i, k, 0)),
        pl.BlockSpec((None, oup, hw), lambda i, k: (i, 0, 0)),
    ]
    pool_cost = pl.CostEstimate(
        flops=int(4 * n * c * d * hw),
        transcendentals=int(2 * n * oup * (d + h + w)),
        bytes_accessed=int(n * c * d * hw * x_itemsize
                           + n * (d * oup + oup * hw) * 4))

    sd, shw = pl.pallas_call(
        functools.partial(_pool_kernel, d=d, h=h, w=w),
        out_shape=(jax.ShapeDtypeStruct((n, d, oup), f32),
                   jax.ShapeDtypeStruct((n, oup, hw), f32)),
        grid_spec=pltpu.PrefetchScalarGridSpec(
            num_scalar_prefetch=0,
            grid=grid1,
            in_specs=pool_in_specs,
            out_specs=pool_out_specs,
            scratch_shapes=[pltpu.VMEM((c, hw), f32)]),
        compiler_params=pltpu.CompilerParams(
            dimension_semantics=("parallel", "arbitrary"),
            vmem_limit_bytes=vmem_limit),
        cost_estimate=pool_cost,
    )(x4, w1f, b1f,
      params["wd"].astype(f32), params["bd"].astype(f32),
      params["wh"].astype(f32), params["bh"].astype(f32),
      params["ww"].astype(f32), params["bw"].astype(f32),
      e_h, e_w)

    # ----------------------- pass 2: broadcast writeback ---------------------
    out_itemsize = jnp.dtype(out_dtype).itemsize
    temp_itemsize = out_itemsize if out_itemsize < 4 else 4
    apply_persistent = 2 * oup * hw * 4 + (2 << 20)        # shw block (2 bufs)
    apply_per_d = (2 * oup * hw * out_itemsize             # output block (2 bufs)
                   + oup * hw * temp_itemsize              # broadcast-product temp
                   + 2 * oup * 4)                          # sd block (2 bufs)
    td2 = _pick_d_tile(d, (vmem_limit - apply_persistent) // max(1, apply_per_d))
    grid2 = (n, pl.cdiv(d, td2))

    apply_in_specs = [
        pl.BlockSpec((None, td2, oup), lambda i, k: (i, k, 0)),
        pl.BlockSpec((None, oup, hw), lambda i, k: (i, 0, 0)),
    ]
    apply_out_spec = pl.BlockSpec((None, oup, td2, hw),
                                  lambda i, k: (i, 0, k, 0))
    apply_cost = pl.CostEstimate(
        flops=int(2 * n * oup * d * hw),
        transcendentals=0,
        bytes_accessed=int(n * oup * d * hw * out_itemsize
                           + n * (d * oup + oup * hw) * 4))

    out4 = pl.pallas_call(
        _apply_kernel,
        out_shape=jax.ShapeDtypeStruct((n, oup, d, hw), out_dtype),
        grid_spec=pltpu.PrefetchScalarGridSpec(
            num_scalar_prefetch=0,
            grid=grid2,
            in_specs=apply_in_specs,
            out_specs=apply_out_spec),
        compiler_params=pltpu.CompilerParams(
            dimension_semantics=("parallel", "parallel"),
            vmem_limit_bytes=vmem_limit),
        cost_estimate=apply_cost,
    )(sd, shw)

    return out4.reshape(n, oup, d, h, w)          # free view back to NCDHW


# ---------------------------------------------------------------------------
# Pure-JAX reference of CoordAtt3D.forward (eval-mode BN) for verification.
# ---------------------------------------------------------------------------
def ref_forward(x, p):
    n, c, d, h, w = x.shape
    pd = x.mean(axis=(3, 4))                       # (n, c, d)
    ph = x.mean(axis=(2, 4))                       # (n, c, h)
    pw = x.mean(axis=(2, 3))                       # (n, c, w)
    y = jnp.concatenate([pd, ph, pw], axis=2)      # (n, c, d+h+w)
    z = jnp.einsum("mc,ncl->nml", p["w1"], y) + p["b1"][None]
    z = (z - p["mean"][None]) * lax.rsqrt(p["var"][None] + EPS) \
        * p["gamma"][None] + p["beta"][None]
    z = z * (jnp.clip(z + 3.0, 0.0, 6.0) / 6.0)
    zd, zh, zw = z[:, :, :d], z[:, :, d:d + h], z[:, :, d + h:]
    sd = jax.nn.sigmoid(jnp.einsum("om,nml->nol", p["wd"], zd) + p["bd"][None])
    sh = jax.nn.sigmoid(jnp.einsum("om,nml->nol", p["wh"], zh) + p["bh"][None])
    sw = jax.nn.sigmoid(jnp.einsum("om,nml->nol", p["ww"], zw) + p["bw"][None])
    return (sd[:, :, :, None, None] * sh[:, :, None, :, None]
            * sw[:, :, None, None, :])


def make_params(key):
    # CoordAtt3D(128, 128): inp = oup = 128, mip = max(8, 128 // 16) = 8.
    c, mip, oup = 128, 8, 128
    ks = jax.random.split(key, 12)
    f32 = jnp.float32
    return {
        "w1": jax.random.normal(ks[0], (mip, c), f32) * 0.1,
        "b1": jax.random.normal(ks[1], (mip, 1), f32) * 0.1,
        # BatchNorm3d running stats (eval mode) -- non-trivial to exercise fold.
        "gamma": 1.0 + 0.1 * jax.random.normal(ks[2], (mip, 1), f32),
        "beta": 0.1 * jax.random.normal(ks[3], (mip, 1), f32),
        "mean": 0.1 * jax.random.normal(ks[4], (mip, 1), f32),
        "var": 0.5 + jax.random.uniform(ks[5], (mip, 1), f32),
        "wd": jax.random.normal(ks[6], (oup, mip), f32) * 0.1,
        "bd": jax.random.normal(ks[7], (oup, 1), f32) * 0.1,
        "wh": jax.random.normal(ks[8], (oup, mip), f32) * 0.1,
        "bh": jax.random.normal(ks[9], (oup, 1), f32) * 0.1,
        "ww": jax.random.normal(ks[10], (oup, mip), f32) * 0.1,
        "bw": jax.random.normal(ks[11], (oup, 1), f32) * 0.1,
    }


if __name__ == "__main__":
    kx, kp = jax.random.split(jax.random.PRNGKey(0))
    params = make_params(kp)
    # Channels fixed at 128 by CoordAtt3D(128, 128); H*W = 128 keeps the
    # flattened spatial lane axis exactly one vreg wide in the demo.
    x = jax.random.normal(kx, (2, 128, 8, 8, 16), jnp.float32)

    ref = ref_forward(x, params)

    # f32 output path (matches the PyTorch module dtype exactly).
    out = jax.block_until_ready(coord_att_3d(x, params))
    np.testing.assert_allclose(np.asarray(out), np.asarray(ref),
                               rtol=1e-4, atol=1e-5)

    # bf16 output path (recommended: halves the dominant HBM write stream).
    out_bf16 = jax.block_until_ready(
        coord_att_3d(x, params, out_dtype=jnp.bfloat16))
    np.testing.assert_allclose(np.asarray(out_bf16.astype(jnp.float32)),
                               np.asarray(ref), rtol=2e-2, atol=2e-2)

    print("KERNEL_OK")
</pallas_src>

<mosaic_0001>
module attributes {stable_mosaic.version = 11 : i64} {
  func.func @_pool_kernel(%arg0: i32, %arg1: i32, %arg2: memref<1x128x8x128xf32, #tpu.memory_space<vmem>>, %arg3: memref<8x128xf32, #tpu.memory_space<vmem>>, %arg4: memref<8x1xf32, #tpu.memory_space<vmem>>, %arg5: memref<128x8xf32, #tpu.memory_space<vmem>>, %arg6: memref<128x1xf32, #tpu.memory_space<vmem>>, %arg7: memref<128x8xf32, #tpu.memory_space<vmem>>, %arg8: memref<128x1xf32, #tpu.memory_space<vmem>>, %arg9: memref<128x8xf32, #tpu.memory_space<vmem>>, %arg10: memref<128x1xf32, #tpu.memory_space<vmem>>, %arg11: memref<128x8xf32, #tpu.memory_space<vmem>>, %arg12: memref<128x16xf32, #tpu.memory_space<vmem>>, %arg13: memref<1x8x128xf32, #tpu.memory_space<vmem>>, %arg14: memref<1x128x128xf32, #tpu.memory_space<vmem>>, %arg15: memref<128x128xf32, #tpu.memory_space<vmem>>) attributes {dimension_semantics = [#tpu.dimension_semantics<parallel>, #tpu.dimension_semantics<arbitrary>], iteration_bounds = array<i64: 2, 1>, scalar_prefetch = 0 : i64, scratch_operands = 1 : i64, tpu.core_type = #tpu.core_type<tc>, window_params = [{transform_indices = @transform_0, window_bounds = array<i64: 1, 128, 8, 128>}, {pipeline_mode = #tpu.pipeline_mode<synchronous>, transform_indices = @transform_1, window_bounds = array<i64: 8, 128>}, {pipeline_mode = #tpu.pipeline_mode<synchronous>, transform_indices = @transform_2, window_bounds = array<i64: 8, 1>}, {pipeline_mode = #tpu.pipeline_mode<synchronous>, transform_indices = @transform_3, window_bounds = array<i64: 128, 8>}, {pipeline_mode = #tpu.pipeline_mode<synchronous>, transform_indices = @transform_4, window_bounds = array<i64: 128, 1>}, {pipeline_mode = #tpu.pipeline_mode<synchronous>, transform_indices = @transform_5, window_bounds = array<i64: 128, 8>}, {pipeline_mode = #tpu.pipeline_mode<synchronous>, transform_indices = @transform_6, window_bounds = array<i64: 128, 1>}, {pipeline_mode = #tpu.pipeline_mode<synchronous>, transform_indices = @transform_7, window_bounds = array<i64: 128, 8>}, {pipeline_mode = #tpu.pipeline_mode<synchronous>, transform_indices = @transform_8, window_bounds = array<i64: 128, 1>}, {pipeline_mode = #tpu.pipeline_mode<synchronous>, transform_indices = @transform_9, window_bounds = array<i64: 128, 8>}, {pipeline_mode = #tpu.pipeline_mode<synchronous>, transform_indices = @transform_10, window_bounds = array<i64: 128, 16>}, {transform_indices = @transform_11, window_bounds = array<i64: 1, 8, 128>}, {transform_indices = @transform_12, window_bounds = array<i64: 1, 128, 128>}]} {
    %c0 = arith.constant 0 : index
    %c0_0 = arith.constant 0 : index
    %c0_1 = arith.constant 0 : index
    %c0_2 = arith.constant 0 : index
    %0 = vector.load %arg2[%c0, %c0_0, %c0_1, %c0_2] : memref<1x128x8x128xf32, #tpu.memory_space<vmem>>, vector<1x128x8x128xf32>
    %1 = vector.shape_cast %0 : vector<1x128x8x128xf32> to vector<128x8x128xf32>
    %c0_3 = arith.constant 0 : index
    %c0_4 = arith.constant 0 : index
    %2 = vector.load %arg3[%c0_3, %c0_4] : memref<8x128xf32, #tpu.memory_space<vmem>>, vector<8x128xf32>
    %c0_5 = arith.constant 0 : index
    %c0_6 = arith.constant 0 : index
    %3 = vector.load %arg4[%c0_5, %c0_6] : memref<8x1xf32, #tpu.memory_space<vmem>>, vector<8x1xf32>
    %cst = arith.constant dense<0.000000e+00> : vector<128x8xf32>
    %4 = vector.multi_reduction <add>, %1, %cst [2] : vector<128x8x128xf32> to vector<128x8xf32>
    %cst_7 = arith.constant 7.812500e-03 : f32
    %5 = vector.broadcast %cst_7 : f32 to vector<128x8xf32>
    %6 = arith.mulf %4, %5 : vector<128x8xf32>
    %c0_8 = arith.constant 0 : index
    %c0_9 = arith.constant 0 : index
    %7 = vector.load %arg5[%c0_8, %c0_9] : memref<128x8xf32, #tpu.memory_space<vmem>>, vector<128x8xf32>
    %c0_10 = arith.constant 0 : index
    %c0_11 = arith.constant 0 : index
    %8 = vector.load %arg6[%c0_10, %c0_11] : memref<128x1xf32, #tpu.memory_space<vmem>>, vector<128x1xf32>
    %cst_12 = arith.constant dense<0.000000e+00> : vector<8x8xf32>
    %9 = tpu.matmul %2, %6, %cst_12 {dimension_numbers = #tpu.dot_dimension_numbers<[1], [0], [0], [1], [0, 0, 1, 1], [], []>} : vector<8x128xf32>, vector<128x8xf32>, vector<8x8xf32> -> vector<8x8xf32>
    %10 = vector.broadcast %3 : vector<8x1xf32> to vector<8x8xf32>
    %11 = arith.addf %9, %10 : vector<8x8xf32>
    %cst_13 = arith.constant 3.000000e+00 : f32
    %12 = vector.broadcast %cst_13 : f32 to vector<8x8xf32>
    %13 = arith.addf %11, %12 : vector<8x8xf32>
    %cst_14 = arith.constant 0.000000e+00 : f32
    %cst_15 = arith.constant 6.000000e+00 : f32
    %14 = vector.broadcast %cst_14 : f32 to vector<8x8xf32>
    %15 = arith.maximumf %14, %13 : vector<8x8xf32>
    %16 = vector.broadcast %cst_15 : f32 to vector<8x8xf32>
    %17 = arith.minimumf %16, %15 : vector<8x8xf32>
    %cst_16 = arith.constant 0.166666672 : f32
    %18 = vector.broadcast %cst_16 : f32 to vector<8x8xf32>
    %19 = arith.mulf %17, %18 : vector<8x8xf32>
    %20 = arith.mulf %11, %19 : vector<8x8xf32>
    %cst_17 = arith.constant dense<0.000000e+00> : vector<128x8xf32>
    %21 = tpu.matmul %7, %20, %cst_17 {dimension_numbers = #tpu.dot_dimension_numbers<[1], [0], [0], [1], [0, 0, 1, 1], [], []>} : vector<128x8xf32>, vector<8x8xf32>, vector<128x8xf32> -> vector<128x8xf32>
    %22 = vector.broadcast %8 : vector<128x1xf32> to vector<128x8xf32>
    %23 = arith.addf %21, %22 : vector<128x8xf32>
    %24 = arith.negf %23 : vector<128x8xf32>
    %25 = math.exp %24 : vector<128x8xf32>
    %cst_18 = arith.constant 1.000000e+00 : f32
    %26 = vector.broadcast %cst_18 : f32 to vector<128x8xf32>
    %27 = arith.addf %26, %25 : vector<128x8xf32>
    %28 = arith.divf %26, %27 : vector<128x8xf32>
    %29 = tpu.transpose %28, [1, 0] : vector<128x8xf32> -> vector<8x128xf32>
    %c0_19 = arith.constant 0 : index
    %c0_20 = arith.constant 0 : index
    %c0_21 = arith.constant 0 : index
    %30 = vector.load %arg13[%c0_19, %c0_20, %c0_21] : memref<1x8x128xf32, #tpu.memory_space<vmem>>, vector<1x8x128xf32>
    %31 = vector.shape_cast %30 : vector<1x8x128xf32> to vector<8x128xf32>
    %32 = vector.shape_cast %29 : vector<8x128xf32> to vector<1x8x128xf32>
    tpu.vector_store %arg13[%c0_19, %c0_20, %c0_21], %32 {strides = array<i32>} : memref<1x8x128xf32, #tpu.memory_space<vmem>>, vector<1x8x128xf32>,
    %c0_i32 = arith.constant 0 : i32
    %33 = arith.cmpi eq, %arg1, %c0_i32 : i32
    %34 = arith.extui %33 : i1 to i32
    %c0_i32_22 = arith.constant 0 : i32
    %35 = arith.cmpi ne, %34, %c0_i32_22 : i32
    scf.if %35 {
      %cst_30 = arith.constant 0.000000e+00 : f32
      %43 = vector.broadcast %cst_30 : f32 to vector<128x128xf32>
      %c0_31 = arith.constant 0 : index
      %c0_32 = arith.constant 0 : index
      %44 = vector.load %arg15[%c0_31, %c0_32] : memref<128x128xf32, #tpu.memory_space<vmem>>, vector<128x128xf32>
      tpu.vector_store %arg15[%c0_31, %c0_32], %43 {strides = array<i32>} : memref<128x128xf32, #tpu.memory_space<vmem>>, vector<128x128xf32>,
    } else {
    }
    %c0_23 = arith.constant 0 : index
    %c0_24 = arith.constant 0 : index
    %36 = vector.load %arg15[%c0_23, %c0_24] : memref<128x128xf32, #tpu.memory_space<vmem>>, vector<128x128xf32>
    %cst_25 = arith.constant dense<0.000000e+00> : vector<128x128xf32>
    %37 = vector.multi_reduction <add>, %1, %cst_25 [1] : vector<128x8x128xf32> to vector<128x128xf32>
    %38 = arith.addf %36, %37 : vector<128x128xf32>
    %c0_26 = arith.constant 0 : index
    %c0_27 = arith.constant 0 : index
    %39 = vector.load %arg15[%c0_26, %c0_27] : memref<128x128xf32, #tpu.memory_space<vmem>>, vector<128x128xf32>
    tpu.vector_store %arg15[%c0_26, %c0_27], %38 {strides = array<i32>} : memref<128x128xf32, #tpu.memory_space<vmem>>, vector<128x128xf32>,
    %c0_i32_28 = arith.constant 0 : i32
    %40 = arith.cmpi eq, %arg1, %c0_i32_28 : i32
    %41 = arith.extui %40 : i1 to i32
    %c0_i32_29 = arith.constant 0 : i32
    %42 = arith.cmpi ne, %41, %c0_i32_29 : i32
    scf.if %42 {
      %c0_30 = arith.constant 0 : index
      %c0_31 = arith.constant 0 : index
      %43 = vector.load %arg15[%c0_30, %c0_31] : memref<128x128xf32, #tpu.memory_space<vmem>>, vector<128x128xf32>
      %c0_32 = arith.constant 0 : index
      %c0_33 = arith.constant 0 : index
      %44 = vector.load %arg11[%c0_32, %c0_33] : memref<128x8xf32, #tpu.memory_space<vmem>>, vector<128x8xf32>
      %c0_34 = arith.constant 0 : index
      %c0_35 = arith.constant 0 : index
      %45 = vector.load %arg12[%c0_34, %c0_35] : memref<128x16xf32, #tpu.memory_space<vmem>>, vector<128x16xf32>
      %cst_36 = arith.constant dense<0.000000e+00> : vector<128x8xf32>
      %46 = tpu.matmul %43, %44, %cst_36 {dimension_numbers = #tpu.dot_dimension_numbers<[1], [0], [0], [1], [0, 0, 1, 1], [], []>} : vector<128x128xf32>, vector<128x8xf32>, vector<128x8xf32> -> vector<128x8xf32>
      %cst_37 = arith.constant 7.812500e-03 : f32
      %47 = vector.broadcast %cst_37 : f32 to vector<128x8xf32>
      %48 = arith.mulf %46, %47 : vector<128x8xf32>
      %cst_38 = arith.constant dense<0.000000e+00> : vector<128x16xf32>
      %49 = tpu.matmul %43, %45, %cst_38 {dimension_numbers = #tpu.dot_dimension_numbers<[1], [0], [0], [1], [0, 0, 1, 1], [], []>} : vector<128x128xf32>, vector<128x16xf32>, vector<128x16xf32> -> vector<128x16xf32>
      %cst_39 = arith.constant 1.562500e-02 : f32
      %50 = vector.broadcast %cst_39 : f32 to vector<128x16xf32>
      %51 = arith.mulf %49, %50 : vector<128x16xf32>
      %c0_40 = arith.constant 0 : index
      %c0_41 = arith.constant 0 : index
      %52 = vector.load %arg7[%c0_40, %c0_41] : memref<128x8xf32, #tpu.memory_space<vmem>>, vector<128x8xf32>
      %c0_42 = arith.constant 0 : index
      %c0_43 = arith.constant 0 : index
      %53 = vector.load %arg8[%c0_42, %c0_43] : memref<128x1xf32, #tpu.memory_space<vmem>>, vector<128x1xf32>
      %cst_44 = arith.constant dense<0.000000e+00> : vector<8x8xf32>
      %54 = tpu.matmul %2, %48, %cst_44 {dimension_numbers = #tpu.dot_dimension_numbers<[1], [0], [0], [1], [0, 0, 1, 1], [], []>} : vector<8x128xf32>, vector<128x8xf32>, vector<8x8xf32> -> vector<8x8xf32>
      %55 = vector.broadcast %3 : vector<8x1xf32> to vector<8x8xf32>
      %56 = arith.addf %54, %55 : vector<8x8xf32>
      %cst_45 = arith.constant 3.000000e+00 : f32
      %57 = vector.broadcast %cst_45 : f32 to vector<8x8xf32>
      %58 = arith.addf %56, %57 : vector<8x8xf32>
      %cst_46 = arith.constant 0.000000e+00 : f32
      %cst_47 = arith.constant 6.000000e+00 : f32
      %59 = vector.broadcast %cst_46 : f32 to vector<8x8xf32>
      %60 = arith.maximumf %59, %58 : vector<8x8xf32>
      %61 = vector.broadcast %cst_47 : f32 to vector<8x8xf32>
      %62 = arith.minimumf %61, %60 : vector<8x8xf32>
      %cst_48 = arith.constant 0.166666672 : f32
      %63 = vector.broadcast %cst_48 : f32 to vector<8x8xf32>
      %64 = arith.mulf %62, %63 : vector<8x8xf32>
      %65 = arith.mulf %56, %64 : vector<8x8xf32>
      %cst_49 = arith.constant dense<0.000000e+00> : vector<128x8xf32>
      %66 = tpu.matmul %52, %65, %cst_49 {dimension_numbers = #tpu.dot_dimension_numbers<[1], [0], [0], [1], [0, 0, 1, 1], [], []>} : vector<128x8xf32>, vector<8x8xf32>, vector<128x8xf32> -> vector<128x8xf32>
      %67 = vector.broadcast %53 : vector<128x1xf32> to vector<128x8xf32>
      %68 = arith.addf %66, %67 : vector<128x8xf32>
      %69 = arith.negf %68 : vector<128x8xf32>
      %70 = math.exp %69 : vector<128x8xf32>
      %cst_50 = arith.constant 1.000000e+00 : f32
      %71 = vector.broadcast %cst_50 : f32 to vector<128x8xf32>
      %72 = arith.addf %71, %70 : vector<128x8xf32>
      %73 = arith.divf %71, %72 : vector<128x8xf32>
      %c0_51 = arith.constant 0 : index
      %c0_52 = arith.constant 0 : index
      %74 = vector.load %arg9[%c0_51, %c0_52] : memref<128x8xf32, #tpu.memory_space<vmem>>, vector<128x8xf32>
      %c0_53 = arith.constant 0 : index
      %c0_54 = arith.constant 0 : index
      %75 = vector.load %arg10[%c0_53, %c0_54] : memref<128x1xf32, #tpu.memory_space<vmem>>, vector<128x1xf32>
      %cst_55 = arith.constant dense<0.000000e+00> : vector<8x16xf32>
      %76 = tpu.matmul %2, %51, %cst_55 {dimension_numbers = #tpu.dot_dimension_numbers<[1], [0], [0], [1], [0, 0, 1, 1], [], []>} : vector<8x128xf32>, vector<128x16xf32>, vector<8x16xf32> -> vector<8x16xf32>
      %77 = vector.broadcast %3 : vector<8x1xf32> to vector<8x16xf32>
      %78 = arith.addf %76, %77 : vector<8x16xf32>
      %cst_56 = arith.constant 3.000000e+00 : f32
      %79 = vector.broadcast %cst_56 : f32 to vector<8x16xf32>
      %80 = arith.addf %78, %79 : vector<8x16xf32>
      %cst_57 = arith.constant 0.000000e+00 : f32
      %cst_58 = arith.constant 6.000000e+00 : f32
      %81 = vector.broadcast %cst_57 : f32 to vector<8x16xf32>
      %82 = arith.maximumf %81, %80 : vector<8x16xf32>
      %83 = vector.broadcast %cst_58 : f32 to vector<8x16xf32>
      %84 = arith.minimumf %83, %82 : vector<8x16xf32>
      %cst_59 = arith.constant 0.166666672 : f32
      %85 = vector.broadcast %cst_59 : f32 to vector<8x16xf32>
      %86 = arith.mulf %84, %85 : vector<8x16xf32>
      %87 = arith.mulf %78, %86 : vector<8x16xf32>
      %cst_60 = arith.constant dense<0.000000e+00> : vector<128x16xf32>
      %88 = tpu.matmul %74, %87, %cst_60 {dimension_numbers = #tpu.dot_dimension_numbers<[1], [0], [0], [1], [0, 0, 1, 1], [], []>} : vector<128x8xf32>, vector<8x16xf32>, vector<128x16xf32> -> vector<128x16xf32>
      %89 = vector.broadcast %75 : vector<128x1xf32> to vector<128x16xf32>
      %90 = arith.addf %88, %89 : vector<128x16xf32>
      %91 = arith.negf %90 : vector<128x16xf32>
      %92 = math.exp %91 : vector<128x16xf32>
      %cst_61 = arith.constant 1.000000e+00 : f32
      %93 = vector.broadcast %cst_61 : f32 to vector<128x16xf32>
      %94 = arith.addf %93, %92 : vector<128x16xf32>
      %95 = arith.divf %93, %94 : vector<128x16xf32>
      %cst_62 = arith.constant dense<0.000000e+00> : vector<128x128xf32>
      %96 = tpu.matmul %73, %44, %cst_62 {dimension_numbers = #tpu.dot_dimension_numbers<[1], [1], [0], [0], [0, 0, 1, 0], [], []>} : vector<128x8xf32>, vector<128x8xf32>, vector<128x128xf32> -> vector<128x128xf32>
      %cst_63 = arith.constant dense<0.000000e+00> : vector<128x128xf32>
      %97 = tpu.matmul %95, %45, %cst_63 {dimension_numbers = #tpu.dot_dimension_numbers<[1], [1], [0], [0], [0, 0, 1, 0], [], []>} : vector<128x16xf32>, vector<128x16xf32>, vector<128x128xf32> -> vector<128x128xf32>
      %98 = arith.mulf %96, %97 : vector<128x128xf32>
      %c0_64 = arith.constant 0 : index
      %c0_65 = arith.constant 0 : index
      %c0_66 = arith.constant 0 : index
      %99 = vector.load %arg14[%c0_64, %c0_65, %c0_66] : memref<1x128x128xf32, #tpu.memory_space<vmem>>, vector<1x128x128xf32>
      %100 = vector.shape_cast %99 : vector<1x128x128xf32> to vector<128x128xf32>
      %101 = vector.shape_cast %98 : vector<128x128xf32> to vector<1x128x128xf32>
      tpu.vector_store %arg14[%c0_64, %c0_65, %c0_66], %101 {strides = array<i32>} : memref<1x128x128xf32, #tpu.memory_space<vmem>>, vector<1x128x128xf32>,
    } else {
    }
    return
  }
  func.func @transform_0(%arg0: i32, %arg1: i32) -> (i32, i32, i32, i32) {
    %c0_i32 = arith.constant 0 : i32
    %c0_i32_0 = arith.constant 0 : i32
    %c0_i32_1 = arith.constant 0 : i32
    return %arg0, %c0_i32, %arg1, %c0_i32_0 : i32, i32, i32, i32
  }
  func.func @transform_1(%arg0: i32, %arg1: i32) -> (i32, i32) {
    %c0_i32 = arith.constant 0 : i32
    %c0_i32_0 = arith.constant 0 : i32
    %c0_i32_1 = arith.constant 0 : i32
    return %c0_i32, %c0_i32_0 : i32, i32
  }
  func.func @transform_2(%arg0: i32, %arg1: i32) -> (i32, i32) {
    %c0_i32 = arith.constant 0 : i32
    %c0_i32_0 = arith.constant 0 : i32
    %c0_i32_1 = arith.constant 0 : i32
    return %c0_i32, %c0_i32_0 : i32, i32
  }
  func.func @transform_3(%arg0: i32, %arg1: i32) -> (i32, i32) {
    %c0_i32 = arith.constant 0 : i32
    %c0_i32_0 = arith.constant 0 : i32
    %c0_i32_1 = arith.constant 0 : i32
    return %c0_i32, %c0_i32_0 : i32, i32
  }
  func.func @transform_4(%arg0: i32, %arg1: i32) -> (i32, i32) {
    %c0_i32 = arith.constant 0 : i32
    %c0_i32_0 = arith.constant 0 : i32
    %c0_i32_1 = arith.constant 0 : i32
    return %c0_i32, %c0_i32_0 : i32, i32
  }
  func.func @transform_5(%arg0: i32, %arg1: i32) -> (i32, i32) {
    %c0_i32 = arith.constant 0 : i32
    %c0_i32_0 = arith.constant 0 : i32
    %c0_i32_1 = arith.constant 0 : i32
    return %c0_i32, %c0_i32_0 : i32, i32
  }
  func.func @transform_6(%arg0: i32, %arg1: i32) -> (i32, i32) {
    %c0_i32 = arith.constant 0 : i32
    %c0_i32_0 = arith.constant 0 : i32
    %c0_i32_1 = arith.constant 0 : i32
    return %c0_i32, %c0_i32_0 : i32, i32
  }
  func.func @transform_7(%arg0: i32, %arg1: i32) -> (i32, i32) {
    %c0_i32 = arith.constant 0 : i32
    %c0_i32_0 = arith.constant 0 : i32
    %c0_i32_1 = arith.constant 0 : i32
    return %c0_i32, %c0_i32_0 : i32, i32
  }
  func.func @transform_8(%arg0: i32, %arg1: i32) -> (i32, i32) {
    %c0_i32 = arith.constant 0 : i32
    %c0_i32_0 = arith.constant 0 : i32
    %c0_i32_1 = arith.constant 0 : i32
    return %c0_i32, %c0_i32_0 : i32, i32
  }
  func.func @transform_9(%arg0: i32, %arg1: i32) -> (i32, i32) {
    %c0_i32 = arith.constant 0 : i32
    %c0_i32_0 = arith.constant 0 : i32
    %c0_i32_1 = arith.constant 0 : i32
    return %c0_i32, %c0_i32_0 : i32, i32
  }
  func.func @transform_10(%arg0: i32, %arg1: i32) -> (i32, i32) {
    %c0_i32 = arith.constant 0 : i32
    %c0_i32_0 = arith.constant 0 : i32
    %c0_i32_1 = arith.constant 0 : i32
    return %c0_i32, %c0_i32_0 : i32, i32
  }
  func.func @transform_11(%arg0: i32, %arg1: i32) -> (i32, i32, i32) {
    %c0_i32 = arith.constant 0 : i32
    %c0_i32_0 = arith.constant 0 : i32
    return %arg0, %arg1, %c0_i32 : i32, i32, i32
  }
  func.func @transform_12(%arg0: i32, %arg1: i32) -> (i32, i32, i32) {
    %c0_i32 = arith.constant 0 : i32
    %c0_i32_0 = arith.constant 0 : i32
    %c0_i32_1 = arith.constant 0 : i32
    return %arg0, %c0_i32, %c0_i32_0 : i32, i32, i32
  }
}

</mosaic_0001>

<bundles_post_ra>
// kernel: tpu_custom_call.1
= control target key start
LH: loop header
LB: loop body
LE: loop exit
PB: predicated region body
PF: predicated region fallthrough
CT: control target
= control target key end

     0   :  { %s8735_s0 = inlined_call_operand.hbm [shape: f32[2,128,8,128], index: 0, kind: input, shape index: {}]   ;;  %s8736_s1 = inlined_call_operand.vmem [shape: f32[8,128], index: 1, kind: input, shape index: {}]   ;;  %s8737_s2 = inlined_call_operand.vmem [shape: f32[8,1], index: 2, kind: input, shape index: {}]   ;;  %s8738_s3 = inlined_call_operand.vmem [shape: f32[128,8], index: 3, kind: input, shape index: {}]   ;;  %s8739_s4 = inlined_call_operand.vmem [shape: f32[128,1], index: 4, kind: input, shape index: {}]   ;;  %s8740_s5 = inlined_call_operand.vmem [shape: f32[128,8], index: 5, kind: input, shape index: {}]   ;;  %s8741_s6 = inlined_call_operand.vmem [shape: f32[128,1], index: 6, kind: input, shape index: {}]   ;;  %s8742_s7 = inlined_call_operand.vmem [shape: f32[128,8], index: 7, kind: input, shape index: {}]   ;;  %s8743_s8 = inlined_call_operand.vmem [shape: f32[128,1], index: 8, kind: input, shape index: {}]   ;;  %s8744_s9 = inlined_call_operand.vmem [shape: f32[128,8], index: 9, kind: input, shape index: {}]   ;;  %s8745_s10 = inlined_call_operand.vmem [shape: f32[128,16], index: 10, kind: input, shape index: {}]   ;;  %s8746_s11 = inlined_call_operand.hbm [shape: f32[2,8,128], index: 11, kind: output, shape index: {0}]   ;;  %s8747_s12 = inlined_call_operand.hbm [shape: f32[2,128,128], index: 12, kind: output, shape index: {1}]  }
   0x1   :  { %8858 = sst [smem:[#allocation105_spill]] %s8735_s0 }
   0x2   :  { %8859 = sst [smem:[#allocation106_spill]] %s8746_s11 }
   0x3   :  { %8860 = sst [smem:[#allocation107_spill]] %s8747_s12 }
   0x4   :  { %18 = vsyncpa [#allocation4], 0 }
   0x5   :  { %20 = vsyncpa [#allocation4 + $0x1], 0 }
   0x6   :  { %21 = vsyncpa [#allocation5], 0 }
   0x7   :  { %23 = vsyncpa [#allocation5 + $0x1], 0 }
   0x8   :  { %24 = vsyncpa [#allocation8], 0 }
   0x9   :  { %26 = vsyncpa [#allocation8 + $0x1], 0  ;;  %s5617_s21 = smov 0   ;;  %s5619_s22 = smov 0  }
   0xa   :  { %s5621_s23 = smov 0   ;;  %s5623_s24 = smov 0  }
   0xb   :  { %s5625_s25 = smov 0   ;;  %s5627_s26 = smov 0  }
   0xc LB: > { %8861 = sst [smem:[#allocation12_spill]] %s5525_s21  ;;  %s4883_s27 = sadd.s32 4294967295, %s5545_s26   ;;  %s5545_s26 = sphi %s5627_s26, %s32_s26   ;;  %s5541_s25 = sphi %s5625_s25, %s9161_s25   ;;  %s5537_s24 = sphi %s5623_s24, %s9160_s24   ;;  %s5533_s23 = sphi %s5621_s23, %s9164_s23   ;;  %s5529_s22 = sphi %s5619_s22, %s9163_s22   ;;  %s5525_s21 = sphi %s5617_s21, %s9162_s21  }
   0xd   : > { %8862 = sst [smem:[#allocation13_spill]] %s5541_s25  ;;  %s4884_s28 = sadd.s32 4294967294, %s5545_s26  }
   0xe   : > { %s44_s29 = sadd.s32 1, %s5541_s25  ;;  %s53_s30 = sadd.s32 1, %s5533_s23 }
   0xf   : > { %p46_p0 = scmp.ge.s32.totalorder %s44_s29, 2  ;;  %p60_p1 = scmp.ne.s32.totalorder %s5533_s23, %s5529_s22 }
  0x10   : > { %p61_p2 = scmp.eq.s32.totalorder %s5545_s26, 0  ;;  %p66_p3 = scmp.ne.s32.totalorder %s5529_s22, %s5525_s21 }
  0x11   : > { %s9166_s29 = smov (%p46_p0, %s44_s29), 0  ;;  %p67_p5 = scmp.eq.s32.totalorder %s4883_s27, 0 }
  0x12   : > { %8863 = sst [smem:[#allocation14_spill]] %s9166_s29  ;;  %p5658_p4 = por %p61_p2, %p60_p1 }
  0x13   : > { %s48_s14 = ssub.s32 %s5541_s25, %s9166_s29  ;;  %p302_p6 = scmp.eq.s32.totalorder %s4883_s27, 1 }
  0x14   : > { %p51_p7 = scmp.eq.s32.totalorder %s48_s14, 0  ;;  %p5664_p8 = por %p67_p5, %p66_p3 }
  0x15   : > { %p5668_p9 = por %p302_p6, %p60_p1  ;;  %p308_p10 = scmp.eq.s32.totalorder %s4884_s28, 1 }
  0x16   : > { %s5673_s17 = scalar_select %p51_p7, %s5533_s23, %s53_s30  }
  0x17   : > { %s8866_s16 = scalar_select %p5668_p9, 1, 0 }
  0x18   : > { %8868 = sst [smem:[#allocation16_spill]] %s5673_s17  ;;  %p5675_p11 = por %p308_p10, %p66_p3 }
  0x19   : > { %8867 = sst [smem:[#allocation15_spill]] %s8866_s16  ;;  %p4886_p12 = scmp.ge.s32.totalorder %s5545_s26, 2 }
  0x1a   : > { %p5112_p13 = scmp.lt.s32.totalorder %s5545_s26, 2  ;;  %s384_s19 = sand.u32 1, %s5533_s23  }
  0x1b   : > { %s4887_s20 = sshll.u32 %s384_s19, 10  ;;  %s5061_s27 = sshll.u32 %s5541_s25, 10 }
  0x1c   : > { %s8870_s0 = sld [smem:[#allocation105_spill]]  ;;  %s388_s12 = scalar_lea.vmem [#allocation3], %s4887_s20 }
  0x1d   : > { %s397_s16 = sshll.u32 %s388_s12, 4  ;;  %p5102_p0 = pnand %p5112_p13, %p5658_p4  ;;  %s398_s16 = int_to_ptr.vmem [resolvable:$true] %s397_s16 }
  0x1e   : > { %p4890_p1 = scmp.ge.s32.totalorder %s5545_s26, 1  ;;  %s385_s28 = scalar_lea.sflag [#allocation4], %s384_s19 }
  0x1f   : > { %s5547_s30 = smov 128   ;;  %s5548_s17 = smov 8  }
  0x20   : > { %p405_p2 = scmp.lt.s32.totalorder %s5545_s26, 3 }
  0x22   : > { %s394_s21 = scalar_lea.hbm %s8870_s0, %s5061_s27  ;;  %p406_p3 = pnand %p4890_p1, %p405_p2 }
  0x23   : > { %s395_s11 = sshll.u32 %s394_s21, 4  ;;  %s396_s11 = int_to_ptr.hbm [resolvable:$true] %s395_s11 }
  0x24   : > { %5104 = dma.hbm_to_vmem [thread:$0]  (!%p5102_p0), %s396_s11, 16384, %s398_s16, %s385_s28, %s5547_s30, %s5547_s30, %s5548_s17  }
  0x25   : > { %409 = sbr.rel (%p406_p3) target bundleno = 1328 (0x530), region = 64 }
  0x2a   : > { %s5691_s25 = sand.u32 1, %s5529_s22  }
  0x2b   : > { %s4891_s12 = sshll.u32 %s5691_s25, 10  ;;  %s412_s21 = scalar_lea.sflag [#allocation4], %s5691_s25 }
  0x2c   : > { %s5695_s29 = scalar_lea.vmem [#allocation3], %s4891_s12 }
  0x2d   : > { %5512 = dma.done.wait (%p5664_p8), %s412_s21, 16384  }
  0x2e   : > { %5514 = vsyncadd (%p5664_p8), %s412_s21, 4294950912  ;;  %v5702_v0 = vld [vmem:[%s5695_s29 + $0x3d0] sm:$0xff]  ;;  %v582_v1 = vld [vmem:[%s5695_s29 + $0x3c0] sm:$0xff]  ;;  %vm1271_vm0 = vcmask 1041409   ;;  %vm1273_vm1 = vcmask 1042434   ;;  %vm1275_vm2 = vcmask 1043459  }
  0x2f   : > { %v575_v2 = vld [vmem:[%s5695_s29 + $0x388] sm:$0xff]  ;;  %836 = vadd.xlane.f32.xlu1 %v5702_v0  ;;  %832 = vadd.xlane.f32.xlu0 %v582_v1  ;;  %v2718_v3 = vrot.slane %v582_v1, 4  ;;  %v574_v6 = vld [vmem:[%s5695_s29 + $0x380] sm:$0xff]  ;;  %v5710_v19 = vld [vmem:[%s5695_s29 + $0x3d8] sm:$0xff]  ;;  %vm1277_vm3 = vcmask 1044484   ;;  %vm1279_vm4 = vcmask 1045509  }
  0x30   : > { %v2676_v4 = vrot.slane %v575_v2, 4  ;;  %v583_v5 = vld [vmem:[%s5695_s29 + $0x3c8] sm:$0xff]  ;;  %818 = vadd.xlane.f32.xlu2 %v575_v2  ;;  %v2670_v8 = vrot.slane %v574_v6, 4  ;;  %v566_v30 = vld [vmem:[%s5695_s29 + $0x340] sm:$0xff]  ;;  %v5722_v36 = vld [vmem:[%s5695_s29 + $0x390] sm:$0xff]  ;;  %vm1281_vm5 = vcmask 1046534  }
  0x31   : > { %v2724_v7 = vrot.slane %v583_v5, 4  ;;  %v2719_v9 = vadd.f32 %v2718_v3, %v582_v1  ;;  %v567_v31 = vld [vmem:[%s5695_s29 + $0x348] sm:$0xff]  ;;  %v2622_v32 = vrot.slane %v566_v30, 4  ;;  %v5725_v37 = vld [vmem:[%s5695_s29 + $0x3e0] sm:$0xff]  ;;  %v5730_v46 = vld [vmem:[%s5695_s29 + $0x398] sm:$0xff]  ;;  %vm1283_vm6 = vcmask 1047559  }
  0x32   : > { %v2677_v10 = vadd.f32 %v2676_v4, %v575_v2  ;;  %v2671_v12 = vadd.f32 %v2670_v8, %v574_v6  ;;  %v2628_v33 = vrot.slane %v567_v31, 4  ;;  %v5733_v49 = vld [vmem:[%s5695_s29 + $0x3e8] sm:$0xff]  ;;  %v558_v51 = vld [vmem:[%s5695_s29 + $0x300] sm:$0xff]  ;;  %v5747_v62 = vld [vmem:[%s5695_s29 + $0x350] sm:$0xff]  ;;  %vm1511_vm7 = vcmask 64512   ;;  %s4893_s27 = sshll.u32 %s5691_s25, 7 }
  0x33   : > { %v2725_v11 = vadd.f32 %v2724_v7, %v583_v5  ;;  %v2720_v13 = vrot.slane %v2719_v9, 2  ;;  %v2623_v38 = vadd.f32 %v2622_v32, %v566_v30  ;;  %v559_v50 = vld [vmem:[%s5695_s29 + $0x308] sm:$0xff]  ;;  %v2574_v54 = vrot.slane %v558_v51, 4  ;;  %v550_v57 = vld [vmem:[%s5695_s29 + $0x2c0] sm:$0xff]  ;;  %v5750_v1 = vld [vmem:[%s5695_s29 + $0x3f0] sm:$0xff]  ;;  %s8659_s14 = scalar_lea.vmem [#allocation7], %s4893_s27 }
  0x34   : > { %v2678_v14 = vrot.slane %v2677_v10, 2  ;;  %v2672_v16 = vrot.slane %v2671_v12, 2  ;;  %v2629_v39 = vadd.f32 %v2628_v33, %v567_v31  ;;  %v2580_v53 = vrot.slane %v559_v50, 4  ;;  %v5744_v61 = vld [vmem:[%s5695_s29 + $0x3a0] sm:$0xff]  ;;  %v5778_v32 = vld [vmem:[%s5695_s29 + $0x3b0] sm:$0xff]  ;;  %s4892_s28 = sshll.u32 %s5691_s25, 3 }
  0x35   : > { %v2726_v15 = vrot.slane %v2725_v11, 2  ;;  %v2721_v17 = vadd.f32 %v2720_v13, %v2719_v9  ;;  %v2624_v40 = vrot.slane %v2623_v38, 2  ;;  %v2575_v56 = vadd.f32 %v2574_v54, %v558_v51  ;;  %v551_v9 = vld [vmem:[%s5695_s29 + $0x2c8] sm:$0xff]  ;;  %v5760_v13 = vld [vmem:[%s5695_s29 + $0x358] sm:$0xff]  ;;  %v5781_v33 = vld [vmem:[%s5695_s29 + $0x360] sm:$0xff]  ;;  %s5056_s30 = sshll.u32 %s5537_s24, 3 }
  0x36   : > { %v2679_v18 = vadd.f32 %v2678_v14, %v2677_v10  ;;  %v2673_v21 = vadd.f32 %v2672_v16, %v2671_v12  ;;  %v2630_v41 = vrot.slane %v2629_v39, 2  ;;  %v2581_v55 = vadd.f32 %v2580_v53, %v559_v50  ;;  %v581_v53 = vld [vmem:[%s5695_s29 + $0x3b8] sm:$0xff]  ;;  %v5801_v54 = vld [vmem:[%s5695_s29 + $0x320] sm:$0xff]  ;;  %s9154_s21 = sld [smem:[#allocation106_spill]]  ;;  %s454_s15 = scalar_lea.vmem [#allocation6], %s4892_s28 }
  0x37   : > { %v2727_v20 = vadd.f32 %v2726_v15, %v2725_v11  ;;  %v2722_v22 = vrot.slane %v2721_v17, 1  ;;  %834 = vadd.xlane.f32.xlu0 %v583_v5  ;;  %816 = vadd.xlane.f32.xlu1 %v574_v6  ;;  %v2625_v42 = vadd.f32 %v2624_v40, %v2623_v38  ;;  %v2526_v58 = vrot.slane %v550_v57, 4  ;;  %s4749_s16 = sshll.u32 %s454_s15, 4  ;;  %s4731_s20 = scalar_lea.sflag [#allocation5], %s5691_s25  ;;  %s4750_s16 = int_to_ptr.vmem [resolvable:$true] %s4749_s16 }
  0x38   : > { %v2680_v23 = vrot.slane %v2679_v18, 1  ;;  %838 = vadd.xlane.f32.xlu2 %v5710_v19  ;;  %v2674_v25 = vrot.slane %v2673_v21, 1  ;;  %v2631_v43 = vadd.f32 %v2630_v41, %v2629_v39  ;;  %v2582_v59 = vrot.slane %v2581_v55, 2 }
  0x39   : > { %v2728_v24 = vrot.slane %v2727_v20, 1  ;;  %v2723_v26 = vadd.f32 %v2722_v22, %v2721_v17  ;;  %v2626_v44 = vrot.slane %v2625_v42, 1  ;;  %v2576_v60 = vrot.slane %v2575_v56, 2  ;;  %v5765_v22 = vld [vmem:[%s5695_s29 + $0x3a8] sm:$0xff] }
  0x3a   : > { %v2681_v27 = vadd.f32 %v2680_v23, %v2679_v18  ;;  %v2675_v29 = vadd.f32 %v2674_v25, %v2673_v21  ;;  %v2632_v45 = vrot.slane %v2631_v43, 1  ;;  %v2527_v63 = vadd.f32 %v2526_v58, %v550_v57  ;;  %v589_v21 = vld [vmem:[%s5695_s29 + $0x3f8] sm:$0xff]  ;;  %v5768_v23 = vld [vmem:[%s5695_s29 + $0x310] sm:$0xff] }
  0x3b   : > { %v2729_v28 = vadd.f32 %v2728_v24, %v2727_v20  ;;  %v2627_v47 = vadd.f32 %v2626_v44, %v2625_v42  ;;  %v2583_v2 = vadd.f32 %v2582_v59, %v2581_v55  ;;  %v2577_v3 = vadd.f32 %v2576_v60, %v2575_v56  ;;  %v535_v55 = vld [vmem:[%s5695_s29 + $0x248] sm:$0xff]  ;;  %v534_v56 = vld [vmem:[%s5695_s29 + $0x240] sm:$0xff] }
  0x3c   : > { %v5719_v35 = vsel %vm1271_vm0, %v2681_v27, %v2675_v29  ;;  %v2633_v48 = vadd.f32 %v2632_v45, %v2631_v43  ;;  %v2528_v6 = vrot.slane %v2527_v63, 2  ;;  %v2532_v12 = vrot.slane %v551_v9, 4  ;;  %v542_v27 = vld [vmem:[%s5695_s29 + $0x280] sm:$0xff]  ;;  %s9155_s11 = smov %s9154_s21  ;;  %s4747_s13 = scalar_lea.hbm %s9154_s21, %s5056_s30 }
  0x3d   : > { %v5716_v34 = vsel %vm1271_vm0, %v2729_v28, %v2723_v26  ;;  %8872 = vst [vmem:[#allocation18_spill] sm:$0xff] %v5719_v35  ;;  %v2584_v4 = vrot.slane %v2583_v2, 1  ;;  %v2578_v5 = vrot.slane %v2577_v3, 1  ;;  %v543_v26 = vld [vmem:[%s5695_s29 + $0x288] sm:$0xff]  ;;  %v2478_v29 = vrot.slane %v542_v27, 4  ;;  %s4751_s19 = sshll.u32 %s4747_s13, 4  ;;  %s4752_s19 = int_to_ptr.hbm [resolvable:$true] %s4751_s19 }
  0x3e   : > { %8871 = vst [vmem:[#allocation17_spill] sm:$0xff] %v5716_v34  ;;  %v5739_v52 = vsel %vm1271_vm0, %v2633_v48, %v2627_v47  ;;  %v2529_v11 = vadd.f32 %v2528_v6, %v2527_v63  ;;  %v2533_v14 = vadd.f32 %v2532_v12, %v551_v9  ;;  %v2484_v28 = vrot.slane %v543_v26, 4  ;;  %v5786_v47 = vld [vmem:[%s5695_s29 + $0x318] sm:$0xff]  ;;  %v5808_v63 = vld [vmem:[%s5695_s29 + $0x370] sm:$0xff]  ;;  %v5815_v12 = vld [vmem:[%s5695_s29 + $0x328] sm:$0xff]  ;;  %s5445_s27 = sshra.s32 %s4752_s19, 4  ;;  %s5446_s27 = int_to_ptr.hbm [resolvable:$true] %s5445_s27 }
  0x3f   : > { %820 = vadd.xlane.f32.xlu0 %v5722_v36  ;;  %840 = vadd.xlane.f32.xlu1 %v5725_v37  ;;  %8873 = vst [vmem:[#allocation19_spill] sm:$0xff] %v5739_v52  ;;  %v2585_v7 = vadd.f32 %v2584_v4, %v2583_v2  ;;  %v2579_v8 = vadd.f32 %v2578_v5, %v2577_v3  ;;  %v2430_v58 = vrot.slane %v534_v56, 4  ;;  %s5447_s0 = scalar_lea.hbm %s5446_s27, 8  ;;  %p5452_p7 = scmp.lt.s32.totalorder %s5446_s27, %s9155_s11 }
  0x40   : > { %800 = vadd.xlane.f32.xlu2 %v566_v30  ;;  %v2530_v15 = vrot.slane %v2529_v11, 1  ;;  %v2534_v16 = vrot.slane %v2533_v14, 2  ;;  %v2485_v30 = vadd.f32 %v2484_v28, %v543_v26  ;;  %p5448_p4 = scmp.ne.s32.totalorder %s5446_s27, %s5447_s0 }
  0x41   : > { %v5757_v10 = vsel %vm1271_vm0, %v2585_v7, %v2579_v8  ;;  %v2431_v60 = vadd.f32 %v2430_v58, %v534_v56  ;;  %v518_v58 = vld [vmem:[%s5695_s29 + $0x1c0] sm:$0xff] }
  0x42   : > { %8874 = vst [vmem:[#allocation20_spill] sm:$0xff] %v5757_v10  ;;  %v2535_v17 = vadd.f32 %v2534_v16, %v2533_v14  ;;  %v2531_v18 = vadd.f32 %v2530_v15, %v2529_v11  ;;  %v2486_v38 = vrot.slane %v2485_v30, 2  ;;  %v5812_v11 = vld [vmem:[%s5695_s29 + $0x2d8] sm:$0xff]  ;;  %v526_v16 = vld [vmem:[%s5695_s29 + $0x200] sm:$0xff]  ;;  %v2736_v10 = vrot.slane %v5710_v19, 4  ;;  %p5449_p5 = pnand %p5448_p4, %p5668_p9 }
  0x43   : > { %v2432_v3 = vrot.slane %v2431_v60, 2  ;;  %v5821_v15 = vld [vmem:[%s5695_s29 + $0x378] sm:$0xff] }
  0x44   : > { %v2536_v20 = vrot.slane %v2535_v17, 1  ;;  %v2487_v40 = vadd.f32 %v2486_v38, %v2485_v30  ;;  %8878 = vst [vmem:[#allocation24_spill] sm:$0xff] %v5821_v15  ;;  %p5450_p6 = pneg %p5449_p5 }
  0x45   : > { %v2433_v5 = vadd.f32 %v2432_v3, %v2431_v60 }
  0x46   : > { %v2537_v24 = vadd.f32 %v2536_v20, %v2535_v17  ;;  %v2488_v42 = vrot.slane %v2487_v40, 1  ;;  %v2382_v17 = vrot.slane %v526_v16, 4  ;;  %v5828_v20 = vld [vmem:[%s5695_s29 + $0x290] sm:$0xff] }
  0x47   : > { %822 = vadd.xlane.f32.xlu1 %v5730_v46  ;;  %802 = vadd.xlane.f32.xlu0 %v567_v31  ;;  %v2479_v31 = vadd.f32 %v2478_v29, %v542_v27  ;;  %v2434_v7 = vrot.slane %v2433_v5, 1 }
  0x48   : > { %842 = vadd.xlane.f32.xlu2 %v5733_v49  ;;  %v5772_v25 = vsel %vm1271_vm0, %v2537_v24, %v2531_v18  ;;  %v2489_v44 = vadd.f32 %v2488_v42, %v2487_v40  ;;  %v2383_v18 = vadd.f32 %v2382_v17, %v526_v16  ;;  %v5834_v24 = vld [vmem:[%s5695_s29 + $0x330] sm:$0xff] }
  0x49   : > { %8875 = vst [vmem:[#allocation21_spill] sm:$0xff] %v5772_v25  ;;  %v2480_v39 = vrot.slane %v2479_v31, 2  ;;  %v5930_v25 = vld [vmem:[%s5695_s29 + $0x2b0] sm:$0xff] }
  0x4a   : > { %8886 = vst [vmem:[#allocation32_spill] sm:$0xff] %v5930_v25 }
  0x4b   : > { %v2481_v41 = vadd.f32 %v2480_v39, %v2479_v31  ;;  %v5841_v31 = vld [vmem:[%s5695_s29 + $0x298] sm:$0xff] }
  0x4d   : > { %v2482_v43 = vrot.slane %v2481_v41, 1 }
  0x4f   : > { %824 = vadd.xlane.f32.xlu1 %v5744_v61  ;;  %804 = vadd.xlane.f32.xlu0 %v5747_v62  ;;  %v2483_v45 = vadd.f32 %v2482_v43, %v2481_v41 }
  0x50   : > { %844 = vadd.xlane.f32.xlu2 %v5750_v1 }
  0x51   : > { %v5789_v48 = vsel %vm1271_vm0, %v2489_v44, %v2483_v45  ;;  %v565_v44 = vld [vmem:[%s5695_s29 + $0x338] sm:$0xff]  ;;  %v5846_v45 = vld [vmem:[%s5695_s29 + $0x2e8] sm:$0xff] }
  0x52   : > { %8876 = vst [vmem:[#allocation22_spill] sm:$0xff] %v5789_v48 }
  0x57   : > { %786 = vadd.xlane.f32.xlu1 %v559_v50  ;;  %784 = vadd.xlane.f32.xlu0 %v558_v51  ;;  %v5792_v50 = vld [vmem:[%s5695_s29 + $0x368] sm:$0xff]  ;;  %v5797_v51 = vld [vmem:[%s5695_s29 + $0x2d0] sm:$0xff] }
  0x58   : > { %806 = vadd.xlane.f32.xlu2 %v5760_v13 }
  0x5f   : > { %846 = vadd.xlane.f32.xlu1 %v589_v21  ;;  %826 = vadd.xlane.f32.xlu0 %v5765_v22  ;;  %v5831_v21 = vld [vmem:[%s5695_s29 + $0x2e0] sm:$0xff] }
  0x60   : > { %788 = vadd.xlane.f32.xlu2 %v5768_v23 }
  0x67   : > { %828 = vadd.xlane.f32.xlu1 %v5778_v32  ;;  %808 = vadd.xlane.f32.xlu0 %v5781_v33 }
  0x68   : > { %768 = vadd.xlane.f32.xlu2 %v550_v57  ;;  %v2436_v57 = vrot.slane %v535_v55, 4 }
  0x6a   : > { %v2437_v59 = vadd.f32 %v2436_v57, %v535_v55 }
  0x6c   : > { %v2438_v2 = vrot.slane %v2437_v59, 2 }
  0x6e   : > { %v2439_v4 = vadd.f32 %v2438_v2, %v2437_v59  ;;  %v2334_v59 = vrot.slane %v518_v58, 4 }
  0x6f   : > { %790 = vadd.xlane.f32.xlu1 %v5786_v47  ;;  %770 = vadd.xlane.f32.xlu0 %v551_v9  ;;  %v2435_v9 = vadd.f32 %v2434_v7, %v2433_v5  ;;  %v5872_v7 = vld [vmem:[%s5695_s29 + $0x2a0] sm:$0xff] }
  0x70   : > { %810 = vadd.xlane.f32.xlu2 %v5792_v50  ;;  %v2440_v6 = vrot.slane %v2439_v4, 1  ;;  %v2335_v5 = vadd.f32 %v2334_v59, %v518_v58  ;;  %8880 = vst [vmem:[#allocation26_spill] sm:$0xff] %v5872_v7  ;;  %v5898_v59 = vld [vmem:[%s5695_s29 + $0x210] sm:$0xff] }
  0x72   : > { %v2441_v8 = vadd.f32 %v2440_v6, %v2439_v4  ;;  %v5869_v6 = vld [vmem:[%s5695_s29 + $0x2f0] sm:$0xff] }
  0x74   : > { %v5818_v14 = vsel %vm1271_vm0, %v2441_v8, %v2435_v9  ;;  %v2336_v9 = vrot.slane %v2335_v5, 2 }
  0x75   : > { %8877 = vst [vmem:[#allocation23_spill] sm:$0xff] %v5818_v14 }
  0x77   : > { %772 = vadd.xlane.f32.xlu1 %v5797_v51  ;;  %830 = vadd.xlane.f32.xlu0 %v581_v53  ;;  %v5849_v53 = vld [vmem:[%s5695_s29 + $0x250] sm:$0xff] }
  0x78   : > { %792 = vadd.xlane.f32.xlu2 %v5801_v54 }
  0x7f   : > { %812 = vadd.xlane.f32.xlu0 %v5808_v63  ;;  %752 = vadd.xlane.f32.xlu1 %v542_v27  ;;  %v527_v27 = vld [vmem:[%s5695_s29 + $0x208] sm:$0xff] }
  0x80   : > { %754 = vadd.xlane.f32.xlu2 %v543_v26  ;;  %v2384_v26 = vrot.slane %v2383_v18, 2  ;;  %v2388_v29 = vrot.slane %v527_v27, 4 }
  0x82   : > { %v2385_v28 = vadd.f32 %v2384_v26, %v2383_v18  ;;  %v2389_v30 = vadd.f32 %v2388_v29, %v527_v27  ;;  %v2337_v18 = vadd.f32 %v2336_v9, %v2335_v5  ;;  %v2682_v5 = vrot.slane %v5722_v36, 4 }
  0x84   : > { %v2386_v38 = vrot.slane %v2385_v28, 1  ;;  %v2390_v39 = vrot.slane %v2389_v30, 2 }
  0x86   : > { %v2391_v40 = vadd.f32 %v2390_v39, %v2389_v30  ;;  %v2387_v41 = vadd.f32 %v2386_v38, %v2385_v28  ;;  %v2338_v28 = vrot.slane %v2337_v18, 1 }
  0x87   : > { %774 = vadd.xlane.f32.xlu0 %v5812_v11  ;;  %794 = vadd.xlane.f32.xlu1 %v5815_v12 }
  0x88   : > { %814 = vadd.xlane.f32.xlu2 %v5821_v15  ;;  %v2392_v42 = vrot.slane %v2391_v40, 1 }
  0x8a   : > { %v2393_v43 = vadd.f32 %v2392_v42, %v2391_v40  ;;  %v2339_v40 = vadd.f32 %v2338_v28, %v2337_v18  ;;  %v5884_v42 = vld [vmem:[%s5695_s29 + $0x2a8] sm:$0xff]  ;;  %v2730_v18 = vrot.slane %v5702_v0, 4 }
  0x8b   : > { %8881 = vst [vmem:[#allocation27_spill] sm:$0xff] %v5884_v42 }
  0x8c   : > { %v5852_v57 = vsel %vm1271_vm0, %v2393_v43, %v2387_v41  ;;  %v5881_v41 = vld [vmem:[%s5695_s29 + $0x258] sm:$0xff] }
  0x8d   : > { %8879 = vst [vmem:[#allocation25_spill] sm:$0xff] %v5852_v57 }
  0x8f   : > { %756 = vadd.xlane.f32.xlu0 %v5828_v20  ;;  %776 = vadd.xlane.f32.xlu1 %v5831_v21 }
  0x90   : > { %796 = vadd.xlane.f32.xlu2 %v5834_v24 }
  0x97   : > { %738 = vadd.xlane.f32.xlu1 %v535_v55  ;;  %736 = vadd.xlane.f32.xlu0 %v534_v56  ;;  %v5856_v55 = vld [vmem:[%s5695_s29 + $0x1c8] sm:$0xff] }
  0x98   : > { %758 = vadd.xlane.f32.xlu2 %v5841_v31  ;;  %v2340_v56 = vrot.slane %v5856_v55, 4 }
  0x9a   : > { %v2341_v3 = vadd.f32 %v2340_v56, %v5856_v55 }
  0x9c   : > { %v2342_v8 = vrot.slane %v2341_v3, 2 }
  0x9e   : > { %v2343_v17 = vadd.f32 %v2342_v8, %v2341_v3  ;;  %v5901_v3 = vld [vmem:[%s5695_s29 + $0x2f8] sm:$0xff]  ;;  %v5905_v8 = vld [vmem:[%s5695_s29 + $0x260] sm:$0xff] }
  0x9f   : > { %798 = vadd.xlane.f32.xlu1 %v565_v44  ;;  %778 = vadd.xlane.f32.xlu0 %v5846_v45  ;;  %8883 = vst [vmem:[#allocation29_spill] sm:$0xff] %v5901_v3 }
  0xa0   : > { %740 = vadd.xlane.f32.xlu2 %v5849_v53  ;;  %v2344_v26 = vrot.slane %v2343_v17, 1  ;;  %8884 = vst [vmem:[#allocation30_spill] sm:$0xff] %v5905_v8 }
  0xa2   : > { %v5861_v60 = vpop.xlane.xlu1 %836  ;;  %v5863_v2 = vpop.xlane.xlu0 %832  ;;  %v2345_v38 = vadd.f32 %v2344_v26, %v2343_v17  ;;  %v5915_v17 = vld [vmem:[%s5695_s29 + $0x180] sm:$0xff]  ;;  %v2683_v26 = vadd.f32 %v2682_v5, %v5722_v36 }
  0xa3   : > { %v5866_v4 = vpop.xlane.xlu2 %818  ;;  %v2286_v28 = vrot.slane %v5915_v17, 4 }
  0xa4   : > { %v5887_v43 = vsel %vm1271_vm0, %v2345_v38, %v2339_v40  ;;  %v2684_v36 = vrot.slane %v2683_v26, 2 }
  0xa5   : > { %8882 = vst [vmem:[#allocation28_spill] sm:$0xff] %v5887_v43  ;;  %v2287_v52 = vadd.f32 %v2286_v28, %v5915_v17  ;;  %v2731_v43 = vadd.f32 %v2730_v18, %v5702_v0 }
  0xa7   : > { %780 = vadd.xlane.f32.xlu1 %v5869_v6  ;;  %760 = vadd.xlane.f32.xlu0 %v5872_v7  ;;  %v2288_v5 = vrot.slane %v2287_v52, 2  ;;  %v2685_v7 = vadd.f32 %v2684_v36, %v2683_v26 }
  0xa8   : > { %720 = vadd.xlane.f32.xlu2 %v526_v16 }
  0xa9   : > { %v2289_v57 = vadd.f32 %v2288_v5, %v2287_v52  ;;  %v2686_v36 = vrot.slane %v2685_v7, 1 }
  0xaa   : > { %v835_v29 = vpop.xlane.xlu0 %834  ;;  %v5876_v30 = vpop.xlane.xlu1 %816 }
  0xab   : > { %v5878_v39 = vpop.xlane.xlu2 %838  ;;  %v2290_v0 = vrot.slane %v2289_v57, 1 }
  0xad   : > { %v2291_v5 = vadd.f32 %v2290_v0, %v2289_v57  ;;  %v2748_v57 = vrot.slane %v5733_v49, 4  ;;  %v5974_v0 = vld [vmem:[%s5695_s29 + $0x140] sm:$0xff] }
  0xaf   : > { %742 = vadd.xlane.f32.xlu1 %v5881_v41  ;;  %722 = vadd.xlane.f32.xlu0 %v527_v27  ;;  %v5910_v27 = vld [vmem:[%s5695_s29 + $0x188] sm:$0xff] }
  0xb0   : > { %762 = vadd.xlane.f32.xlu2 %v5884_v42  ;;  %v2292_v9 = vrot.slane %v5910_v27, 4  ;;  %v2732_v42 = vrot.slane %v2731_v43, 2 }
  0xb2   : > { %v5891_v16 = vpop.xlane.xlu0 %820  ;;  %v5893_v44 = vpop.xlane.xlu1 %840  ;;  %v2293_v34 = vadd.f32 %v2292_v9, %v5910_v27  ;;  %v2737_v9 = vadd.f32 %v2736_v10, %v5710_v19  ;;  %v5951_v26 = vadd.f32 %v2732_v42, %v2731_v43  ;;  %v2694_v43 = vrot.slane %v5744_v61, 4 }
  0xb3   : > { %v5895_v56 = vpop.xlane.xlu2 %800 }
  0xb4   : > { %v2294_v48 = vrot.slane %v2293_v34, 2  ;;  %v2738_v19 = vrot.slane %v2737_v9, 2  ;;  %8890 = vst [vmem:[#allocation36_spill] sm:$0xff] %v5951_v26 }
  0xb6   : > { %v2295_v14 = vadd.f32 %v2294_v48, %v2293_v34 }
  0xb7   : > { %724 = vadd.xlane.f32.xlu1 %v5898_v59  ;;  %782 = vadd.xlane.f32.xlu0 %v5901_v3  ;;  %v2742_v3 = vrot.slane %v5725_v37, 4 }
  0xb8   : > { %744 = vadd.xlane.f32.xlu2 %v5905_v8  ;;  %v2296_v28 = vrot.slane %v2295_v14, 1  ;;  %v5949_v8 = vld [vmem:[%s5695_s29 + $0x268] sm:$0xff] }
  0xb9   : > { %v5942_v10 = vadd.f32 %v2742_v3, %v5725_v37  ;;  %8889 = vst [vmem:[#allocation35_spill] sm:$0xff] %v5949_v8  ;;  %v968_v3 = vmul.f32 0.0078125, %v5863_v2  ;;  %v5977_v2 = vadd.f32 %v2686_v36, %v2685_v7 }
  0xba   : > { %v5920_v38 = vpop.xlane.xlu1 %822  ;;  %v5922_v40 = vpop.xlane.xlu0 %802  ;;  %v2297_v48 = vadd.f32 %v2296_v28, %v2295_v14  ;;  %v5965_v28 = vadd.f32 %v2738_v19, %v2737_v9  ;;  %v2238_v9 = vrot.slane %v5974_v0, 4  ;;  %v970_v19 = vmul.f32 0.0078125, %v5861_v60 }
  0xbb   : > { %8885 = vst [vmem:[#allocation31_spill] sm:$0xff] %v5922_v40  ;;  %v5925_v35 = vpop.xlane.xlu2 %842  ;;  %v969_v40 = vmul.f32 0.0078125, %v835_v29  ;;  %v2640_v60 = vrot.slane %v5760_v13, 4 }
  0xbc   : > { %8888 = vst [vmem:[#allocation34_spill] sm:$0xff] %v5942_v10  ;;  %v5957_v14 = vsel %vm1271_vm0, %v2297_v48, %v2291_v5  ;;  %v5982_v5 = vadd.f32 %v2748_v57, %v5733_v49  ;;  %v971_v48 = vmul.f32 0.0078125, %v5878_v39  ;;  %v2239_v57 = vadd.f32 %v2238_v9, %v5974_v0  ;;  %v6004_v10 = vld [vmem:[%s5695_s29 + $0x1d0] sm:$0xff] }
  0xbd   : > { %8892 = vst [vmem:[#allocation38_spill] sm:$0xff] %v5957_v14  ;;  %v6007_v14 = vld [vmem:[%s5695_s29 + $0x220] sm:$0xff]  ;;  %v6012_v9 = vld [vmem:[%s5695_s29 + $0x270] sm:$0xff] }
  0xbe   : > { %8893 = vst [vmem:[#allocation39_spill] sm:$0xff] %v5965_v28  ;;  %v5999_v28 = vadd.f32 %v2694_v43, %v5744_v61 }
  0xbf   : > { %764 = vadd.xlane.f32.xlu0 %v5930_v25  ;;  %704 = vadd.xlane.f32.xlu1 %v518_v58  ;;  %v1141_v58 = vlaneseq  ;;  %v2688_v25 = vrot.slane %v5730_v46, 4  ;;  %8894 = vst [vmem:[#allocation40_spill] sm:$0xff] %v5977_v2  ;;  %v972_v2 = vmul.f32 0.0078125, %v5893_v44 }
  0xc0   : > { %706 = vadd.xlane.f32.xlu2 %v5856_v55  ;;  %v5946_v55 = vld [vmem:[%s5695_s29 + $0x218] sm:$0xff]  ;;  %8895 = vst [vmem:[#allocation41_spill] sm:$0xff] %v5982_v5 }
  0xc1   : > { %v5960_v37 = vand.u32 127, %v1141_v58  ;;  %v5969_v29 = vadd.f32 %v2688_v25, %v5730_v46  ;;  %v2634_v46 = vrot.slane %v5747_v62, 4  ;;  %v2586_v25 = vrot.slane %v5768_v23, 4  ;;  %8898 = vst [vmem:[#allocation44_spill] sm:$0xff] %v6007_v14 }
  0xc2   : > { %v5937_v18 = vpop.xlane.xlu1 %824  ;;  %v5939_v34 = vpop.xlane.xlu0 %804 }
  0xc3   : > { %8887 = vst [vmem:[#allocation33_spill] sm:$0xff] %v5939_v34  ;;  %v845_v52 = vpop.xlane.xlu2 %844  ;;  %v5954_v34 = vld [vmem:[%s5695_s29 + $0x2b8] sm:$0xff]  ;;  %v1264_v58 = vperm.slane %v969_v40, %v5960_v37  ;;  %v2754_v40 = vrot.slane %v5750_v1, 4  ;;  %v1263_v36 = vperm.slane %v968_v3, %v5960_v37  ;;  %v2690_v26 = vrot.slane %v5969_v29, 2 }
  0xc4   : > { %8891 = vst [vmem:[#allocation37_spill] sm:$0xff] %v5954_v34  ;;  %v973_v3 = vmul.f32 0.0078125, %v5925_v35  ;;  %v2587_v43 = vadd.f32 %v2586_v25, %v5768_v23  ;;  %v974_v44 = vmul.f32 0.0078125, %v845_v52  ;;  %v6023_v35 = vld [vmem:[%s5695_s29 + $0x148] sm:$0xff]  ;;  %v1267_v23 = vperm.slane %v972_v2, %v5960_v37 }
  0xc5   : > { %v1383_v39 = vsel %vm1271_vm0, %v1264_v58, %v1263_v36  ;;  %v1266_v58 = vperm.slane %v971_v48, %v5960_v37  ;;  %v2641_v48 = vadd.f32 %v2640_v60, %v5760_v13 }
  0xc6   : > { %v1268_v25 = vperm.slane %v973_v3, %v5960_v37  ;;  %v1269_v61 = vperm.slane %v974_v44, %v5960_v37  ;;  %v6044_v3 = vadd.f32 %v2690_v26, %v5969_v29  ;;  %v2544_v26 = vrot.slane %v5812_v11, 4 }
  0xc7   : > { %726 = vadd.xlane.f32.xlu0 %v5946_v55  ;;  %746 = vadd.xlane.f32.xlu1 %v5949_v8  ;;  %v2592_v8 = vrot.slane %v5786_v47, 4 }
  0xc8   : > { %766 = vadd.xlane.f32.xlu2 %v5954_v34  ;;  %v2635_v34 = vadd.f32 %v2634_v46, %v5747_v62  ;;  %v2244_v62 = vrot.slane %v6023_v35, 4  ;;  %v6030_v46 = vadd.f32 %v2754_v40, %v5750_v1  ;;  %8900 = vst [vmem:[#allocation46_spill] sm:$0xff] %v6044_v3 }
  0xca   : > { %v5987_v42 = vpop.xlane.xlu1 %786  ;;  %v5989_v7 = vpop.xlane.xlu0 %784  ;;  %8899 = vst [vmem:[#allocation45_spill] sm:$0xff] %v6030_v46  ;;  %v2245_v2 = vadd.f32 %v2244_v62, %v6023_v35  ;;  %v2636_v44 = vrot.slane %v2635_v34, 2  ;;  %v6048_v62 = vld [vmem:[%s5695_s29 + $0x1d8] sm:$0xff]  ;;  %v960_v46 = vmul.f32 0.0078125, %v5876_v30  ;;  %v963_v30 = vmul.f32 0.0078125, %v5920_v38 }
  0xcb   : > { %8896 = vst [vmem:[#allocation42_spill] sm:$0xff] %v5987_v42  ;;  %v5994_v49 = vpop.xlane.xlu2 %806  ;;  %v1265_v42 = vperm.slane %v970_v19, %v5960_v37  ;;  %v2588_v19 = vrot.slane %v2587_v43, 2 }
  0xcc   : > { %8897 = vst [vmem:[#allocation43_spill] sm:$0xff] %v5989_v7  ;;  %v2240_v7 = vrot.slane %v2239_v57, 2 }
  0xcd   : > { %v1384_v36 = vsel %vm1273_vm1, %v1265_v42, %v1383_v39  ;;  %v2246_v39 = vrot.slane %v2245_v2, 2  ;;  %8901 = vst [vmem:[#allocation47_spill] sm:$0xff] %v6048_v62 }
  0xce   : > { %v2241_v52 = vadd.f32 %v2240_v7, %v2239_v57  ;;  %v2593_v7 = vadd.f32 %v2592_v8, %v5786_v47  ;;  %v1385_v1 = vsel %vm1275_vm2, %v1266_v58, %v1384_v36  ;;  %v2589_v8 = vadd.f32 %v2588_v19, %v2587_v43 }
  0xcf   : > { %708 = vadd.xlane.f32.xlu0 %v6004_v10  ;;  %728 = vadd.xlane.f32.xlu1 %v6007_v14  ;;  %v1386_v57 = vsel %vm1277_vm3, %v1267_v23, %v1385_v1  ;;  %v2646_v58 = vrot.slane %v5781_v33, 4  ;;  %v2247_v36 = vadd.f32 %v2246_v39, %v2245_v2  ;;  %v2652_v23 = vrot.slane %v5792_v50, 4 }
  0xd0   : > { %748 = vadd.xlane.f32.xlu2 %v6012_v9  ;;  %v2242_v60 = vrot.slane %v2241_v52, 1  ;;  %v1387_v47 = vsel %vm1279_vm4, %v1268_v25, %v1386_v57  ;;  %v2538_v1 = vrot.slane %v5797_v51, 4  ;;  %v2696_v25 = vrot.slane %v5999_v28, 2 }
  0xd1   : > { %v2594_v43 = vrot.slane %v2593_v7, 2  ;;  %v2248_v19 = vrot.slane %v2247_v36, 1  ;;  %v6061_v2 = vadd.f32 %v2636_v44, %v2635_v34  ;;  %v2642_v57 = vrot.slane %v2641_v48, 2 }
  0xd2   : > { %v847_v5 = vpop.xlane.xlu1 %846  ;;  %v6035_v42 = vpop.xlane.xlu0 %826  ;;  %v6068_v39 = vadd.f32 %v2646_v58, %v5781_v33  ;;  %v6075_v44 = vadd.f32 %v2652_v23, %v5792_v50  ;;  %v6083_v33 = vadd.f32 %v2696_v25, %v5999_v28  ;;  %v2658_v28 = vrot.slane %v5808_v63, 4 }
  0xd3   : > { %v6040_v40 = vpop.xlane.xlu2 %788  ;;  %v975_v13 = vmul.f32 0.0078125, %v847_v5  ;;  %v1388_v5 = vsel %vm1281_vm5, %v1269_v61, %v1387_v47  ;;  %v2243_v61 = vadd.f32 %v2242_v60, %v2241_v52  ;;  %8902 = vst [vmem:[#allocation48_spill] sm:$0xff] %v6061_v2  ;;  %v2249_v34 = vadd.f32 %v2248_v19, %v2247_v36  ;;  %v6091_v36 = vld [vmem:[%s5695_s29 + $0x228] sm:$0xff] }
  0xd4   : > { %8903 = vst [vmem:[#allocation49_spill] sm:$0xff] %v6068_v39  ;;  %v2590_v60 = vrot.slane %v2589_v8, 1  ;;  %v6085_v58 = vadd.f32 %v2594_v43, %v2593_v7  ;;  %v6104_v7 = vld [vmem:[%s5695_s29 + $0x190] sm:$0xff]  ;;  %v2490_v43 = vrot.slane %v5828_v20, 4  ;;  %v1258_v2 = vperm.slane %v963_v30, %v5960_v37 }
  0xd5   : > { %v1270_v14 = vperm.slane %v975_v13, %v5960_v37  ;;  %8904 = vst [vmem:[#allocation50_spill] sm:$0xff] %v6075_v44  ;;  %v6094_v50 = vsel %vm1271_vm0, %v2249_v34, %v2243_v61  ;;  %v6132_v34 = vadd.f32 %v2658_v28, %v5808_v63 }
  0xd6   : > { %8905 = vst [vmem:[#allocation51_spill] sm:$0xff] %v6083_v33  ;;  %v6114_v61 = vadd.f32 %v2590_v60, %v2589_v8  ;;  %v961_v60 = vmul.f32 0.0078125, %v5866_v4  ;;  %v2442_v4 = vrot.slane %v5849_v53, 4 }
  0xd7   : > { %690 = vadd.xlane.f32.xlu1 %v5910_v27  ;;  %688 = vadd.xlane.f32.xlu0 %v5915_v17  ;;  %v1389_v29 = vsel %vm1283_vm6, %v1270_v14, %v1388_v5  ;;  %v2598_v27 = vrot.slane %v5801_v54, 4  ;;  %v2700_v17 = vrot.slane %v5765_v22, 4  ;;  %v2706_v14 = vrot.slane %v5778_v32, 4  ;;  %8906 = vst [vmem:[#allocation52_spill] sm:$0xff] %v6085_v58  ;;  %v6253_v58 = vld [vmem:[%s5695_s29 + $0x1a0] sm:$0xff] }
  0xd8   : > { %710 = vadd.xlane.f32.xlu2 %v6048_v62  ;;  %1406 = vmatpush.msra.mxu0 %v1389_v29  ;;  %v2539_v5 = vadd.f32 %v2538_v1, %v5797_v51  ;;  %v2545_v29 = vadd.f32 %v2544_v26, %v5812_v11  ;;  %v6088_v62 = vld [vmem:[%s5695_s29 + $0x278] sm:$0xff]  ;;  %8907 = vst [vmem:[#allocation53_spill] sm:$0xff] %v6094_v50 }
  0xd9   : > { %v6097_v11 = vadd.f32 %v2642_v57, %v2641_v48  ;;  %v6100_v23 = vadd.f32 %v2598_v27, %v5801_v54  ;;  %v6107_v1 = vadd.f32 %v2700_v17, %v5765_v22  ;;  %v6110_v26 = vadd.f32 %v2706_v14, %v5778_v32  ;;  %8911 = vst [vmem:[#allocation57_spill] sm:$0xff] %v6114_v61  ;;  %v6120_v57 = vld [vmem:[%s5695_s29 + $0x108] sm:$0xff]  ;;  %v6123_v22 = vld [vmem:[%s5695_s29 + $0x100] sm:$0xff] }
  0xda   : > { %v6070_v47 = vpop.xlane.xlu1 %828  ;;  %v6072_v52 = vpop.xlane.xlu0 %808  ;;  %v2540_v54 = vrot.slane %v2539_v5, 2  ;;  %v2546_v19 = vrot.slane %v2545_v29, 2  ;;  %v2496_v27 = vrot.slane %v5841_v31, 4  ;;  %v2196_v8 = vrot.slane %v6120_v57, 4  ;;  %8912 = vst [vmem:[#allocation58_spill] sm:$0xff] %v6132_v34 }
  0xdb   : > { %v6079_v13 = vpop.xlane.xlu2 %768  ;;  %8908 = vst [vmem:[#allocation54_spill] sm:$0xff] %v6097_v11  ;;  %v2190_v17 = vrot.slane %v6123_v22, 4  ;;  %v2491_v51 = vadd.f32 %v2490_v43, %v5828_v20  ;;  %v962_v48 = vmul.f32 0.0078125, %v5891_v16  ;;  %v2550_v20 = vrot.slane %v5831_v21, 4 }
  0xdc   : > { %8909 = vst [vmem:[#allocation55_spill] sm:$0xff] %v6107_v1  ;;  %v2197_v3 = vadd.f32 %v2196_v8, %v6120_v57  ;;  %v2541_v63 = vadd.f32 %v2540_v54, %v2539_v5  ;;  %v6144_v28 = vadd.f32 %v2546_v19, %v2545_v29  ;;  %v2497_v16 = vadd.f32 %v2496_v27, %v5841_v31  ;;  %v6157_v8 = vld [vmem:[%s5695_s29 + $0x1e0] sm:$0xff] }
  0xdd   : > { %8910 = vst [vmem:[#allocation56_spill] sm:$0xff] %v6110_v26  ;;  %v2191_v14 = vadd.f32 %v2190_v17, %v6123_v22  ;;  %v964_v43 = vmul.f32 0.0078125, %v5937_v18  ;;  %v6154_v26 = vld [vmem:[%s5695_s29 + $0x230] sm:$0xff]  ;;  %v1256_v5 = vperm.slane %v961_v60, %v5960_v37  ;;  %v1255_v29 = vperm.slane %v960_v46, %v5960_v37 }
  0xde   : > { %8913 = vst [vmem:[#allocation59_spill] sm:$0xff] %v6144_v28  ;;  %v2198_v17 = vrot.slane %v2197_v3, 2  ;;  %v965_v54 = vmul.f32 0.0078125, %v6035_v42  ;;  %v2492_v19 = vrot.slane %v2491_v51, 2  ;;  %v1257_v1 = vperm.slane %v962_v48, %v5960_v37 }
  0xdf   : > { %750 = vadd.xlane.f32.xlu1 %v6088_v62  ;;  %730 = vadd.xlane.f32.xlu0 %v6091_v36  ;;  %v2192_v38 = vrot.slane %v2191_v14, 2  ;;  %v966_v11 = vmul.f32 0.0078125, %v6070_v47  ;;  %v2542_v27 = vrot.slane %v2541_v63, 1  ;;  %v2443_v18 = vadd.f32 %v2442_v4, %v5849_v53 }
  0xe0   : > { %692 = vadd.xlane.f32.xlu2 %v6104_v7  ;;  %v2199_v31 = vadd.f32 %v2198_v17, %v2197_v3  ;;  %v2604_v46 = vrot.slane %v5815_v12, 4  ;;  %v2498_v42 = vrot.slane %v2497_v16, 2  ;;  %v1259_v61 = vperm.slane %v964_v43, %v5960_v37 }
  0xe1   : > { %v2193_v60 = vadd.f32 %v2192_v38, %v2191_v14  ;;  %v2551_v3 = vadd.f32 %v2550_v20, %v5831_v21  ;;  %v1376_v47 = vsel %vm1271_vm0, %v1256_v5, %v1255_v29  ;;  %v1260_v53 = vperm.slane %v965_v54, %v5960_v37  ;;  %v6186_v54 = vld [vmem:[%s5695_s29 + $0x198] sm:$0xff] }
  0xe2   : > { %v6138_v25 = vpop.xlane.xlu1 %790  ;;  %v6140_v32 = vpop.xlane.xlu0 %770  ;;  %v2200_v48 = vrot.slane %v2199_v31, 1  ;;  %v2493_v30 = vadd.f32 %v2492_v19, %v2491_v51  ;;  %v1377_v17 = vsel %vm1273_vm1, %v1257_v1, %v1376_v47  ;;  %v1261_v14 = vperm.slane %v966_v11, %v5960_v37 }
  0xe3   : > { %v6148_v33 = vpop.xlane.xlu2 %810  ;;  %v2194_v4 = vrot.slane %v2193_v60, 1  ;;  %v1378_v39 = vsel %vm1275_vm2, %v1258_v2, %v1377_v17  ;;  %v6182_v29 = vadd.f32 %v2604_v46, %v5815_v12  ;;  %v2610_v51 = vrot.slane %v5834_v24, 4  ;;  %v6240_v17 = vld [vmem:[%s5695_s29 + $0x150] sm:$0xff] }
  0xe4   : > { %v2201_v44 = vadd.f32 %v2200_v48, %v2199_v31  ;;  %v2499_v1 = vadd.f32 %v2498_v42, %v2497_v16  ;;  %v1379_v11 = vsel %vm1277_vm3, %v1259_v61, %v1378_v39  ;;  %v2556_v19 = vrot.slane %v5846_v45, 4  ;;  %v6192_v48 = vld [vmem:[%s5695_s29 + $0x1e8] sm:$0xff]  ;;  %v8928_v16 = vld [vmem:[#allocation27_spill] sm:$0xff] }
  0xe5   : > { %v2195_v5 = vadd.f32 %v2194_v4, %v2193_v60  ;;  %8914 = vst [vmem:[#allocation60_spill] sm:$0xff] %v6182_v29  ;;  %v1380_v2 = vsel %vm1279_vm4, %v1260_v53, %v1379_v11  ;;  %v8916_v12 = vrot.slane %v6100_v23, 2  ;;  %v2552_v42 = vrot.slane %v2551_v3, 2  ;;  %v6243_v53 = vld [vmem:[%s5695_s29 + $0x238] sm:$0xff] }
  0xe6   : > { %v1381_v39 = vsel %vm1281_vm5, %v1261_v14, %v1380_v2  ;;  %v6205_v61 = vadd.f32 %v2542_v27, %v2541_v63  ;;  %v2494_v47 = vrot.slane %v2493_v30, 1  ;;  %v6216_v63 = vadd.f32 %v2610_v51, %v5834_v24  ;;  %v8925_v51 = vld [vmem:[#allocation30_spill] sm:$0xff] }
  0xe7   : > { %732 = vadd.xlane.f32.xlu1 %v6154_v26  ;;  %712 = vadd.xlane.f32.xlu0 %v6157_v8  ;;  %v6196_v60 = vsel %vm1271_vm0, %v2201_v44, %v2195_v5  ;;  %v6201_v46 = vadd.f32 %v8916_v12, %v6100_v23  ;;  %v2500_v27 = vrot.slane %v2499_v1, 1  ;;  %v6222_v14 = vadd.f32 %v2552_v42, %v2551_v3  ;;  %v8922_v5 = vld [vmem:[#allocation31_spill] sm:$0xff]  ;;  %v8926_v12 = vld [vmem:[#allocation33_spill] sm:$0xff]  ;;  %v8927_v42 = vld [vmem:[#allocation26_spill] sm:$0xff] }
  0xe8   : > { %672 = vadd.xlane.f32.xlu2 %v5974_v0  ;;  %v2444_v0 = vrot.slane %v2443_v18, 2  ;;  %8915 = vst [vmem:[#allocation61_spill] sm:$0xff] %v6196_v60  ;;  %v953_v11 = vmul.f32 0.0078125, %v8922_v5  ;;  %v6229_v24 = vadd.f32 %v2494_v47, %v2493_v30  ;;  %v2508_v23 = vrot.slane %v8928_v16, 4 }
  0xe9   : > { %8917 = vst [vmem:[#allocation62_spill] sm:$0xff] %v6201_v46  ;;  %v955_v5 = vmul.f32 0.0078125, %v5994_v49  ;;  %v6245_v30 = vadd.f32 %v2500_v27, %v2499_v1  ;;  %v956_v34 = vmul.f32 0.0078125, %v6072_v52  ;;  %v957_v15 = vmul.f32 0.0078125, %v6148_v33  ;;  %v8933_v46 = vld [vmem:[#allocation32_spill] sm:$0xff] }
  0xea   : > { %v6176_v38 = vpop.xlane.xlu1 %772  ;;  %v831_v43 = vpop.xlane.xlu0 %830  ;;  %8918 = vst [vmem:[#allocation63_spill] sm:$0xff] %v6205_v61  ;;  %v2445_v4 = vadd.f32 %v2444_v0, %v2443_v18  ;;  %v6219_v18 = vadd.f32 %v2556_v19, %v5846_v45  ;;  %v952_v0 = vmul.f32 0.0078125, %v5895_v56  ;;  %v2454_v19 = vrot.slane %v8925_v51, 4 }
  0xeb   : > { %v967_v21 = vmul.f32 0.0078125, %v831_v43  ;;  %v6179_v20 = vpop.xlane.xlu2 %792  ;;  %v2448_v43 = vrot.slane %v5881_v41, 4  ;;  %8919 = vst [vmem:[#allocation64_spill] sm:$0xff] %v6216_v63  ;;  %v1250_v33 = vperm.slane %v955_v5, %v5960_v37  ;;  %v2514_v61 = vrot.slane %v8933_v46, 4 }
  0xec   : > { %8920 = vst [vmem:[#allocation65_spill] sm:$0xff] %v6219_v18  ;;  %v2446_v45 = vrot.slane %v2445_v4, 1  ;;  %v2455_v27 = vadd.f32 %v2454_v19, %v8925_v51  ;;  %v6281_v19 = vld [vmem:[%s5695_s29 + $0xc0] sm:$0xff] }
  0xed   : > { %v1262_v31 = vperm.slane %v967_v21, %v5960_v37  ;;  %8921 = vst [vmem:[#allocation66_spill] sm:$0xff] %v6222_v14  ;;  %v2394_v21 = vrot.slane %v5898_v59, 4  ;;  %v2449_v56 = vadd.f32 %v2448_v43, %v5881_v41  ;;  %v1247_v41 = vperm.slane %v952_v0, %v5960_v37 }
  0xee   : > { %8924 = vst [vmem:[#allocation67_spill] sm:$0xff] %v6229_v24  ;;  %v1248_v43 = vperm.slane %v953_v11, %v5960_v37  ;;  %v6259_v1 = vadd.f32 %v2446_v45, %v2445_v4  ;;  %v6269_v0 = vadd.f32 %v2508_v23, %v8928_v16  ;;  %v6274_v4 = vld [vmem:[%s5695_s29 + $0xc8] sm:$0xff]  ;;  %v8932_v11 = vld [vmem:[#allocation35_spill] sm:$0xff]  ;;  %v1251_v45 = vperm.slane %v956_v34, %v5960_v37 }
  0xef   : > { %694 = vadd.xlane.f32.xlu1 %v6186_v54  ;;  %674 = vadd.xlane.f32.xlu0 %v6023_v35  ;;  %v1382_v44 = vsel %vm1283_vm6, %v1262_v31, %v1381_v39  ;;  %v2562_v35 = vrot.slane %v5869_v6, 4  ;;  %v954_v39 = vmul.f32 0.0078125, %v8926_v12  ;;  %8929 = vst [vmem:[#allocation30_spill] sm:$0xff] %v6245_v30  ;;  %v2395_v49 = vadd.f32 %v2394_v21, %v5898_v59 }
  0xf0   : > { %714 = vadd.xlane.f32.xlu2 %v6192_v48  ;;  %1407 = vmatpush.msra.mxu0 %v1382_v44  ;;  %v2502_v44 = vrot.slane %v8927_v42, 4  ;;  %8931 = vst [vmem:[#allocation26_spill] sm:$0xff] %v6259_v1  ;;  %v2450_v59 = vrot.slane %v2449_v56, 2  ;;  %v2400_v21 = vrot.slane %v5946_v55, 4  ;;  %v2148_v51 = vrot.slane %v6274_v4, 4 }
  0xf1   : > { %v6249_v12 = vadd.f32 %v2562_v35, %v5869_v6  ;;  %v1249_v6 = vperm.slane %v954_v39, %v5960_v37  ;;  %v2396_v39 = vrot.slane %v2395_v49, 2  ;;  %v1369_v16 = vsel %vm1271_vm0, %v1248_v43, %v1247_v41  ;;  %v6295_v41 = vld [vmem:[%s5695_s29 + $0x1f0] sm:$0xff] }
  0xf2   : > { %v813_v31 = vpop.xlane.xlu0 %812  ;;  %v6227_v2 = vpop.xlane.xlu1 %752  ;;  %v6266_v52 = vadd.f32 %v2502_v44, %v8927_v42  ;;  %v1252_v23 = vperm.slane %v957_v15, %v5960_v37  ;;  %v2142_v5 = vrot.slane %v6281_v19, 4  ;;  %v2456_v47 = vrot.slane %v2455_v27, 2 }
  0xf3   : > { %8923 = vst [vmem:[#allocation31_spill] sm:$0xff] %v6227_v2  ;;  %v6233_v3 = vpop.xlane.xlu2 %754  ;;  %v958_v35 = vmul.f32 0.0078125, %v813_v31  ;;  %v2460_v31 = vrot.slane %v8932_v11, 4  ;;  %v1370_v34 = vsel %vm1273_vm1, %v1249_v6, %v1369_v16  ;;  %v2149_v15 = vadd.f32 %v2148_v51, %v6274_v4 }
  0xf4   : > { %8930 = vst [vmem:[#allocation33_spill] sm:$0xff] %v6249_v12  ;;  %v1371_v30 = vsel %vm1275_vm2, %v1250_v33, %v1370_v34  ;;  %v2143_v43 = vadd.f32 %v2142_v5, %v6281_v19  ;;  %v2451_v24 = vadd.f32 %v2450_v59, %v2449_v56  ;;  %v2401_v63 = vadd.f32 %v2400_v21, %v5946_v55  ;;  %v8934_v21 = vld [vmem:[#allocation37_spill] sm:$0xff]  ;;  %v6336_v12 = vld [vmem:[%s5695_s29 + $0x1f8] sm:$0xff] }
  0xf5   : > { %v1253_v29 = vperm.slane %v958_v35, %v5960_v37  ;;  %v2461_v18 = vadd.f32 %v2460_v31, %v8932_v11  ;;  %v1372_v1 = vsel %vm1277_vm3, %v1251_v45, %v1371_v30  ;;  %v2150_v16 = vrot.slane %v2149_v15, 2  ;;  %8938 = vst [vmem:[#allocation32_spill] sm:$0xff] %v6336_v12 }
  0xf6   : > { %v1373_v35 = vsel %vm1279_vm4, %v1252_v23, %v1372_v1  ;;  %v2144_v33 = vrot.slane %v2143_v43, 2  ;;  %v2397_v34 = vadd.f32 %v2396_v39, %v2395_v49  ;;  %v2457_v50 = vadd.f32 %v2456_v47, %v2455_v27 }
  0xf7   : > { %676 = vadd.xlane.f32.xlu1 %v6240_v17  ;;  %734 = vadd.xlane.f32.xlu0 %v6243_v53  ;;  %v1374_v55 = vsel %vm1281_vm5, %v1253_v29, %v1373_v35  ;;  %v2515_v56 = vadd.f32 %v2514_v61, %v8933_v46  ;;  %v2151_v30 = vadd.f32 %v2150_v16, %v2149_v15  ;;  %v2402_v59 = vrot.slane %v2401_v63, 2  ;;  %v8935_v29 = vld [vmem:[#allocation44_spill] sm:$0xff] }
  0xf8   : > { %696 = vadd.xlane.f32.xlu2 %v6253_v58  ;;  %v2145_v1 = vadd.f32 %v2144_v33, %v2143_v43  ;;  %v2520_v11 = vrot.slane %v8934_v21, 4  ;;  %v2462_v31 = vrot.slane %v2461_v18, 2  ;;  %v2346_v47 = vrot.slane %v6004_v10, 4  ;;  %v6325_v35 = vld [vmem:[%s5695_s29 + $0x1a8] sm:$0xff] }
  0xf9   : > { %v2406_v49 = vrot.slane %v8935_v29, 4  ;;  %v2152_v61 = vrot.slane %v2151_v30, 1  ;;  %v2452_v51 = vrot.slane %v2451_v24, 1  ;;  %v2510_v39 = vrot.slane %v6269_v0, 2 }
  0xfa   : > { %v6285_v42 = vpop.xlane.xlu0 %774  ;;  %v6287_v44 = vpop.xlane.xlu1 %794  ;;  %v2146_v27 = vrot.slane %v2145_v1, 1  ;;  %v2398_v23 = vrot.slane %v2397_v34, 1  ;;  %v2458_v15 = vrot.slane %v2457_v50, 1  ;;  %v2516_v43 = vrot.slane %v2515_v56, 2 }
  0xfb   : > { %v815_v28 = vpop.xlane.xlu2 %814  ;;  %v2153_v16 = vadd.f32 %v2152_v61, %v2151_v30  ;;  %v6332_v60 = vadd.f32 %v2462_v31, %v2461_v18  ;;  %v2347_v45 = vadd.f32 %v2346_v47, %v6004_v10  ;;  %v2407_v30 = vadd.f32 %v2406_v49, %v8935_v29  ;;  %v8948_v31 = vld [vmem:[#allocation43_spill] sm:$0xff]  ;;  %v479_v10 = vld [vmem:[%s5695_s29 + $0x88] sm:$0xff] }
  0xfc   : > { %v959_v14 = vmul.f32 0.0078125, %v815_v28  ;;  %v2504_v28 = vrot.slane %v6266_v52, 2  ;;  %v2147_v33 = vadd.f32 %v2146_v27, %v2145_v1  ;;  %v6348_v1 = vadd.f32 %v2452_v51, %v2451_v24 }
  0xfd   : > { %v6351_v18 = vadd.f32 %v2510_v39, %v6269_v0  ;;  %v944_v24 = vmul.f32 0.0078125, %v8948_v31  ;;  %v2298_v49 = vrot.slane %v6104_v7, 4  ;;  %v2412_v51 = vrot.slane %v6091_v36, 4 }
  0xfe   : > { %v1254_v6 = vperm.slane %v959_v14, %v5960_v37  ;;  %8941 = vst [vmem:[#allocation68_spill] sm:$0xff] %v6348_v1  ;;  %v947_v39 = vmul.f32 0.0078125, %v6138_v25  ;;  %v2304_v47 = vrot.slane %v6186_v54, 4  ;;  %v949_v25 = vmul.f32 0.0078125, %v6287_v44 }
  0xff   : > { %716 = vadd.xlane.f32.xlu0 %v6295_v41  ;;  %656 = vadd.xlane.f32.xlu1 %v6123_v22  ;;  %v2466_v22 = vrot.slane %v6012_v9, 4  ;;  %8942 = vst [vmem:[#allocation69_spill] sm:$0xff] %v6351_v18  ;;  %v2418_v18 = vrot.slane %v6154_v26, 4 }
 0x100   : > { %658 = vadd.xlane.f32.xlu2 %v6120_v57  ;;  %v1375_v14 = vsel %vm1283_vm6, %v1254_v6, %v1374_v55  ;;  %v6322_v6 = vld [vmem:[%s5695_s29 + $0x158] sm:$0xff]  ;;  %v6327_v55 = vadd.f32 %v2402_v59, %v2401_v63  ;;  %v6346_v63 = vsel %vm1271_vm0, %v2153_v16, %v2147_v33  ;;  %v6353_v59 = vadd.f32 %v2398_v23, %v2397_v34  ;;  %v6380_v34 = vld [vmem:[%s5695_s29 + $0x110] sm:$0xff] }
 0x101   : > { %1408 = vmatpush.msra.mxu0 %v1375_v14  ;;  %v6330_v14 = vadd.f32 %v2520_v11, %v8934_v21  ;;  %v6342_v2 = vadd.f32 %v2466_v22, %v6012_v9  ;;  %8940 = vst [vmem:[#allocation44_spill] sm:$0xff] %v6346_v63  ;;  %v6358_v9 = vadd.f32 %v2458_v15, %v2457_v50  ;;  %v2348_v22 = vrot.slane %v2347_v45, 2  ;;  %v6383_v21 = vld [vmem:[%s5695_s29 + $0x160] sm:$0xff] }
 0x102   : > { %v6315_v46 = vpop.xlane.xlu0 %756  ;;  %v6317_v57 = vpop.xlane.xlu1 %776  ;;  %8943 = vst [vmem:[#allocation70_spill] sm:$0xff] %v6353_v59  ;;  %v2408_v50 = vrot.slane %v2407_v30, 2  ;;  %v1239_v33 = vperm.slane %v944_v24, %v5960_v37  ;;  %v481_v59 = vld [vmem:[%s5695_s29 + $0x98] sm:$0xff] }
 0x103   : > { %8936 = vst [vmem:[#allocation27_spill] sm:$0xff] %v6315_v46  ;;  %v797_v5 = vpop.xlane.xlu2 %796  ;;  %v6339_v46 = vadd.f32 %v2504_v28, %v6266_v52  ;;  %v6360_v52 = vadd.f32 %v2516_v43, %v2515_v56  ;;  %v8947_v28 = vld [vmem:[#allocation42_spill] sm:$0xff]  ;;  %v946_v56 = vmul.f32 0.0078125, %v6040_v40  ;;  %v948_v40 = vmul.f32 0.0078125, %v6179_v20 }
 0x104   : > { %8937 = vst [vmem:[#allocation35_spill] sm:$0xff] %v6330_v14  ;;  %v945_v11 = vmul.f32 0.0078125, %v8947_v28  ;;  %v8949_v28 = vld [vmem:[#allocation47_spill] sm:$0xff]  ;;  %v2299_v20 = vadd.f32 %v2298_v49, %v6104_v7  ;;  %v950_v29 = vmul.f32 0.0078125, %v797_v5  ;;  %v2413_v14 = vadd.f32 %v2412_v51, %v6091_v36 }
 0x105   : > { %8939 = vst [vmem:[#allocation37_spill] sm:$0xff] %v6339_v46  ;;  %v2352_v31 = vrot.slane %v8949_v28, 4  ;;  %v1241_v24 = vperm.slane %v946_v56, %v5960_v37  ;;  %v2358_v56 = vrot.slane %v6157_v8, 4  ;;  %v1243_v7 = vperm.slane %v948_v40, %v5960_v37 }
 0x106   : > { %8945 = vst [vmem:[#allocation71_spill] sm:$0xff] %v6358_v9  ;;  %v1240_v16 = vperm.slane %v945_v11, %v5960_v37  ;;  %v6392_v11 = vadd.f32 %v2348_v22, %v2347_v45  ;;  %v2409_v45 = vadd.f32 %v2408_v50, %v2407_v30  ;;  %v2472_v5 = vrot.slane %v6088_v62, 4  ;;  %v6427_v9 = vld [vmem:[%s5695_s29 + $0x118] sm:$0xff] }
 0x107   : > { %678 = vadd.xlane.f32.xlu0 %v6322_v6  ;;  %698 = vadd.xlane.f32.xlu1 %v6325_v35  ;;  %8946 = vst [vmem:[#allocation72_spill] sm:$0xff] %v6360_v52  ;;  %v1242_v52 = vperm.slane %v947_v39, %v5960_v37  ;;  %v2353_v22 = vadd.f32 %v2352_v31, %v8949_v28  ;;  %v2300_v39 = vrot.slane %v2299_v20, 2  ;;  %v2250_v30 = vrot.slane %v6240_v17, 4 }
 0x108   : > { %718 = vadd.xlane.f32.xlu2 %v6336_v12  ;;  %8950 = vst [vmem:[#allocation42_spill] sm:$0xff] %v6392_v11  ;;  %v1362_v36 = vsel %vm1271_vm0, %v1240_v16, %v1239_v33  ;;  %v1244_v49 = vperm.slane %v949_v25, %v5960_v37  ;;  %v1245_v50 = vperm.slane %v950_v29, %v5960_v37  ;;  %v2414_v28 = vrot.slane %v2413_v14, 2 }
 0x109   : > { %v1363_v51 = vsel %vm1273_vm1, %v1241_v24, %v1362_v36  ;;  %v2419_v33 = vadd.f32 %v2418_v18, %v6154_v26  ;;  %v2364_v40 = vrot.slane %v6192_v48, 4  ;;  %v2310_v25 = vrot.slane %v6253_v58, 4 }
 0x10a   : > { %v739_v61 = vpop.xlane.xlu1 %738  ;;  %v737_v27 = vpop.xlane.xlu0 %736  ;;  %v1364_v16 = vsel %vm1275_vm2, %v1242_v52, %v1363_v51  ;;  %v2354_v29 = vrot.slane %v2353_v22, 2  ;;  %v2301_v26 = vadd.f32 %v2300_v39, %v2299_v20  ;;  %v2473_v18 = vadd.f32 %v2472_v5, %v6088_v62 }
 0x10b   : > { %v6373_v23 = vpop.xlane.xlu2 %758  ;;  %v921_v15 = vmul.f32 0.0078125, %v739_v61  ;;  %v920_v43 = vmul.f32 0.0078125, %v737_v27  ;;  %v6390_v27 = vld [vmem:[%s5695_s29 + $0x1b0] sm:$0xff]  ;;  %v2251_v51 = vadd.f32 %v2250_v30, %v6240_v17  ;;  %v2410_v20 = vrot.slane %v2409_v45, 1 }
 0x10c   : > { %v2365_v62 = vadd.f32 %v2364_v40, %v6192_v48  ;;  %v2311_v17 = vadd.f32 %v2310_v25, %v6253_v58  ;;  %v6449_v5 = vadd.f32 %v2354_v29, %v2353_v22  ;;  %v8956_v30 = vrot.slane %v6332_v60, 1  ;;  %v6522_v22 = vld [vmem:[%s5695_s29 + $0x120] sm:$0xff] }
 0x10d   : > { %v1216_v0 = vperm.slane %v921_v15, %v5960_v37  ;;  %v1215_v61 = vperm.slane %v920_v43, %v5960_v37  ;;  %v2302_v58 = vrot.slane %v2301_v26, 1  ;;  %v6463_v29 = vadd.f32 %v2410_v20, %v2409_v45 }
 0x10e   : > { %8955 = vst [vmem:[#allocation73_spill] sm:$0xff] %v6449_v5  ;;  %v6455_v48 = vadd.f32 %v8956_v30, %v6332_v60 }
 0x10f   : > { %v6400_v44 = vsel %vm1271_vm0, %v1216_v0, %v1215_v61  ;;  %660 = vadd.xlane.f32.xlu0 %v6380_v34  ;;  %680 = vadd.xlane.f32.xlu1 %v6383_v21  ;;  %v2305_v0 = vadd.f32 %v2304_v47, %v6186_v54  ;;  %v2359_v47 = vadd.f32 %v2358_v56, %v6157_v8  ;;  %v8951_v56 = vrot.slane %v6342_v2, 2 }
 0x110   : > { %700 = vadd.xlane.f32.xlu2 %v6390_v27  ;;  %v1365_v61 = vsel %vm1277_vm3, %v1243_v7, %v1364_v16  ;;  %v2415_v7 = vadd.f32 %v2414_v28, %v2413_v14  ;;  %v2420_v16 = vrot.slane %v2419_v33, 2  ;;  %8957 = vst [vmem:[#allocation74_spill] sm:$0xff] %v6455_v48  ;;  %v2252_v28 = vrot.slane %v2251_v51, 2 }
 0x111   : > { %v2306_v24 = vrot.slane %v2305_v0, 2  ;;  %v1366_v52 = vsel %vm1279_vm4, %v1244_v49, %v1365_v61  ;;  %v2360_v39 = vrot.slane %v2359_v47, 2  ;;  %8959 = vst [vmem:[#allocation76_spill] sm:$0xff] %v6463_v29 }
 0x112   : > { %v799_v15 = vpop.xlane.xlu1 %798  ;;  %v6415_v43 = vpop.xlane.xlu0 %778  ;;  %v1367_v8 = vsel %vm1281_vm5, %v1245_v50, %v1366_v52  ;;  %v2474_v50 = vrot.slane %v2473_v18, 2  ;;  %v6461_v25 = vadd.f32 %v2420_v16, %v2419_v33  ;;  %v517_v52 = vld [vmem:[%s5695_s29 + $0x1b8] sm:$0xff]  ;;  %v6477_v33 = vld [vmem:[%s5695_s29 + $0xd0] sm:$0xff]  ;;  %v6479_v16 = vadd.f32 %v2302_v58, %v2301_v26 }
 0x113   : > { %v6419_v31 = vpop.xlane.xlu2 %740  ;;  %v951_v54 = vmul.f32 0.0078125, %v799_v15  ;;  %v6436_v15 = vadd.f32 %v8951_v56, %v6342_v2  ;;  %v8953_v2 = vrot.slane %v6327_v55, 1  ;;  %v6465_v60 = vadd.f32 %v2360_v39, %v2359_v47 }
 0x114   : > { %8958 = vst [vmem:[#allocation75_spill] sm:$0xff] %v6461_v25  ;;  %v6481_v45 = vadd.f32 %v2474_v50, %v2473_v18  ;;  %v937_v47 = vmul.f32 0.0078125, %v6140_v32  ;;  %v6484_v20 = vadd.f32 %v2252_v28, %v2251_v51  ;;  %v938_v26 = vmul.f32 0.0078125, %v6176_v38 }
 0x115   : > { %v1246_v36 = vperm.slane %v951_v54, %v5960_v37  ;;  %8952 = vst [vmem:[#allocation43_spill] sm:$0xff] %v6436_v15  ;;  %v6447_v14 = vadd.f32 %v8953_v2, %v6327_v55  ;;  %v2202_v58 = vrot.slane %v6380_v34, 4  ;;  %v6519_v55 = vld [vmem:[%s5695_s29 + $0x170] sm:$0xff]  ;;  %v6606_v15 = vld [vmem:[%s5695_s29 + $0x178] sm:$0xff] }
 0x116   : > { %8960 = vst [vmem:[#allocation77_spill] sm:$0xff] %v6465_v60  ;;  %v1232_v50 = vperm.slane %v937_v47, %v5960_v37  ;;  %v940_v47 = vmul.f32 0.0078125, %v6317_v57 }
 0x117   : > { %642 = vadd.xlane.f32.xlu1 %v6274_v4  ;;  %640 = vadd.xlane.f32.xlu0 %v6281_v19  ;;  %v1368_v49 = vsel %vm1283_vm6, %v1246_v36, %v1367_v8  ;;  %8954 = vst [vmem:[#allocation47_spill] sm:$0xff] %v6447_v14  ;;  %v2307_v4 = vadd.f32 %v2306_v24, %v2305_v0  ;;  %v2424_v19 = vrot.slane %v6243_v53, 4  ;;  %v2416_v0 = vrot.slane %v2415_v7, 1  ;;  %v6469_v8 = vld [vmem:[%s5695_s29 + $0x168] sm:$0xff] }
 0x118   : > { %662 = vadd.xlane.f32.xlu2 %v6427_v9  ;;  %1409 = vmatpush.msra.mxu0 %v1368_v49  ;;  %v2366_v24 = vrot.slane %v2365_v62, 2  ;;  %v2312_v36 = vrot.slane %v2311_v17, 2  ;;  %v936_v49 = vmul.f32 0.0078125, %v6079_v13  ;;  %8962 = vst [vmem:[#allocation79_spill] sm:$0xff] %v6479_v16  ;;  %v2256_v13 = vrot.slane %v6322_v6, 4 }
 0x119   : > { %v2308_v2 = vrot.slane %v2307_v4, 1  ;;  %v6474_v30 = vadd.f32 %v2424_v19, %v6243_v53  ;;  %8963 = vst [vmem:[#allocation80_spill] sm:$0xff] %v6481_v45  ;;  %v6486_v39 = vadd.f32 %v2416_v0, %v2415_v7  ;;  %v2316_v53 = vrot.slane %v6325_v35, 4 }
 0x11a   : > { %v781_v54 = vpop.xlane.xlu1 %780  ;;  %v6457_v40 = vpop.xlane.xlu0 %760  ;;  %8964 = vst [vmem:[#allocation81_spill] sm:$0xff] %v6484_v20  ;;  %v6493_v18 = vadd.f32 %v2366_v24, %v2365_v62  ;;  %v6495_v19 = vadd.f32 %v2312_v36, %v2311_v17  ;;  %v1231_v32 = vperm.slane %v936_v49, %v5960_v37  ;;  %v2370_v62 = vrot.slane %v6295_v41, 4 }
 0x11b   : > { %v721_v61 = vpop.xlane.xlu2 %720  ;;  %8961 = vst [vmem:[#allocation78_spill] sm:$0xff] %v6474_v30  ;;  %v6499_v51 = vadd.f32 %v2308_v2, %v2307_v4  ;;  %v2208_v17 = vrot.slane %v6427_v9, 4  ;;  %v939_v4 = vmul.f32 0.0078125, %v6285_v42  ;;  %v1233_v49 = vperm.slane %v938_v26, %v5960_v37  ;;  %v3102_v30 = vld [vmem:[%s8745_s10 + $0x68] sm:$0xff] }
 0x11c   : > { %8965 = vst [vmem:[#allocation82_spill] sm:$0xff] %v6486_v39  ;;  %v912_v56 = vmul.f32 0.0078125, %v721_v61  ;;  %v2257_v61 = vadd.f32 %v2256_v13, %v6322_v6  ;;  %v2203_v42 = vadd.f32 %v2202_v58, %v6380_v34  ;;  %v2262_v6 = vrot.slane %v6383_v21, 4  ;;  %v6636_v39 = vld [vmem:[%s5695_s29 + $0x130] sm:$0xff] }
 0x11d   : > { %8966 = vst [vmem:[#allocation83_spill] sm:$0xff] %v6493_v18  ;;  %v6530_v26 = vadd.f32 %v2370_v62, %v6295_v41  ;;  %v2209_v57 = vadd.f32 %v2208_v17, %v6427_v9  ;;  %v942_v2 = vmul.f32 0.0078125, %v781_v54  ;;  %v2154_v7 = vrot.slane %v6477_v33, 4 }
 0x11e   : > { %8967 = vst [vmem:[#allocation84_spill] sm:$0xff] %v6495_v19  ;;  %v1207_v24 = vperm.slane %v912_v56, %v5960_v37  ;;  %v941_v56 = vmul.f32 0.0078125, %v6415_v43  ;;  %v1355_v38 = vsel %vm1271_vm0, %v1232_v50, %v1231_v32  ;;  %v1234_v48 = vperm.slane %v939_v4, %v5960_v37  ;;  %v8970_v43 = vld [vmem:[#allocation31_spill] sm:$0xff] }
 0x11f   : > { %702 = vadd.xlane.f32.xlu1 %v517_v52  ;;  %682 = vadd.xlane.f32.xlu0 %v6469_v8  ;;  %8968 = vst [vmem:[#allocation85_spill] sm:$0xff] %v6499_v51  ;;  %v2258_v34 = vrot.slane %v2257_v61, 2  ;;  %v929_v41 = vmul.f32 0.0078125, %v6233_v3  ;;  %v928_v62 = vmul.f32 0.0078125, %v8970_v43  ;;  %v1235_v9 = vperm.slane %v940_v47, %v5960_v37 }
 0x120   : > { %644 = vadd.xlane.f32.xlu2 %v6477_v33  ;;  %8969 = vst [vmem:[#allocation86_spill] sm:$0xff] %v6530_v26  ;;  %v6545_v54 = vadd.f32 %v2316_v53, %v6325_v35  ;;  %v1356_v32 = vsel %vm1273_vm1, %v1233_v49, %v1355_v38  ;;  %v2204_v50 = vrot.slane %v2203_v42, 2  ;;  %v2263_v17 = vadd.f32 %v2262_v6, %v6383_v21 }
 0x121   : > { %v1236_v4 = vperm.slane %v941_v56, %v5960_v37  ;;  %v2210_v3 = vrot.slane %v2209_v57, 2  ;;  %v2155_v47 = vadd.f32 %v2154_v7, %v6477_v33  ;;  %v1357_v53 = vsel %vm1275_vm2, %v1234_v48, %v1356_v32  ;;  %v489_v7 = vld [vmem:[%s5695_s29 + $0xd8] sm:$0xff]  ;;  %v6569_v32 = vld [vmem:[%s5695_s29 + $0x128] sm:$0xff]  ;;  %8979 = vst [vmem:[#allocation92_spill] sm:$0xff] %v6606_v15 }
 0x122   : > { %v6507_v28 = vpop.xlane.xlu1 %742  ;;  %v723_v0 = vpop.xlane.xlu0 %722  ;;  %8971 = vst [vmem:[#allocation31_spill] sm:$0xff] %v6545_v54  ;;  %v2322_v38 = vrot.slane %v6390_v27, 4  ;;  %v2268_v21 = vrot.slane %v6469_v8, 4  ;;  %v1224_v56 = vperm.slane %v929_v41, %v5960_v37  ;;  %v6565_v1 = vadd.f32 %v2204_v50, %v2203_v42 }
 0x123   : > { %v913_v36 = vmul.f32 0.0078125, %v723_v0  ;;  %v6512_v52 = vpop.xlane.xlu2 %762  ;;  %v478_v0 = vld [vmem:[%s5695_s29 + $0x80] sm:$0xff]  ;;  %v2264_v60 = vrot.slane %v2263_v17, 2  ;;  %v6573_v41 = vadd.f32 %v2210_v3, %v2209_v57  ;;  %v2100_v50 = vrot.slane %v479_v10, 4 }
 0x124   : > { %v2094_v33 = vrot.slane %v478_v0, 4  ;;  %v6579_v42 = vadd.f32 %v2268_v21, %v6469_v8  ;;  %v6585_v57 = vadd.f32 %v2322_v38, %v6390_v27  ;;  %v6592_v8 = vld [vmem:[%s5695_s29 + $0x40] sm:$0xff] }
 0x125   : > { %v1208_v13 = vperm.slane %v913_v36, %v5960_v37  ;;  %8974 = vst [vmem:[#allocation87_spill] sm:$0xff] %v6573_v41 }
 0x126   : > { %8976 = vst [vmem:[#allocation89_spill] sm:$0xff] %v6579_v42  ;;  %v2095_v3 = vadd.f32 %v2094_v33, %v478_v0 }
 0x127   : > { %v6537_v58 = vsel %vm1271_vm0, %v1208_v13, %v1207_v24  ;;  %684 = vadd.xlane.f32.xlu1 %v6519_v55  ;;  %664 = vadd.xlane.f32.xlu0 %v6522_v22  ;;  %v8972_v24 = vld [vmem:[#allocation27_spill] sm:$0xff]  ;;  %v1237_v13 = vperm.slane %v942_v2, %v5960_v37  ;;  %v1358_v2 = vsel %vm1277_vm3, %v1235_v9, %v1357_v53 }
 0x128   : > { %624 = vadd.xlane.f32.xlu2 %v478_v0  ;;  %v930_v36 = vmul.f32 0.0078125, %v8972_v24  ;;  %v1223_v24 = vperm.slane %v928_v62, %v5960_v37  ;;  %8973 = vst [vmem:[#allocation27_spill] sm:$0xff] %v6565_v1  ;;  %v2156_v62 = vrot.slane %v2155_v47, 2  ;;  %v6576_v53 = vadd.f32 %v2258_v34, %v2257_v61  ;;  %v6589_v61 = vld [vmem:[%s5695_s29 + $0x48] sm:$0xff]  ;;  %v490_v0 = vld [vmem:[%s5695_s29 + $0xe0] sm:$0xff] }
 0x129   : > { %8977 = vst [vmem:[#allocation90_spill] sm:$0xff] %v6585_v57  ;;  %v2052_v21 = vrot.slane %v6589_v61, 4  ;;  %v2096_v34 = vrot.slane %v2095_v3, 2 }
 0x12a   : > { %v6553_v43 = vpop.xlane.xlu1 %724  ;;  %v783_v35 = vpop.xlane.xlu0 %782  ;;  %v1225_v46 = vperm.slane %v930_v36, %v5960_v37  ;;  %8975 = vst [vmem:[#allocation88_spill] sm:$0xff] %v6576_v53  ;;  %v2157_v38 = vadd.f32 %v2156_v62, %v2155_v47  ;;  %v931_v36 = vmul.f32 0.0078125, %v6373_v23  ;;  %v932_v47 = vmul.f32 0.0078125, %v6457_v40 }
 0x12b   : > { %v943_v49 = vmul.f32 0.0078125, %v783_v35  ;;  %v6558_v6 = vpop.xlane.xlu2 %744  ;;  %v1359_v35 = vsel %vm1279_vm4, %v1236_v4, %v1358_v2  ;;  %v1348_v4 = vsel %vm1271_vm0, %v1224_v56, %v1223_v24  ;;  %v2046_v56 = vrot.slane %v6592_v8, 4 }
 0x12c   : > { %v1360_v9 = vsel %vm1281_vm5, %v1237_v13, %v1359_v35  ;;  %v6595_v13 = vadd.f32 %v2264_v60, %v2263_v17  ;;  %v1349_v27 = vsel %vm1273_vm1, %v1225_v46, %v1348_v4  ;;  %v2214_v24 = vrot.slane %v6522_v22, 4 }
 0x12d   : > { %v1238_v48 = vperm.slane %v943_v49, %v5960_v37  ;;  %v2160_v35 = vrot.slane %v489_v7, 4  ;;  %v2101_v60 = vadd.f32 %v2100_v50, %v479_v10  ;;  %v2053_v45 = vadd.f32 %v2052_v21, %v6589_v61 }
 0x12e   : > { %8978 = vst [vmem:[#allocation91_spill] sm:$0xff] %v6595_v13  ;;  %v933_v50 = vmul.f32 0.0078125, %v6512_v52  ;;  %v1226_v40 = vperm.slane %v931_v36, %v5960_v37  ;;  %v2220_v21 = vrot.slane %v6569_v32, 4 }
 0x12f   : > { %646 = vadd.xlane.f32.xlu1 %v489_v7  ;;  %626 = vadd.xlane.f32.xlu0 %v479_v10  ;;  %v1361_v49 = vsel %vm1283_vm6, %v1238_v48, %v1360_v9  ;;  %v2047_v48 = vadd.f32 %v2046_v56, %v6592_v8  ;;  %v2158_v10 = vrot.slane %v2157_v38, 1  ;;  %v2161_v5 = vadd.f32 %v2160_v35, %v489_v7 }
 0x130   : > { %666 = vadd.xlane.f32.xlu2 %v6569_v32  ;;  %1410 = vmatpush.msra.mxu0 %v1361_v49  ;;  %v480_v49 = vld [vmem:[%s5695_s29 + $0x90] sm:$0xff]  ;;  %v2102_v18 = vrot.slane %v2101_v60, 2  ;;  %v922_v7 = vmul.f32 0.0078125, %v6419_v31  ;;  %v1228_v35 = vperm.slane %v933_v50, %v5960_v37  ;;  %v2221_v31 = vadd.f32 %v2220_v21, %v6569_v32 }
 0x131   : > { %v2106_v4 = vrot.slane %v480_v49, 4 }
 0x132   : > { %v765_v2 = vpop.xlane.xlu0 %764  ;;  %v705_v33 = vpop.xlane.xlu1 %704 }
 0x133   : > { %v707_v17 = vpop.xlane.xlu2 %706  ;;  %v904_v9 = vmul.f32 0.0078125, %v705_v33  ;;  %v2215_v33 = vadd.f32 %v2214_v24, %v6522_v22  ;;  %v934_v11 = vmul.f32 0.0078125, %v765_v2  ;;  %v2107_v52 = vadd.f32 %v2106_v4, %v480_v49 }
 0x134   : > { %v905_v46 = vmul.f32 0.0078125, %v707_v17  ;;  %v2274_v17 = vrot.slane %v6519_v55, 4  ;;  %v1227_v22 = vperm.slane %v932_v47, %v5960_v37  ;;  %v2097_v24 = vadd.f32 %v2096_v34, %v2095_v3 }
 0x135   : > { %v1199_v62 = vperm.slane %v904_v9, %v5960_v37  ;;  %v2054_v9 = vrot.slane %v2053_v45, 2  ;;  %v6625_v2 = vadd.f32 %v2158_v10, %v2157_v38  ;;  %v2216_v36 = vrot.slane %v2215_v33, 2 }
 0x136   : > { %v1200_v23 = vperm.slane %v905_v46, %v5960_v37  ;;  %v2048_v46 = vrot.slane %v2047_v48, 2  ;;  %v2103_v4 = vadd.f32 %v2102_v18, %v2101_v60  ;;  %v1229_v47 = vperm.slane %v934_v11, %v5960_v37 }
 0x137   : > { %628 = vadd.xlane.f32.xlu1 %v480_v49  ;;  %686 = vadd.xlane.f32.xlu0 %v6606_v15  ;;  %8981 = vst [vmem:[#allocation94_spill] sm:$0xff] %v6625_v2  ;;  %v2162_v49 = vrot.slane %v2161_v5, 2  ;;  %v2166_v3 = vrot.slane %v490_v0, 4  ;;  %v2108_v38 = vrot.slane %v2107_v52, 2  ;;  %v2098_v16 = vrot.slane %v2097_v24, 1 }
 0x138   : > { %v6621_v56 = vsel %vm1271_vm0, %v1200_v23, %v1199_v62  ;;  %648 = vadd.xlane.f32.xlu2 %v490_v0  ;;  %v1350_v23 = vsel %vm1275_vm2, %v1226_v40, %v1349_v27  ;;  %v2055_v29 = vadd.f32 %v2054_v9, %v2053_v45  ;;  %v2049_v14 = vadd.f32 %v2048_v46, %v2047_v48 }
 0x139   : > { %8980 = vst [vmem:[#allocation93_spill] sm:$0xff] %v6621_v56  ;;  %v1351_v50 = vsel %vm1277_vm3, %v1227_v22, %v1350_v23  ;;  %v1217_v18 = vperm.slane %v922_v7, %v5960_v37  ;;  %v2112_v27 = vrot.slane %v481_v59, 4  ;;  %v2163_v40 = vadd.f32 %v2162_v49, %v2161_v5  ;;  %v491_v7 = vld [vmem:[%s5695_s29 + $0xe8] sm:$0xff]  ;;  %v3093_v56 = vld [vmem:[%s8745_s10 + $0x20] sm:$0xff] }
 0x13a   : > { %v6628_v51 = vpop.xlane.xlu0 %726  ;;  %v6630_v62 = vpop.xlane.xlu1 %746  ;;  %v1352_v60 = vsel %vm1279_vm4, %v1228_v35, %v1351_v50  ;;  %v2104_v32 = vrot.slane %v2103_v4, 1  ;;  %v2167_v21 = vadd.f32 %v2166_v3, %v490_v0  ;;  %v6647_v45 = vadd.f32 %v2274_v17, %v6519_v55 }
 0x13b   : > { %v767_v34 = vpop.xlane.xlu2 %766  ;;  %v1353_v22 = vsel %vm1281_vm5, %v1229_v47, %v1352_v60  ;;  %v2222_v48 = vrot.slane %v2221_v31, 2  ;;  %v2109_v9 = vadd.f32 %v2108_v38, %v2107_v52  ;;  %v923_v5 = vmul.f32 0.0078125, %v6507_v28  ;;  %v6677_v60 = vld [vmem:[%s5695_s29] sm:$0xff] }
 0x13c   : > { %v935_v10 = vmul.f32 0.0078125, %v767_v34  ;;  %8982 = vst [vmem:[#allocation95_spill] sm:$0xff] %v6647_v45  ;;  %v2056_v0 = vrot.slane %v2055_v29, 1  ;;  %v2050_v35 = vrot.slane %v2049_v14, 1  ;;  %v2172_v49 = vrot.slane %v491_v7, 4 }
 0x13d   : > { %v2099_v47 = vadd.f32 %v2098_v16, %v2097_v24  ;;  %v914_v55 = vmul.f32 0.0078125, %v6553_v43  ;;  %v1342_v28 = vsel %vm1273_vm1, %v1217_v18, %v6400_v44  ;;  %v2164_v3 = vrot.slane %v2163_v40, 1  ;;  %v6671_v44 = vld [vmem:[%s5695_s29 + $0x138] sm:$0xff]  ;;  %v6674_v18 = vld [vmem:[%s5695_s29 + $0x8] sm:$0xff] }
 0x13e   : > { %v1230_v11 = vperm.slane %v935_v10, %v5960_v37  ;;  %v2105_v34 = vadd.f32 %v2104_v32, %v2103_v4  ;;  %v2168_v23 = vrot.slane %v2167_v21, 2  ;;  %v924_v16 = vmul.f32 0.0078125, %v6558_v6 }
 0x13f   : > { %668 = vadd.xlane.f32.xlu0 %v6636_v39  ;;  %608 = vadd.xlane.f32.xlu1 %v6592_v8  ;;  %v6653_v8 = vadd.f32 %v2216_v36, %v2215_v33  ;;  %v6663_v33 = vld [vmem:[%s5695_s29 + $0x50] sm:$0xff]  ;;  %v6666_v43 = vadd.f32 %v2222_v48, %v2221_v31  ;;  %v2110_v24 = vrot.slane %v2109_v9, 1  ;;  %v1218_v10 = vperm.slane %v923_v5, %v5960_v37  ;;  %v6692_v5 = vld [vmem:[%s5695_s29 + $0x58] sm:$0xff] }
 0x140   : > { %610 = vadd.xlane.f32.xlu2 %v6589_v61  ;;  %v1354_v46 = vsel %vm1283_vm6, %v1230_v11, %v1353_v22  ;;  %v2113_v61 = vadd.f32 %v2112_v27, %v481_v59  ;;  %v2058_v36 = vrot.slane %v6663_v33, 4  ;;  %v2057_v50 = vadd.f32 %v2056_v0, %v2055_v29 }
 0x141   : > { %1411 = vmatpush.msra.mxu0 %v1354_v46  ;;  %8983 = vst [vmem:[#allocation96_spill] sm:$0xff] %v6666_v43  ;;  %v2051_v11 = vadd.f32 %v2050_v35, %v2049_v14  ;;  %v2173_v4 = vadd.f32 %v2172_v49, %v491_v7  ;;  %v1209_v6 = vperm.slane %v914_v55, %v5960_v37  ;;  %v2004_v27 = vrot.slane %v6674_v18, 4  ;;  %v482_v46 = vld [vmem:[%s5695_s29 + $0xa0] sm:$0xff] }
 0x142   : > { %v6656_v17 = vpop.xlane.xlu0 %708  ;;  %v6658_v52 = vpop.xlane.xlu1 %728  ;;  %v2114_v31 = vrot.slane %v2113_v61, 2  ;;  %v1998_v32 = vrot.slane %v6677_v60, 4  ;;  %v6682_v22 = vadd.f32 %v2164_v3, %v2163_v40  ;;  %v6685_v29 = vsel %vm1271_vm0, %v2105_v34, %v2099_v47  ;;  %v3103_v3 = vld [vmem:[%s8745_s10 + $0x70] sm:$0xff] }
 0x143   : > { %v749_v38 = vpop.xlane.xlu2 %748  ;;  %v6687_v14 = vadd.f32 %v2168_v23, %v2167_v21  ;;  %v1219_v0 = vperm.slane %v924_v16, %v5960_v37  ;;  %v2059_v35 = vadd.f32 %v2058_v36, %v6663_v33  ;;  %v2118_v40 = vrot.slane %v482_v46, 4  ;;  %v3104_v21 = vld [vmem:[%s8745_s10 + $0x78] sm:$0xff] }
 0x144   : > { %8984 = vst [vmem:[#allocation97_spill] sm:$0xff] %v6682_v22  ;;  %v2064_v49 = vrot.slane %v6692_v5, 4  ;;  %v6705_v47 = vsel %vm1271_vm0, %v2057_v50, %v2051_v11  ;;  %v2174_v55 = vrot.slane %v2173_v4, 2  ;;  %3186 = vmatpush.msra.mxu3 %v3104_v21  ;;  %v6712_v34 = vsel %vm1273_vm1, %v1209_v6, %v6537_v58 }
 0x145   : > { %v6714_v23 = vadd.f32 %v2114_v31, %v2113_v61  ;;  %v2060_v31 = vrot.slane %v2059_v35, 2  ;;  %v925_v48 = vmul.f32 0.0078125, %v6630_v62  ;;  %v6751_v62 = vld [vmem:[%s5695_s29 + $0x60] sm:$0xff] }
 0x146   : > { %3187 = vmatpush.msra.mxu3 %v3103_v3  ;;  %v6731_v25 = vadd.f32 %v2174_v55, %v2173_v4  ;;  %v926_v3 = vmul.f32 0.0078125, %v749_v38  ;;  %v3101_v38 = vld [vmem:[%s8745_s10 + $0x60] sm:$0xff]  ;;  %v915_v55 = vmul.f32 0.0078125, %v6628_v51  ;;  %v3100_v51 = vld [vmem:[%s8745_s10 + $0x58] sm:$0xff] }
 0x147   : > { %630 = vadd.xlane.f32.xlu0 %v481_v59  ;;  %650 = vadd.xlane.f32.xlu1 %v491_v7  ;;  %v1343_v59 = vsel %vm1275_vm2, %v1218_v10, %v1342_v28  ;;  %v6702_v7 = vadd.f32 %v2110_v24, %v2109_v9  ;;  %v2005_v9 = vadd.f32 %v2004_v27, %v6674_v18  ;;  %v6719_v24 = vld [vmem:[%s5695_s29 + $0x10] sm:$0xff]  ;;  %v6722_v10 = vld [vmem:[%s5695_s29 + $0x18] sm:$0xff] }
 0x148   : > { %670 = vadd.xlane.f32.xlu2 %v6671_v44  ;;  %v1999_v28 = vadd.f32 %v1998_v32, %v6677_v60  ;;  %v2010_v58 = vrot.slane %v6719_v24, 4  ;;  %v2016_v61 = vrot.slane %v6722_v10, 4  ;;  %v1344_v6 = vsel %vm1277_vm3, %v1219_v0, %v1343_v59  ;;  %3188 = vmatpush.msra.mxu3 %v3102_v30 }
 0x149   : > { %v2119_v27 = vadd.f32 %v2118_v40, %v482_v46  ;;  %v2065_v32 = vadd.f32 %v2064_v49, %v6692_v5  ;;  %v2006_v0 = vrot.slane %v2005_v9, 2  ;;  %v1210_v26 = vperm.slane %v915_v55, %v5960_v37 }
 0x14a   : > { %v691_v16 = vpop.xlane.xlu1 %690  ;;  %v689_v36 = vpop.xlane.xlu0 %688  ;;  %v2000_v40 = vrot.slane %v1999_v28, 2  ;;  %v2011_v49 = vadd.f32 %v2010_v58, %v6719_v24  ;;  %v2017_v59 = vadd.f32 %v2016_v61, %v6722_v10  ;;  %3189 = vmatpush.msra.mxu3 %v3101_v38  ;;  %v2070_v58 = vrot.slane %v6751_v62, 4 }
 0x14b   : > { %v6724_v50 = vpop.xlane.xlu2 %710  ;;  %v897_v11 = vmul.f32 0.0078125, %v691_v16  ;;  %v896_v21 = vmul.f32 0.0078125, %v689_v36  ;;  %v492_v36 = vld [vmem:[%s5695_s29 + $0xf0] sm:$0xff]  ;;  %v2120_v30 = vrot.slane %v2119_v27, 2 }
 0x14c   : > { %v2178_v20 = vrot.slane %v492_v36, 4  ;;  %3190 = vmatpush.msra.mxu3 %v3100_v51  ;;  %v2012_v12 = vrot.slane %v2011_v49, 2  ;;  %v2018_v53 = vrot.slane %v2017_v59, 2 }
 0x14d   : > { %v1192_v19 = vperm.slane %v897_v11, %v5960_v37  ;;  %v1191_v16 = vperm.slane %v896_v21, %v5960_v37  ;;  %v2061_v11 = vadd.f32 %v2060_v31, %v2059_v35  ;;  %v2066_v21 = vrot.slane %v2065_v32, 2  ;;  %v3099_v35 = vld [vmem:[%s8745_s10 + $0x50] sm:$0xff] }
 0x14e   : > { %v1221_v31 = vperm.slane %v926_v3, %v5960_v37  ;;  %v6775_v3 = vadd.f32 %v2120_v30, %v2119_v27  ;;  %3191 = vmatpush.msra.mxu3 %v3099_v35  ;;  %v2013_v30 = vadd.f32 %v2012_v12, %v2011_v49  ;;  %v6798_v35 = vsel %vm1275_vm2, %v1210_v26, %v6712_v34  ;;  %v6807_v12 = vld [vmem:[%s5695_s29 + $0x70] sm:$0xff] }
 0x14f   : > { %v6741_v4 = vsel %vm1271_vm0, %v1192_v19, %v1191_v16  ;;  %612 = vadd.xlane.f32.xlu0 %v6663_v33  ;;  %632 = vadd.xlane.f32.xlu1 %v482_v46  ;;  %v6754_v19 = vld [vmem:[%s5695_s29 + $0x20] sm:$0xff]  ;;  %v1220_v33 = vperm.slane %v925_v48, %v5960_v37  ;;  %v6767_v16 = vadd.f32 %v2178_v20, %v492_v36  ;;  %v2062_v45 = vrot.slane %v2061_v11, 1 }
 0x150   : > { %8985 = vst [vmem:[#allocation98_spill] sm:$0xff] %v6741_v4  ;;  %652 = vadd.xlane.f32.xlu2 %v492_v36  ;;  %v2022_v61 = vrot.slane %v6754_v19, 4  ;;  %v2007_v46 = vadd.f32 %v2006_v0, %v2005_v9  ;;  %v2001_v4 = vadd.f32 %v2000_v40, %v1999_v28  ;;  %v2067_v20 = vadd.f32 %v2066_v21, %v2065_v32  ;;  %v6781_v40 = vld [vmem:[%s5695_s29 + $0x68] sm:$0xff] }
 0x151   : > { %v1345_v9 = vsel %vm1279_vm4, %v1220_v33, %v1344_v6  ;;  %v2071_v28 = vadd.f32 %v2070_v58, %v6751_v62  ;;  %v2076_v32 = vrot.slane %v6781_v40, 4  ;;  %v483_v21 = vld [vmem:[%s5695_s29 + $0xa8] sm:$0xff]  ;;  %v2019_v33 = vadd.f32 %v2018_v53, %v2017_v59  ;;  %v3097_v58 = vld [vmem:[%s8745_s10 + $0x40] sm:$0xff]  ;;  %8987 = vst [vmem:[#allocation100_spill] sm:$0xff] %v6807_v12  ;;  %v6810_v53 = vld [vmem:[%s5695_s29 + $0xf8] sm:$0xff] }
 0x152   : > { %v751_v38 = vpop.xlane.xlu1 %750  ;;  %v6769_v48 = vpop.xlane.xlu0 %730  ;;  %v2023_v42 = vadd.f32 %v2022_v61, %v6754_v19  ;;  %v3098_v61 = vld [vmem:[%s8745_s10 + $0x48] sm:$0xff]  ;;  %v2008_v55 = vrot.slane %v2007_v46, 1  ;;  %v2002_v51 = vrot.slane %v2001_v4, 1  ;;  %v1346_v27 = vsel %vm1281_vm5, %v1221_v31, %v1345_v9 }
 0x153   : > { %v6771_v13 = vpop.xlane.xlu2 %692  ;;  %v927_v57 = vmul.f32 0.0078125, %v751_v38  ;;  %3192 = vmatpush.msra.mxu3 %v3098_v61  ;;  %v6800_v31 = vadd.f32 %v2062_v45, %v2061_v11  ;;  %v2068_v38 = vrot.slane %v2067_v20, 1  ;;  %v2072_v49 = vrot.slane %v2071_v28, 2  ;;  %v6840_v61 = vld [vmem:[%s5695_s29 + $0x38] sm:$0xff] }
 0x154   : > { %8986 = vst [vmem:[#allocation99_spill] sm:$0xff] %v6771_v13  ;;  %v2024_v0 = vrot.slane %v2023_v42, 2  ;;  %v2082_v45 = vrot.slane %v6807_v12, 4  ;;  %v2009_v34 = vadd.f32 %v2008_v55, %v2007_v46  ;;  %v2003_v11 = vadd.f32 %v2002_v51, %v2001_v4 }
 0x155   : > { %v1222_v36 = vperm.slane %v927_v57, %v5960_v37  ;;  %3193 = vmatpush.msra.mxu3 %v3097_v58  ;;  %v6833_v46 = vmul.f32 0.0078125, %v6658_v52  ;;  %v2014_v55 = vrot.slane %v2013_v30, 1  ;;  %v2020_v51 = vrot.slane %v2019_v33, 1  ;;  %v6837_v57 = vld [vmem:[%s5695_s29 + $0x78] sm:$0xff]  ;;  %8990 = vst [vmem:[#allocation103_spill] sm:$0xff] %v6840_v61 }
 0x156   : > { %v2025_v59 = vadd.f32 %v2024_v0, %v2023_v42  ;;  %v6823_v42 = vld [vmem:[%s5695_s29 + $0xb0] sm:$0xff]  ;;  %v2077_v0 = vadd.f32 %v2076_v32, %v6781_v40  ;;  %8989 = vst [vmem:[#allocation102_spill] sm:$0xff] %v6837_v57  ;;  %v6842_v32 = vadd.f32 %v2068_v38, %v2067_v20  ;;  %v2088_v41 = vrot.slane %v6837_v57, 4 }
 0x157   : > { %594 = vadd.xlane.f32.xlu1 %v6674_v18  ;;  %592 = vadd.xlane.f32.xlu0 %v6677_v60  ;;  %v1347_v6 = vsel %vm1283_vm6, %v1222_v36, %v1346_v27  ;;  %v2124_v18 = vrot.slane %v483_v21, 4  ;;  %v6804_v60 = vld [vmem:[%s5695_s29 + $0x28] sm:$0xff]  ;;  %v3095_v27 = vld [vmem:[%s8745_s10 + $0x30] sm:$0xff]  ;;  %v2130_v58 = vrot.slane %v6823_v42, 4  ;;  %v6848_v52 = vadd.f32 %v2072_v49, %v2071_v28 }
 0x158   : > { %614 = vadd.xlane.f32.xlu2 %v6692_v5  ;;  %1412 = vmatpush.msra.mxu0 %v1347_v6  ;;  %v2028_v26 = vrot.slane %v6804_v60, 4  ;;  %v3096_v5 = vld [vmem:[%s8745_s10 + $0x38] sm:$0xff]  ;;  %v6830_v6 = vld [vmem:[%s5695_s29 + $0x30] sm:$0xff]  ;;  %v2026_v54 = vrot.slane %v2025_v59, 1  ;;  %v2083_v22 = vadd.f32 %v2082_v45, %v6807_v12  ;;  %v2894_v38 = vsel %vm1271_vm0, %v2009_v34, %v2003_v11 }
 0x159   : > { %8988 = vst [vmem:[#allocation101_spill] sm:$0xff] %v6830_v6  ;;  %3194 = vmatpush.msra.mxu3 %v3096_v5  ;;  %v6844_v13 = vadd.f32 %v2124_v18, %v483_v21  ;;  %v3094_v5 = vld [vmem:[%s8745_s10 + $0x28] sm:$0xff]  ;;  %v2034_v20 = vrot.slane %v6830_v6, 4  ;;  %v2078_v18 = vrot.slane %v2077_v0, 2  ;;  %v2040_v63 = vrot.slane %v6840_v61, 4 }
 0x15a   : > { %v6817_v36 = vpop.xlane.xlu1 %732  ;;  %v6819_v9 = vpop.xlane.xlu0 %712  ;;  %v2029_v1 = vadd.f32 %v2028_v26, %v6804_v60  ;;  %v2015_v28 = vadd.f32 %v2014_v55, %v2013_v30  ;;  %v2021_v49 = vadd.f32 %v2020_v51, %v2019_v33  ;;  %v6859_v45 = vadd.f32 %v2130_v58, %v6823_v42  ;;  %v3092_v51 = vld [vmem:[%s8745_s10 + $0x18] sm:$0xff] }
 0x15b   : > { %v673_v4 = vpop.xlane.xlu2 %672  ;;  %3195 = vmatpush.msra.mxu3 %v3095_v27  ;;  %v6862_v27 = vld [vmem:[%s5695_s29 + $0xb8] sm:$0xff]  ;;  %v2089_v11 = vadd.f32 %v2088_v41, %v6837_v57  ;;  %v2074_v33 = vrot.slane %v6848_v52, 1  ;;  %v2084_v55 = vrot.slane %v2083_v22, 2  ;;  %v2041_v58 = vadd.f32 %v2040_v63, %v6840_v61  ;;  %v3091_v63 = vld [vmem:[%s8745_s10 + $0x10] sm:$0xff] }
 0x15c   : > { %v2030_v2 = vrot.slane %v2029_v1, 2  ;;  %v888_v26 = vmul.f32 0.0078125, %v673_v4  ;;  %v2136_v34 = vrot.slane %v6862_v27, 4  ;;  %v2027_v4 = vadd.f32 %v2026_v54, %v2025_v59 }
 0x15d   : > { %3196 = vmatpush.msra.mxu3 %v3094_v5  ;;  %v2090_v61 = vrot.slane %v2089_v11, 2  ;;  %v1211_v12 = vperm.slane %v6833_v46, %v5960_v37 }
 0x15e   : > { %v2031_v30 = vadd.f32 %v2030_v2, %v2029_v1  ;;  %v2079_v1 = vadd.f32 %v2078_v18, %v2077_v0  ;;  %v2085_v18 = vadd.f32 %v2084_v55, %v2083_v22  ;;  %v3089_v22 = vld [vmem:[%s8745_s10] sm:$0xff] }
 0x15f   : > { %654 = vadd.xlane.f32.xlu1 %v6810_v53  ;;  %634 = vadd.xlane.f32.xlu0 %v483_v21  ;;  %v2035_v21 = vadd.f32 %v2034_v20, %v6830_v6  ;;  %v1183_v20 = vperm.slane %v888_v26, %v5960_v37  ;;  %v2042_v6 = vrot.slane %v2041_v58, 2  ;;  %v2091_v55 = vadd.f32 %v2090_v61, %v2089_v11 }
 0x160   : > { %596 = vadd.xlane.f32.xlu2 %v6719_v24  ;;  %v6877_v24 = vmul.f32 0.0078125, %v6769_v48  ;;  %v2032_v2 = vrot.slane %v2031_v30, 1  ;;  %3197 = vmatpush.msra.mxu3 %v3093_v56  ;;  %v2895_v48 = vsel %vm1273_vm1, %v2015_v28, %v2894_v38  ;;  %v918_v38 = vmul.f32 0.0078125, %v6817_v36 }
 0x161   : > { %v2036_v5 = vrot.slane %v2035_v21, 2  ;;  %v2896_v0 = vsel %vm1275_vm2, %v2021_v49, %v2895_v48  ;;  %v2043_v26 = vadd.f32 %v2042_v6, %v2041_v58  ;;  %v2080_v28 = vrot.slane %v2079_v1, 1 }
 0x162   : > { %v6879_v15 = vpop.xlane.xlu1 %694  ;;  %v675_v41 = vpop.xlane.xlu0 %674  ;;  %v2033_v43 = vadd.f32 %v2032_v2, %v2031_v30  ;;  %3198 = vmatpush.msra.mxu3 %v3092_v51  ;;  %v2897_v57 = vsel %vm1277_vm3, %v2027_v4, %v2896_v0  ;;  %v2126_v49 = vrot.slane %v6844_v13, 2  ;;  %v2132_v36 = vrot.slane %v6859_v45, 2 }
 0x163   : > { %8991 = vst [vmem:[#allocation104_spill] sm:$0xff] %v6879_v15  ;;  %v889_v54 = vmul.f32 0.0078125, %v675_v41  ;;  %v6882_v59 = vpop.xlane.xlu2 %714  ;;  %v2037_v15 = vadd.f32 %v2036_v5, %v2035_v21  ;;  %v3090_v41 = vld [vmem:[%s8745_s10 + $0x8] sm:$0xff]  ;;  %v2044_v6 = vrot.slane %v2043_v26, 1  ;;  %v2137_v4 = vadd.f32 %v2136_v34, %v6862_v27 }
 0x164   : > { %3199 = vmatpush.msra.mxu3 %v3091_v63  ;;  %v2898_v46 = vsel %vm1279_vm4, %v2033_v43, %v2897_v57  ;;  %v2086_v58 = vrot.slane %v2085_v18, 1  ;;  %v1337_v5 = vsel %vm1277_vm3, %v1211_v12, %v6798_v35  ;;  %v1213_v43 = vperm.slane %v918_v38, %v5960_v37 }
 0x165   : > { %v1184_v56 = vperm.slane %v889_v54, %v5960_v37  ;;  %v2038_v30 = vrot.slane %v2037_v15, 1  ;;  %v2045_v2 = vadd.f32 %v2044_v6, %v2043_v26  ;;  %v2902_v35 = vsel %vm1273_vm1, %v6800_v31, %v6705_v47 }
 0x166   : > { %3200 = vmatpush.msra.mxu3 %v3090_v41  ;;  %v2133_v12 = vadd.f32 %v2132_v36, %v6859_v45  ;;  %v2087_v63 = vadd.f32 %v2086_v58, %v2085_v18  ;;  %v2122_v0 = vrot.slane %v6775_v3, 1  ;;  %v2218_v38 = vrot.slane %v6653_v8, 1 }
 0x167   : > { %v6899_v21 = vsel %vm1271_vm0, %v1184_v56, %v1183_v20  ;;  %636 = vadd.xlane.f32.xlu1 %v6823_v42  ;;  %616 = vadd.xlane.f32.xlu0 %v6751_v62  ;;  %v2039_v51 = vadd.f32 %v2038_v30, %v2037_v15  ;;  %v1212_v42 = vperm.slane %v6877_v24, %v5960_v37  ;;  %v2092_v24 = vrot.slane %v2091_v55, 1 }
 0x168   : > { %598 = vadd.xlane.f32.xlu2 %v6722_v10  ;;  %v2075_v62 = vadd.f32 %v2074_v33, %v6848_v52  ;;  %v2081_v20 = vadd.f32 %v2080_v28, %v2079_v1  ;;  %3201 = vmatpush.msra.mxu3 %v3089_v22  ;;  %v2127_v15 = vadd.f32 %v2126_v49, %v6844_v13  ;;  %v2138_v33 = vrot.slane %v2137_v4, 2 }
 0x169   : > { %v2899_v61 = vsel %vm1281_vm5, %v2039_v51, %v2898_v46  ;;  %v2903_v1 = vsel %vm1275_vm2, %v6842_v32, %v2902_v35  ;;  %v1338_v54 = vsel %vm1279_vm4, %v1212_v42, %v1337_v5  ;;  %v2093_v31 = vadd.f32 %v2092_v24, %v2091_v55 }
 0x16a   : > { %v6916_v10 = vpop.xlane.xlu1 %676  ;;  %v735_v57 = vpop.xlane.xlu0 %734  ;;  %v6923_v52 = vsel %vm1283_vm6, %v2045_v2, %v2899_v61  ;;  %v2904_v48 = vsel %vm1277_vm3, %v2075_v62, %v2903_v1  ;;  %v1339_v47 = vsel %vm1281_vm5, %v1213_v43, %v1338_v54  ;;  %v8992_v56 = vrot.slane %v6810_v53, 4 }
 0x16b   : > { %v919_v34 = vmul.f32 0.0078125, %v735_v57  ;;  %v6920_v11 = vpop.xlane.xlu2 %696  ;;  %3202 = vmatmul.f32.vlgmr.msra.gmra.mxu3 %v6923_v52  ;;  %v2905_v45 = vsel %vm1279_vm4, %v2081_v20, %v2904_v48  ;;  %v2128_v41 = vrot.slane %v2127_v15, 1  ;;  %v8993_v28 = vrot.slane %v6636_v39, 4  ;;  %v3087_v48 = vld [vmem:[%s8744_s9 + $0x70] sm:$0xff] }
 0x16c   : > { %v2185_v26 = vadd.f32 %v8992_v56, %v6810_v53  ;;  %v2906_v18 = vsel %vm1281_vm5, %v2087_v63, %v2905_v45  ;;  %v8994_v49 = vrot.slane %v6714_v23, 1  ;;  %v2170_v22 = vrot.slane %v6687_v14, 1  ;;  %v8998_v63 = vld [vmem:[#allocation102_spill] sm:$0xff] }
 0x16d   : > { %v1214_v13 = vperm.slane %v919_v34, %v5960_v37  ;;  %v6949_v30 = vadd.f32 %v8993_v28, %v6636_v39  ;;  %v8995_v6 = vrot.slane %v6671_v44, 4  ;;  %v2134_v39 = vrot.slane %v2133_v12, 1 }
 0x16e   : > { %v2117_v53 = vadd.f32 %v8994_v49, %v6714_v23  ;;  %v6965_v36 = vsel %vm1283_vm6, %v2093_v31, %v2906_v18  ;;  %v906_v23 = vmul.f32 0.0078125, %v6656_v17  ;;  %v2123_v51 = vadd.f32 %v2122_v0, %v6775_v3 }
 0x16f   : > { %638 = vadd.xlane.f32.xlu1 %v6862_v27  ;;  %618 = vadd.xlane.f32.xlu0 %v6781_v40  ;;  %v1340_v32 = vsel %vm1283_vm6, %v1214_v13, %v1339_v47  ;;  %v2139_v27 = vadd.f32 %v2138_v33, %v2137_v4  ;;  %v3088_v40 = vld [vmem:[%s8744_s9 + $0x78] sm:$0xff]  ;;  %v6962_v46 = vadd.f32 %v8995_v6, %v6671_v44  ;;  %v8996_v4 = vrot.slane %v6767_v16, 2 }
 0x170   : > { %600 = vadd.xlane.f32.xlu2 %v6754_v19  ;;  %1413 = vmatpush.msra.mxu0 %v1340_v32  ;;  %v2176_v19 = vrot.slane %v6731_v25, 1  ;;  %v2186_v44 = vrot.slane %v2185_v26, 2  ;;  %v2129_v58 = vadd.f32 %v2128_v41, %v2127_v15  ;;  %v2909_v43 = vsel %vm1273_vm1, %v6702_v7, %v6685_v29  ;;  %v9000_v32 = vld [vmem:[#allocation92_spill] sm:$0xff] }
 0x171   : > { %5063 = vmatpush.msra.mxu2 %v3088_v40  ;;  %v6972_v55 = vadd.f32 %v8996_v4, %v6767_v16  ;;  %v907_v17 = vmul.f32 0.0078125, %v6724_v50  ;;  %v2140_v20 = vrot.slane %v2139_v27, 1  ;;  %v2910_v16 = vsel %vm1275_vm2, %v2117_v53, %v2909_v43  ;;  %v9001_v40 = vld [vmem:[#allocation93_spill] sm:$0xff]  ;;  %v3084_v43 = vld [vmem:[%s8744_s9 + $0x58] sm:$0xff] }
 0x172   : > { %v717_v42 = vpop.xlane.xlu0 %716  ;;  %v657_v62 = vpop.xlane.xlu1 %656  ;;  %v908_v3 = vmul.f32 0.0078125, %v6819_v9  ;;  %v2135_v34 = vadd.f32 %v2134_v39, %v2133_v12  ;;  %v909_v15 = vmul.f32 0.0078125, %v6882_v59  ;;  %v5549_v33 = vmov 0   ;;  %v8997_v9 = vld [vmem:[#allocation100_spill] sm:$0xff] }
 0x173   : > { %v659_v2 = vpop.xlane.xlu2 %658  ;;  %v880_v5 = vmul.f32 0.0078125, %v657_v62  ;;  %3205 = vmatmul.f32.gmra.mxu3 %v6965_v36  ;;  %5167 = vset.pattern.permute.xlu2 %v5549_v33  ;;  %v2141_v29 = vadd.f32 %v2140_v20, %v2139_v27  ;;  %v2911_v7 = vsel %vm1277_vm3, %v2123_v51, %v2910_v16  ;;  %v1201_v50 = vperm.slane %v906_v23, %v5960_v37 }
 0x174   : > { %v881_v57 = vmul.f32 0.0078125, %v659_v2  ;;  %5169 = vset.pattern.permute.xlu1 %v5549_v33  ;;  %v2187_v24 = vadd.f32 %v2186_v44, %v2185_v26  ;;  %v910_v1 = vmul.f32 0.0078125, %v717_v42  ;;  %v2912_v12 = vsel %vm1279_vm4, %v2129_v58, %v2911_v7  ;;  %5168 = vset.pattern.permute.xlu0 %v5549_v33  ;;  %v8999_v26 = vld [vmem:[#allocation96_spill] sm:$0xff]  ;;  %v9004_v44 = vld [vmem:[#allocation97_spill] sm:$0xff] }
 0x175   : > { %v1175_v61 = vperm.slane %v880_v5, %v5960_v37  ;;  %v2228_v59 = vrot.slane %v6949_v30, 2  ;;  %v1202_v13 = vperm.slane %v907_v17, %v5960_v37  ;;  %v2913_v0 = vsel %vm1281_vm5, %v2135_v34, %v2912_v12  ;;  %5064 = vmatpush.msra.mxu2 %v3087_v48  ;;  %v9005_v34 = vld [vmem:[#allocation31_spill] sm:$0xff] }
 0x176   : > { %v1176_v35 = vperm.slane %v881_v57, %v5960_v37  ;;  %v2171_v47 = vadd.f32 %v2170_v22, %v6687_v14  ;;  %v2182_v31 = vrot.slane %v6972_v55, 1  ;;  %v1203_v45 = vperm.slane %v908_v3, %v5960_v37  ;;  %v3085_v14 = vld [vmem:[%s8744_s9 + $0x60] sm:$0xff] }
 0x177   : > { %602 = vadd.xlane.f32.xlu1 %v6804_v60  ;;  %620 = vadd.xlane.f32.xlu0 %v8997_v9  ;;  %v3086_v60 = vld [vmem:[%s8744_s9 + $0x68] sm:$0xff]  ;;  %v7007_v56 = vsel %vm1283_vm6, %v2141_v29, %v2913_v0  ;;  %v2224_v41 = vrot.slane %v8999_v26, 1  ;;  %v2280_v18 = vrot.slane %v9000_v32, 4  ;;  %v2177_v28 = vadd.f32 %v2176_v19, %v6731_v25  ;;  %v9003_v19 = vld [vmem:[#allocation94_spill] sm:$0xff]  ;;  %v9008_v29 = vld [vmem:[#allocation101_spill] sm:$0xff] }
 0x178   : > { %v6993_v54 = vsel %vm1271_vm0, %v1176_v35, %v1175_v61  ;;  %622 = vadd.xlane.f32.xlu2 %v8998_v63  ;;  %v1204_v49 = vperm.slane %v909_v15, %v5960_v37  ;;  %v1328_v22 = vsel %vm1273_vm1, %v1201_v50, %v9001_v40  ;;  %v2234_v6 = vrot.slane %v6962_v46, 2  ;;  %5065 = vmatpush.msra.mxu2 %v3086_v60  ;;  %v9002_v25 = vld [vmem:[#allocation44_spill] sm:$0xff]  ;;  %v9006_v15 = vld [vmem:[#allocation27_spill] sm:$0xff]  ;;  %v7051_v50 = vld [vmem:[%s8744_s9 + $0x50] sm:$0xff] }
 0x179   : > { %v1205_v39 = vperm.slane %v910_v1, %v5960_v37  ;;  %v2916_v4 = vsel %vm1273_vm1, %v9003_v19, %v9002_v25  ;;  %v1329_v51 = vsel %vm1275_vm2, %v1202_v13, %v1328_v22  ;;  %v2188_v62 = vrot.slane %v2187_v24, 1  ;;  %v9010_v1 = vld [vmem:[#allocation87_spill] sm:$0xff]  ;;  %v9018_v25 = vld [vmem:[#allocation32_spill] sm:$0xff] }
 0x17a   : > { %v7013_v53 = vpop.xlane.xlu0 %678  ;;  %v7015_v27 = vpop.xlane.xlu1 %698  ;;  %v2917_v58 = vsel %vm1275_vm2, %v9004_v44, %v2916_v4  ;;  %v2229_v2 = vadd.f32 %v2228_v59, %v6949_v30  ;;  %v1330_v5 = vsel %vm1277_vm3, %v1203_v45, %v1329_v51  ;;  %5066 = vmatpush.msra.mxu2 %v3085_v14  ;;  %v2183_v17 = vadd.f32 %v2182_v31, %v6972_v55  ;;  %v9009_v55 = vld [vmem:[#allocation103_spill] sm:$0xff]  ;;  %v7067_v31 = vld [vmem:[%s8744_s9 + $0x48] sm:$0xff]  ;;  %v9021_v44 = vld [vmem:[#allocation90_spill] sm:$0xff] }
 0x17b   : > { %v719_v23 = vpop.xlane.xlu2 %718  ;;  %3208 = vmatmul.f32.gmra.mxu3 %v7007_v56  ;;  %v2918_v57 = vsel %vm1277_vm3, %v2171_v47, %v2917_v58  ;;  %v1331_v16 = vsel %vm1279_vm4, %v1204_v49, %v1330_v5  ;;  %v2189_v3 = vadd.f32 %v2188_v62, %v2187_v24  ;;  %v2318_v30 = vrot.slane %v9005_v34, 2  ;;  %v9012_v48 = vld [vmem:[#allocation95_spill] sm:$0xff]  ;;  %v9015_v49 = vld [vmem:[#allocation89_spill] sm:$0xff] }
 0x17c   : > { %v911_v42 = vmul.f32 0.0078125, %v719_v23  ;;  %v2919_v61 = vsel %vm1279_vm4, %v2177_v28, %v2918_v57  ;;  %v9007_v35 = vrot.slane %v9006_v15, 1  ;;  %v1332_v7 = vsel %vm1281_vm5, %v1205_v39, %v1331_v16  ;;  %5067 = vmatpush.msra.mxu2 %v3084_v43  ;;  %v5363_v23 = vld [vmem:[%s5695_s29 + $0x1f8] sm:$0xff]  ;;  %v9022_v57 = vld [vmem:[#allocation91_spill] sm:$0xff] }
 0x17d   : > { %v2920_v24 = vsel %vm1281_vm5, %v2183_v17, %v2919_v61  ;;  %v9011_v9 = vrot.slane %v9010_v1, 1  ;;  %v2281_v59 = vadd.f32 %v2280_v18, %v9000_v32  ;;  %v2235_v13 = vadd.f32 %v2234_v6, %v6962_v46  ;;  %v9014_v46 = vld [vmem:[#allocation86_spill] sm:$0xff]  ;;  %v9017_v6 = vld [vmem:[#allocation88_spill] sm:$0xff] }
 0x17e   : > { %v1206_v20 = vperm.slane %v911_v42, %v5960_v37  ;;  %v2207_v33 = vadd.f32 %v9007_v35, %v9006_v15  ;;  %v2276_v60 = vrot.slane %v9012_v48, 2  ;;  %v2219_v0 = vadd.f32 %v2218_v38, %v6653_v8  ;;  %v5362_v18 = vld [vmem:[%s5695_s29 + $0x1b8] sm:$0xff]  ;;  %5068 = vmatpush.msra.mxu2 %v7051_v50 }
 0x17f   : > { %604 = vadd.xlane.f32.xlu0 %v9008_v29  ;;  %606 = vadd.xlane.f32.xlu1 %v9009_v55  ;;  %v2213_v12 = vadd.f32 %v9011_v9, %v9010_v1  ;;  %v2230_v47 = vrot.slane %v2229_v2, 1  ;;  %v7070_v45 = vsel %vm1283_vm6, %v2189_v3, %v2920_v24  ;;  %v2372_v32 = vrot.slane %v9014_v46, 2  ;;  %v7108_v3 = vld [vmem:[%s8744_s9 + $0x38] sm:$0xff]  ;;  %v9023_v29 = vld [vmem:[#allocation81_spill] sm:$0xff] }
 0x180   : > { %v1333_v63 = vsel %vm1283_vm6, %v1206_v20, %v1332_v7  ;;  %9013 = vst [vmem:[#allocation100_spill] sm:$0xff] %v7070_v45  ;;  %v2328_v28 = vrot.slane %v5362_v18, 4  ;;  %v9016_v14 = vrot.slane %v9015_v49, 2  ;;  %v2225_v8 = vadd.f32 %v2224_v41, %v8999_v26  ;;  %v7095_v26 = vld [vmem:[%s8744_s9 + $0x40] sm:$0xff]  ;;  %v9020_v41 = vld [vmem:[#allocation61_spill] sm:$0xff]  ;;  %5069 = vmatpush.msra.mxu2 %v7067_v31  ;;  %v9025_v24 = vld [vmem:[#allocation78_spill] sm:$0xff] }
 0x181   : > { %1414 = vmatpush.msra.mxu0 %v1333_v63  ;;  %v2260_v39 = vrot.slane %v9017_v6, 1  ;;  %v9019_v19 = vrot.slane %v9018_v25, 4  ;;  %v7090_v51 = vadd.f32 %v2318_v30, %v9005_v34  ;;  %v2923_v62 = vsel %vm1273_vm1, %v2207_v33, %v9020_v41  ;;  %v9031_v41 = vld [vmem:[#allocation104_spill] sm:$0xff] }
 0x182   : > { %v2271_v40 = vadd.f32 %v9016_v14, %v9015_v49  ;;  %v7078_v38 = vpop.xlane.xlu0 %660  ;;  %v7080_v22 = vpop.xlane.xlu1 %680  ;;  %v2324_v58 = vrot.slane %v9021_v44, 2  ;;  %v2282_v5 = vrot.slane %v2281_v59, 2  ;;  %v2236_v43 = vrot.slane %v2235_v13, 1  ;;  %5070 = vmatpush.msra.mxu2 %v7095_v26 }
 0x183   : > { %v7087_v4 = vadd.f32 %v5363_v23, %v9019_v19  ;;  %v701_v42 = vpop.xlane.xlu2 %700  ;;  %3211 = vmatmul.f32.gmra.mxu3 %v7070_v45  ;;  %v2924_v17 = vsel %vm1275_vm2, %v2213_v12, %v2923_v62  ;;  %v2266_v20 = vrot.slane %v9022_v57, 1  ;;  %v2277_v16 = vadd.f32 %v2276_v60, %v9012_v48  ;;  %v9027_v12 = vld [vmem:[#allocation84_spill] sm:$0xff] }
 0x184   : > { %v2231_v61 = vadd.f32 %v2230_v47, %v2229_v2  ;;  %v2925_v34 = vsel %vm1277_vm3, %v2219_v0, %v2924_v17  ;;  %v2329_v30 = vadd.f32 %v5362_v18, %v2328_v28  ;;  %v2272_v15 = vrot.slane %v2271_v40, 1  ;;  %5071 = vmatpush.msra.mxu2 %v7108_v3 }
 0x185   : > { %v2237_v35 = vadd.f32 %v2236_v43, %v2235_v13  ;;  %v2926_v33 = vsel %vm1279_vm4, %v2225_v8, %v2925_v34  ;;  %v9024_v7 = vrot.slane %v9023_v29, 1  ;;  %v9026_v1 = vrot.slane %v9025_v24, 2  ;;  %v7129_v13 = vld [vmem:[%s8744_s9 + $0x30] sm:$0xff]  ;;  %v7143_v8 = vld [vmem:[%s8744_s9 + $0x28] sm:$0xff] }
 0x186   : > { %v9028_v2 = vrot.slane %v9027_v12, 1  ;;  %v2927_v48 = vsel %vm1281_vm5, %v2231_v61, %v2926_v33  ;;  %v7133_v60 = vadd.f32 %v2372_v32, %v9014_v46  ;;  %v2261_v0 = vadd.f32 %v2260_v39, %v9017_v6  ;;  %v9030_v39 = vld [vmem:[#allocation99_spill] sm:$0xff]  ;;  %5072 = vmatpush.msra.mxu2 %v7129_v13 }
 0x187   : > { %v2255_v55 = vadd.f32 %v9024_v7, %v9023_v29  ;;  %v7119_v9 = vadd.f32 %v9026_v1, %v9025_v24  ;;  %v2378_v47 = vrot.slane %v7087_v4, 2  ;;  %v2283_v18 = vadd.f32 %v2282_v5, %v2281_v59  ;;  %v591_v33 = vld [vmem:[%s8737_s2] sm:$0xff] }
 0x188   : > { %v7124_v63 = vadd.f32 %v9028_v2, %v9027_v12  ;;  %v2320_v28 = vrot.slane %v7090_v51, 1  ;;  %v2267_v49 = vadd.f32 %v2266_v20, %v9022_v57  ;;  %v2278_v14 = vrot.slane %v2277_v16, 1  ;;  %v7159_v57 = vld [vmem:[%s8744_s9 + $0x20] sm:$0xff]  ;;  %5073 = vmatpush.msra.mxu2 %v7143_v8 }
 0x189   : > { %v7146_v46 = vsel %vm1283_vm6, %v2237_v35, %v2927_v48  ;;  %v7149_v32 = vadd.f32 %v2324_v58, %v9021_v44  ;;  %v2330_v6 = vrot.slane %v2329_v30, 2  ;;  %v2273_v59 = vadd.f32 %v2272_v15, %v2271_v40  ;;  %v9032_v44 = vld [vmem:[#allocation53_spill] sm:$0xff] }
 0x18a   : > { %9029 = vst [vmem:[#allocation102_spill] sm:$0xff] %v7146_v46  ;;  %v898_v23 = vmul.f32 0.0078125, %v9030_v39  ;;  %v643_v25 = vpop.xlane.xlu1 %642  ;;  %v641_v19 = vpop.xlane.xlu0 %640  ;;  %v899_v62 = vmul.f32 0.0078125, %v9031_v41  ;;  %v2930_v40 = vsel %vm1273_vm1, %v2255_v55, %v9032_v44  ;;  %v900_v58 = vmul.f32 0.0078125, %v6920_v11  ;;  %v7176_v11 = vld [vmem:[%s8744_s9 + $0x18] sm:$0xff]  ;;  %5074 = vmatpush.msra.mxu2 %v7159_v57 }
 0x18b   : > { %v7154_v5 = vpop.xlane.xlu2 %662  ;;  %v873_v43 = vmul.f32 0.0078125, %v643_v25  ;;  %v872_v17 = vmul.f32 0.0078125, %v641_v19  ;;  %v901_v20 = vmul.f32 0.0078125, %v7015_v27  ;;  %3214 = vmatmul.f32.gmra.mxu3 %v7146_v46  ;;  %v2284_v61 = vrot.slane %v2283_v18, 1  ;;  %v9037_v25 = vld [vmem:[#allocation70_spill] sm:$0xff] }
 0x18c   : > { %v2931_v34 = vsel %vm1275_vm2, %v2261_v0, %v2930_v40  ;;  %v2279_v27 = vadd.f32 %v2278_v14, %v2277_v16  ;;  %v1193_v7 = vperm.slane %v898_v23, %v5960_v37  ;;  %v902_v55 = vmul.f32 0.0078125, %v701_v42  ;;  %5075 = vmatpush.msra.mxu2 %v7176_v11  ;;  %v7193_v42 = vld [vmem:[%s8744_s9 + $0x10] sm:$0xff]  ;;  %v9038_v41 = vld [vmem:[#allocation98_spill] sm:$0xff] }
 0x18d   : > { %v1168_v15 = vperm.slane %v873_v43, %v5960_v37  ;;  %v1167_v35 = vperm.slane %v872_v17, %v5960_v37  ;;  %v2932_v29 = vsel %vm1277_vm3, %v2267_v49, %v2931_v34  ;;  %v2285_v24 = vadd.f32 %v2284_v61, %v2283_v18  ;;  %v9036_v23 = vld [vmem:[#allocation25_spill] sm:$0xff] }
 0x18e   : > { %v2933_v1 = vsel %vm1279_vm4, %v2273_v59, %v2932_v29  ;;  %v2321_v12 = vadd.f32 %v2320_v28, %v7090_v51  ;;  %v1194_v2 = vperm.slane %v899_v62, %v5960_v37  ;;  %v2331_v16 = vadd.f32 %v2330_v6, %v2329_v30  ;;  %v7204_v30 = vld [vmem:[%s8744_s9 + $0x8] sm:$0xff]  ;;  %v9034_v6 = vld [vmem:[#allocation75_spill] sm:$0xff]  ;;  %5076 = vmatpush.msra.mxu2 %v7193_v42  ;;  %v9041_v29 = vld [vmem:[#allocation38_spill] sm:$0xff] }
 0x18f   : > { %v7185_v48 = vsel %vm1271_vm0, %v1168_v15, %v1167_v35  ;;  %v2934_v0 = vsel %vm1281_vm5, %v2279_v27, %v2933_v1  ;;  %v1195_v49 = vperm.slane %v900_v58, %v5960_v37  ;;  %v2428_v18 = vrot.slane %v7119_v9, 1  ;;  %v9039_v58 = vld [vmem:[#allocation47_spill] sm:$0xff] }
 0x190   : > { %1010 = vperm.xlu2 %5167, %v591_v33   ;;  %v7196_v51 = vsel %vm1283_vm6, %v2285_v24, %v2934_v0  ;;  %v2326_v28 = vrot.slane %v7149_v32, 1  ;;  %v1196_v14 = vperm.slane %v901_v20, %v5960_v37  ;;  %v9035_v59 = vrot.slane %v9034_v6, 1  ;;  %v7227_v35 = vld [vmem:[%s8744_s9] sm:$0xff]  ;;  %v9040_v33 = vld [vmem:[#allocation76_spill] sm:$0xff]  ;;  %5077 = vmatpush.msra.mxu2 %v7204_v30  ;;  %v9043_v24 = vld [vmem:[#allocation82_spill] sm:$0xff] }
 0x191   : > { %9033 = vst [vmem:[#allocation96_spill] sm:$0xff] %v7196_v51  ;;  %v2951_v19 = vsel %vm1273_vm1, %v9037_v25, %v9036_v23  ;;  %v1321_v62 = vsel %vm1273_vm1, %v1193_v7, %v9038_v41  ;;  %v1197_v43 = vperm.slane %v902_v55, %v5960_v37  ;;  %v2429_v40 = vadd.f32 %v2428_v18, %v7119_v9  ;;  %v9042_v7 = vld [vmem:[#allocation79_spill] sm:$0xff]  ;;  %v9044_v0 = vld [vmem:[#allocation85_spill] sm:$0xff] }
 0x192   : > { %v2423_v39 = vadd.f32 %v9035_v59, %v9034_v6  ;;  %v703_v17 = vpop.xlane.xlu1 %702  ;;  %v7215_v44 = vpop.xlane.xlu0 %682  ;;  %v2952_v20 = vsel %vm1275_vm2, %v9039_v58, %v2951_v19  ;;  %v1322_v61 = vsel %vm1275_vm2, %v1194_v2, %v1321_v62  ;;  %v2937_v9 = vsel %vm1273_vm1, %v9042_v7, %v9041_v29  ;;  %v994_v23 = vld [vmem:[%s8739_s4 + $0x10] sm:$0xff]  ;;  %5078 = vmatpush.msra.mxu2 %v7227_v35 }
 0x193   : > { %v7222_v34 = vpop.xlane.xlu2 %644  ;;  %v903_v15 = vmul.f32 0.0078125, %v703_v17  ;;  %v2953_v27 = vsel %vm1277_vm3, %v9040_v33, %v2952_v20  ;;  %v1323_v55 = vsel %vm1277_vm3, %v1195_v49, %v1322_v61  ;;  %3217 = vmatmul.f32.gmra.mxu3 %v7196_v51  ;;  %v2332_v2 = vrot.slane %v2331_v16, 1  ;;  %v9047_v61 = vld [vmem:[#allocation83_spill] sm:$0xff]  ;;  %v9050_v33 = vld [vmem:[#allocation80_spill] sm:$0xff] }
 0x194   : > { %v2954_v1 = vsel %vm1279_vm4, %v9043_v24, %v2953_v27  ;;  %v2938_v18 = vsel %vm1275_vm2, %v9044_v0, %v2937_v9  ;;  %v1324_v59 = vsel %vm1279_vm4, %v1196_v14, %v1323_v55  ;;  %v2327_v25 = vadd.f32 %v2326_v28, %v7149_v32  ;;  %v9045_v14 = vld [vmem:[#allocation42_spill] sm:$0xff]  ;;  %v9048_v28 = vld [vmem:[#allocation73_spill] sm:$0xff]  ;;  %v9054_v24 = vld [vmem:[#allocation23_spill] sm:$0xff] }
 0x195   : > { %v1198_v6 = vperm.slane %v903_v15, %v5960_v37  ;;  %v2955_v49 = vsel %vm1281_vm5, %v2423_v39, %v2954_v1  ;;  %v1325_v19 = vsel %vm1281_vm5, %v1197_v43, %v1324_v59  ;;  %v2333_v62 = vadd.f32 %v2332_v2, %v2331_v16  ;;  %v9055_v1 = vld [vmem:[#allocation26_spill] sm:$0xff]  ;;  %v9057_v0 = vld [vmem:[#allocation77_spill] sm:$0xff]  ;;  %v9079_v51 = vld [vmem:[#allocation59_spill] sm:$0xff] }
 0x196   : > { %v7251_v41 = vsel %vm1283_vm6, %v2429_v40, %v2955_v49  ;;  %v2939_v17 = vsel %vm1277_vm3, %v7124_v63, %v2938_v18  ;;  %v9046_v58 = vrot.slane %v9045_v14, 1  ;;  %v2368_v15 = vrot.slane %v9047_v61, 1 }
 0x197   : > { %v1326_v39 = vsel %vm1283_vm6, %v1198_v6, %v1325_v19  ;;  %3145 = vmatmul.f32.vlgmr.msra.gmra.mxu2 %v7251_v41  ;;  %v2940_v32 = vsel %vm1279_vm4, %v2321_v12, %v2939_v17  ;;  %v9049_v43 = vrot.slane %v9048_v28, 1  ;;  %v2379_v63 = vadd.f32 %v2378_v47, %v7087_v4  ;;  %v9052_v12 = vld [vmem:[#allocation43_spill] sm:$0xff]  ;;  %v9056_v4 = vld [vmem:[#allocation37_spill] sm:$0xff] }
 0x198   : > { %v2351_v20 = vadd.f32 %v9046_v58, %v9045_v14  ;;  %1415 = vmatpush.msra.mxu0 %v1326_v39  ;;  %1443 = vperm.xlu2 %5167, %v994_v23   ;;  %v2941_v16 = vsel %vm1281_vm5, %v2327_v25, %v2940_v32  ;;  %v2476_v27 = vrot.slane %v9050_v33, 1  ;;  %v2374_v29 = vrot.slane %v7133_v60, 1  ;;  %v9059_v25 = vld [vmem:[#allocation68_spill] sm:$0xff]  ;;  %v9060_v17 = vld [vmem:[#allocation29_spill] sm:$0xff] }
 0x199   : > { %v2357_v40 = vadd.f32 %v9049_v43, %v9048_v28  ;;  %v7272_v7 = vsel %vm1283_vm6, %v2333_v62, %v2941_v16  ;;  %v9053_v9 = vrot.slane %v9052_v12, 1  ;;  %v2958_v2 = vsel %vm1273_vm1, %v9055_v1, %v9054_v24  ;;  %v5364_v62 = vld [vmem:[%s5695_s29 + $0x2f8] sm:$0xff]  ;;  %v9062_v28 = vld [vmem:[#allocation71_spill] sm:$0xff]  ;;  %v9063_v16 = vld [vmem:[#allocation28_spill] sm:$0xff] }
 0x19a   : > { %9051 = vst [vmem:[#allocation92_spill] sm:$0xff] %v7272_v7  ;;  %v2506_v47 = vrot.slane %v9056_v4, 1  ;;  %v9058_v18 = vrot.slane %v9057_v0, 1  ;;  %v685_v59 = vpop.xlane.xlu1 %684  ;;  %v7284_v23 = vpop.xlane.xlu0 %664  ;;  %v2477_v49 = vadd.f32 %v2476_v27, %v9050_v33  ;;  %v2959_v19 = vsel %vm1275_vm2, %v9059_v25, %v2958_v2  ;;  %v9065_v33 = vld [vmem:[#allocation74_spill] sm:$0xff] }
 0x19b   : > { %v2471_v55 = vadd.f32 %v9053_v9, %v9052_v12  ;;  %v9061_v14 = vrot.slane %v9060_v17, 4  ;;  %v2369_v39 = vadd.f32 %v2368_v15, %v9047_v61  ;;  %v7293_v32 = vpop.xlane.xlu2 %624  ;;  %v2960_v43 = vsel %vm1277_vm3, %v9062_v28, %v2959_v19  ;;  %v9064_v9 = vld [vmem:[#allocation69_spill] sm:$0xff]  ;;  %3220 = vmatmul.f32.gmra.mxu3 %v7272_v7  ;;  %v9066_v61 = vld [vmem:[#allocation72_spill] sm:$0xff] }
 0x19c   : > { %v2363_v6 = vadd.f32 %v9058_v18, %v9057_v0  ;;  %v2944_v12 = vsel %vm1273_vm1, %v2351_v20, %v9063_v16  ;;  %v2512_v24 = vrot.slane %v9064_v9, 1  ;;  %v2961_v27 = vsel %vm1279_vm4, %v9065_v33, %v2960_v43  ;;  %v9067_v0 = vld [vmem:[#allocation35_spill] sm:$0xff]  ;;  %v995_v20 = vld [vmem:[%s8739_s4 + $0x18] sm:$0xff]  ;;  %v9069_v17 = vld [vmem:[#allocation65_spill] sm:$0xff] }
 0x19d   : > { %v2569_v58 = vadd.f32 %v5364_v62, %v9061_v14  ;;  %v2380_v1 = vrot.slane %v2379_v63, 1  ;;  %v2945_v2 = vsel %vm1275_vm2, %v2357_v40, %v2944_v12  ;;  %v2518_v15 = vrot.slane %v9066_v61, 1  ;;  %v9071_v12 = vld [vmem:[#allocation64_spill] sm:$0xff] }
 0x19e   : > { %v9068_v18 = vrot.slane %v9067_v0, 2  ;;  %v2962_v19 = vsel %vm1281_vm5, %v2471_v55, %v2961_v27  ;;  %v2375_v62 = vadd.f32 %v2374_v29, %v7133_v60  ;;  %v9070_v14 = vrot.slane %v9069_v17, 2  ;;  %v5365_v60 = vld [vmem:[%s5695_s29 + $0x338] sm:$0xff]  ;;  %v9072_v27 = vld [vmem:[#allocation33_spill] sm:$0xff] }
 0x19f   : > { %v7317_v40 = vsel %vm1283_vm6, %v2477_v49, %v2962_v19  ;;  %v2381_v43 = vadd.f32 %v2380_v1, %v2379_v63  ;;  %v2946_v16 = vsel %vm1277_vm3, %v2363_v6, %v2945_v2  ;;  %v2612_v33 = vrot.slane %v9071_v12, 2  ;;  %v9075_v1 = vld [vmem:[#allocation22_spill] sm:$0xff]  ;;  %v9076_v2 = vld [vmem:[#allocation67_spill] sm:$0xff] }
 0x1a0   : > { %v2523_v25 = vadd.f32 %v9068_v18, %v9067_v0  ;;  %v2559_v28 = vadd.f32 %v9070_v14, %v9069_v17  ;;  %v2507_v0 = vadd.f32 %v2506_v47, %v9056_v4  ;;  %v2570_v18 = vrot.slane %v2569_v58, 2  ;;  %3148 = vmatmul.f32.gmra.mxu2 %v7317_v40  ;;  %1448 = vperm.xlu2 %5167, %v995_v20   ;;  %v9077_v19 = vld [vmem:[#allocation66_spill] sm:$0xff] }
 0x1a1   : > { %v2947_v55 = vsel %vm1279_vm4, %v2369_v39, %v2946_v16  ;;  %v2616_v29 = vrot.slane %v5365_v60, 4  ;;  %v9073_v17 = vrot.slane %v9072_v27, 2  ;;  %v2513_v49 = vadd.f32 %v2512_v24, %v9064_v9  ;;  %v9078_v24 = vld [vmem:[#allocation30_spill] sm:$0xff] }
 0x1a2   : > { %v2948_v63 = vsel %vm1281_vm5, %v2375_v62, %v2947_v55  ;;  %v2519_v4 = vadd.f32 %v2518_v15, %v9066_v61  ;;  %v2524_v47 = vrot.slane %v2523_v25, 1  ;;  %v2965_v39 = vsel %vm1273_vm1, %v9076_v2, %v9075_v1  ;;  %v7341_v9 = vpop.xlane.xlu0 %626 }
 0x1a3   : > { %v2565_v14 = vadd.f32 %v9073_v17, %v9072_v27  ;;  %v7331_v6 = vsel %vm1283_vm6, %v2381_v43, %v2948_v63  ;;  %v2554_v16 = vrot.slane %v9077_v19, 1  ;;  %v2560_v7 = vrot.slane %v2559_v28, 1  ;;  %v7339_v17 = vpop.xlane.xlu1 %646  ;;  %v7346_v15 = vpop.xlane.xlu2 %666 }
 0x1a4   : > { %9074 = vst [vmem:[#allocation93_spill] sm:$0xff] %v7331_v6  ;;  %v890_v27 = vmul.f32 0.0078125, %v6916_v10  ;;  %v2966_v20 = vsel %vm1275_vm2, %v9078_v24, %v2965_v39  ;;  %v2571_v62 = vadd.f32 %v2570_v18, %v2569_v58  ;;  %v891_v61 = vmul.f32 0.0078125, %v7013_v53  ;;  %3223 = vmatmul.f32.gmra.mxu3 %v7331_v6  ;;  %v9081_v58 = vld [vmem:[#allocation60_spill] sm:$0xff] }
 0x1a5   : > { %v2525_v43 = vadd.f32 %v2524_v47, %v2523_v25  ;;  %v2967_v55 = vsel %vm1277_vm3, %v2507_v0, %v2966_v20  ;;  %v2617_v63 = vadd.f32 %v5365_v60, %v2616_v29  ;;  %v2566_v1 = vrot.slane %v2565_v14, 1  ;;  %v3283_v0 = vld [vmem:[%s8741_s6] sm:$0xff] }
 0x1a6   : > { %v892_v2 = vmul.f32 0.0078125, %v7080_v22  ;;  %v2968_v10 = vsel %vm1279_vm4, %v2513_v49, %v2967_v55  ;;  %v9080_v46 = vrot.slane %v9079_v51, 1  ;;  %v9082_v53 = vrot.slane %v9081_v58, 2  ;;  %v9085_v55 = vld [vmem:[#allocation62_spill] sm:$0xff] }
 0x1a7   : > { %v893_v25 = vmul.f32 0.0078125, %v7215_v44  ;;  %v2969_v22 = vsel %vm1281_vm5, %v2519_v4, %v2968_v10  ;;  %v2555_v60 = vadd.f32 %v2554_v16, %v9077_v19  ;;  %v1185_v29 = vperm.slane %v890_v27, %v5960_v37  ;;  %v9083_v16 = vld [vmem:[#allocation21_spill] sm:$0xff]  ;;  %v9084_v27 = vld [vmem:[#allocation63_spill] sm:$0xff] }
 0x1a8   : > { %v2549_v39 = vadd.f32 %v9080_v46, %v9079_v51  ;;  %v2607_v18 = vadd.f32 %v9082_v53, %v9081_v58  ;;  %v894_v49 = vmul.f32 0.0078125, %v685_v59  ;;  %v7366_v46 = vsel %vm1283_vm6, %v2525_v43, %v2969_v22  ;;  %3326 = vperm.xlu2 %5167, %v3283_v0  }
 0x1a9   : > { %v2613_v51 = vadd.f32 %v2612_v33, %v9071_v12  ;;  %v2561_v47 = vadd.f32 %v2560_v7, %v2559_v28  ;;  %v1186_v44 = vperm.slane %v891_v61, %v5960_v37  ;;  %3151 = vmatmul.f32.gmra.mxu2 %v7366_v46  ;;  %v2572_v24 = vrot.slane %v2571_v62, 1  ;;  %v5366_v28 = vld [vmem:[%s5695_s29 + $0x378] sm:$0xff]  ;;  %v9086_v33 = vld [vmem:[#allocation24_spill] sm:$0xff] }
 0x1aa   : > { %v2618_v20 = vrot.slane %v2617_v63, 2  ;;  %v1187_v4 = vperm.slane %v892_v2, %v5960_v37  ;;  %v2567_v19 = vadd.f32 %v2566_v1, %v2565_v14  ;;  %v2972_v59 = vsel %vm1273_vm1, %v9084_v27, %v9083_v16  ;;  %v687_v53 = vpop.xlane.xlu0 %686 }
 0x1ab   : > { %v2602_v43 = vrot.slane %v9085_v55, 1  ;;  %v1188_v10 = vperm.slane %v893_v25, %v5960_v37  ;;  %v2573_v12 = vadd.f32 %v2572_v24, %v2571_v62  ;;  %v2973_v7 = vsel %vm1275_vm2, %v2549_v39, %v2972_v59  ;;  %v7384_v1 = vpop.xlane.xlu1 %628  ;;  %v7388_v39 = vpop.xlane.xlu2 %648 }
 0x1ac   : > { %v9087_v61 = vrot.slane %v9086_v33, 4  ;;  %v1314_v2 = vsel %vm1273_vm1, %v1185_v29, %v6899_v21  ;;  %v1189_v14 = vperm.slane %v894_v49, %v5960_v37  ;;  %v2974_v0 = vsel %vm1277_vm3, %v2555_v60, %v2973_v7  ;;  %3226 = vmatmul.f32.gmra.mxu3 %v7251_v41  ;;  %v9088_v49 = vld [vmem:[#allocation52_spill] sm:$0xff] }
 0x1ad   : > { %v2608_v22 = vrot.slane %v2607_v18, 1  ;;  %v1315_v62 = vsel %vm1275_vm2, %v1186_v44, %v1314_v2  ;;  %v895_v25 = vmul.f32 0.0078125, %v687_v53  ;;  %v2975_v24 = vsel %vm1279_vm4, %v2561_v47, %v2974_v0  ;;  %v3285_v47 = vld [vmem:[%s8741_s6 + $0x10] sm:$0xff]  ;;  %v9092_v2 = vld [vmem:[#allocation50_spill] sm:$0xff] }
 0x1ae   : > { %v2665_v58 = vadd.f32 %v5366_v28, %v9087_v61  ;;  %v2614_v16 = vrot.slane %v2613_v51, 1  ;;  %v2619_v27 = vadd.f32 %v2618_v20, %v2617_v63  ;;  %v1316_v21 = vsel %vm1277_vm3, %v1187_v4, %v1315_v62  ;;  %v9090_v20 = vld [vmem:[#allocation49_spill] sm:$0xff]  ;;  %v9094_v0 = vld [vmem:[#allocation58_spill] sm:$0xff] }
 0x1af   : > { %v2976_v29 = vsel %vm1281_vm5, %v2567_v19, %v2975_v24  ;;  %v9089_v60 = vrot.slane %v9088_v49, 1  ;;  %v1190_v7 = vperm.slane %v895_v25, %v5960_v37  ;;  %v1317_v44 = vsel %vm1279_vm4, %v1188_v10, %v1316_v21  ;;  %v5367_v19 = vld [vmem:[%s5695_s29 + $0x3b8] sm:$0xff] }
 0x1b0   : > { %v7403_v63 = vsel %vm1283_vm6, %v2573_v12, %v2976_v29  ;;  %v9091_v41 = vrot.slane %v9090_v20, 2  ;;  %v2712_v28 = vrot.slane %v5367_v19, 4  ;;  %v2603_v33 = vadd.f32 %v2602_v43, %v9085_v55  ;;  %3336 = vperm.xlu2 %5167, %v3285_v47   ;;  %v9096_v43 = vld [vmem:[#allocation20_spill] sm:$0xff] }
 0x1b1   : > { %v2597_v59 = vadd.f32 %v9089_v60, %v9088_v49  ;;  %v1318_v61 = vsel %vm1281_vm5, %v1189_v14, %v1317_v44  ;;  %v9093_v10 = vrot.slane %v9092_v2, 2  ;;  %v9095_v62 = vrot.slane %v9094_v0, 2  ;;  %3154 = vmatmul.f32.gmra.mxu2 %v7403_v63  ;;  %v9097_v14 = vld [vmem:[#allocation57_spill] sm:$0xff]  ;;  %v9098_v60 = vld [vmem:[#allocation48_spill] sm:$0xff] }
 0x1b2   : > { %v2649_v4 = vadd.f32 %v9091_v41, %v9090_v20  ;;  %v2609_v12 = vadd.f32 %v2608_v22, %v2607_v18  ;;  %v1319_v24 = vsel %vm1283_vm6, %v1190_v7, %v1318_v61  ;;  %v2666_v21 = vrot.slane %v2665_v58, 2  ;;  %v9100_v41 = vld [vmem:[#allocation54_spill] sm:$0xff]  ;;  %v9101_v18 = vld [vmem:[#allocation55_spill] sm:$0xff]  ;;  %v9102_v61 = vld [vmem:[#allocation56_spill] sm:$0xff] }
 0x1b3   : > { %v2655_v53 = vadd.f32 %v9093_v10, %v9092_v2  ;;  %v2661_v25 = vadd.f32 %v9095_v62, %v9094_v0  ;;  %1416 = vmatpush.msra.mxu0 %v1319_v24  ;;  %v2615_v29 = vadd.f32 %v2614_v16, %v2613_v51  ;;  %v2620_v55 = vrot.slane %v2619_v27, 1  ;;  %v669_v51 = vpop.xlane.xlu0 %668  ;;  %v7429_v16 = vpop.xlane.xlu1 %608 }
 0x1b4   : > { %v2979_v49 = vsel %vm1273_vm1, %v9097_v14, %v9096_v43  ;;  %v9099_v44 = vrot.slane %v9098_v60, 1  ;;  %v2644_v2 = vrot.slane %v9100_v41, 1  ;;  %v2702_v22 = vrot.slane %v9101_v18, 2  ;;  %3229 = vmatmul.f32.gmra.mxu3 %v7317_v40 }
 0x1b5   : > { %v2980_v7 = vsel %vm1275_vm2, %v2597_v59, %v2979_v49  ;;  %v2708_v10 = vrot.slane %v9102_v61, 2  ;;  %v2650_v0 = vrot.slane %v2649_v4, 1  ;;  %v2621_v47 = vadd.f32 %v2620_v55, %v2619_v27  ;;  %v5368_v55 = vld [vmem:[%s5695_s29 + $0x3f8] sm:$0xff]  ;;  %s5451_s29 = scalar_lea.hbm %s9155_s11, 16 }
 0x1b6   : > { %v2639_v20 = vadd.f32 %v9099_v44, %v9098_v60  ;;  %v2981_v62 = vsel %vm1277_vm3, %v2603_v33, %v2980_v7  ;;  %v2656_v24 = vrot.slane %v2655_v53, 1  ;;  %v2713_v43 = vadd.f32 %v5367_v19, %v2712_v28  ;;  %v7433_v60 = vpop.xlane.xlu2 %610  ;;  %p5453_p8 = scmp.lt.s32.totalorder %s5451_s29, %s5447_s0 }
 0x1b7   : > { %v882_v14 = vmul.f32 0.0078125, %v7078_v38  ;;  %v2982_v44 = vsel %vm1279_vm4, %v2609_v12, %v2981_v62  ;;  %v2662_v6 = vrot.slane %v2661_v25, 1  ;;  %v2667_v59 = vadd.f32 %v2666_v21, %v2665_v58  ;;  %v998_v38 = vld [vmem:[%s8739_s4 + $0x30] sm:$0xff] }
 0x1b8   : > { %v883_v49 = vmul.f32 0.0078125, %v7154_v5  ;;  %v2983_v45 = vsel %vm1281_vm5, %v2615_v29, %v2982_v44  ;;  %v2645_v27 = vadd.f32 %v2644_v2, %v9100_v41  ;;  %v2760_v33 = vrot.slane %v5368_v55, 4  ;;  %1463 = vperm.xlu2 %5167, %v998_v38   ;;  %p5454_p10 = por %p5453_p8, %p5452_p7 }
 0x1b9   : > { %v884_v19 = vmul.f32 0.0078125, %v7284_v23  ;;  %v7446_v28 = vsel %vm1283_vm6, %v2621_v47, %v2983_v45  ;;  %v2703_v58 = vadd.f32 %v2702_v22, %v9101_v18  ;;  %v2709_v5 = vadd.f32 %v2708_v10, %v9102_v61  ;;  %v9103_v47 = vld [vmem:[#allocation19_spill] sm:$0xff] }
 0x1ba   : > { %v2651_v40 = vadd.f32 %v2650_v0, %v2649_v4  ;;  %v885_v12 = vmul.f32 0.0078125, %v7346_v15  ;;  %v2657_v21 = vadd.f32 %v2656_v24, %v2655_v53  ;;  %v2714_v29 = vrot.slane %v2713_v43, 2  ;;  %3157 = vmatmul.f32.gmra.mxu2 %v7446_v28  ;;  %v9104_v22 = vld [vmem:[#allocation51_spill] sm:$0xff]  ;;  %p5455_p13 = pnand %p5454_p10, %p5450_p6 }
 0x1bb   : > { %v1177_v41 = vperm.slane %v882_v14, %v5960_v37  ;;  %v886_v2 = vmul.f32 0.0078125, %v669_v51  ;;  %v1178_v23 = vperm.slane %v883_v49, %v5960_v37  ;;  %v2663_v7 = vadd.f32 %v2662_v6, %v2661_v25  ;;  %v7460_v51 = vpop.xlane.xlu0 %630  ;;  %v7462_v62 = vpop.xlane.xlu1 %650 }
 0x1bc   : > { %v2668_v45 = vrot.slane %v2667_v59, 1  ;;  %v2986_v18 = vsel %vm1273_vm1, %v2639_v20, %v9103_v47  ;;  %v2698_v61 = vrot.slane %v9104_v22, 1  ;;  %v2761_v4 = vadd.f32 %v5368_v55, %v2760_v33  ;;  %3232 = vmatmul.f32.gmra.mxu3 %v7366_v46  ;;  %v9109_v46 = vld [vmem:[#allocation41_spill] sm:$0xff] }
 0x1bd   : > { %v1179_v15 = vperm.slane %v884_v19, %v5960_v37  ;;  %v2987_v53 = vsel %vm1275_vm2, %v2645_v27, %v2986_v18  ;;  %v2704_v10 = vrot.slane %v2703_v58, 1  ;;  %v1180_v0 = vperm.slane %v885_v12, %v5960_v37  ;;  %v9107_v12 = vld [vmem:[#allocation46_spill] sm:$0xff]  ;;  %v9111_v18 = vld [vmem:[#allocation45_spill] sm:$0xff] }
 0x1be   : > { %v2669_v24 = vadd.f32 %v2668_v45, %v2667_v59  ;;  %v2988_v6 = vsel %vm1277_vm3, %v2651_v40, %v2987_v53  ;;  %v2710_v25 = vrot.slane %v2709_v5, 1  ;;  %v1307_v20 = vsel %vm1273_vm1, %v1177_v41, %v6993_v54  ;;  %v671_v44 = vpop.xlane.xlu2 %670  ;;  %v9105_v59 = vld [vmem:[#allocation34_spill] sm:$0xff] }
 0x1bf   : > { %v1181_v14 = vperm.slane %v886_v2, %v5960_v37  ;;  %v2989_v49 = vsel %vm1279_vm4, %v2657_v21, %v2988_v6  ;;  %v2715_v27 = vadd.f32 %v2714_v29, %v2713_v43  ;;  %v1308_v55 = vsel %vm1275_vm2, %v1178_v23, %v1307_v20  ;;  %v3840_v43 = vld [vmem:[%s8743_s8 + $0x18] sm:$0xff] }
 0x1c0   : > { %v887_v33 = vmul.f32 0.0078125, %v671_v44  ;;  %v2990_v19 = vsel %vm1281_vm5, %v2663_v7, %v2989_v49  ;;  %v9106_v38 = vrot.slane %v9105_v59, 2  ;;  %v9108_v54 = vrot.slane %v9107_v12, 1  ;;  %3895 = vperm.xlu2 %5167, %v3840_v43  }
 0x1c1   : > { %v1309_v2 = vsel %vm1277_vm3, %v1179_v15, %v1308_v55  ;;  %v7483_v21 = vsel %vm1283_vm6, %v2669_v24, %v2990_v19  ;;  %v9110_v29 = vrot.slane %v9109_v46, 2  ;;  %v2699_v7 = vadd.f32 %v2698_v61, %v9104_v22  ;;  %v9113_v22 = vld [vmem:[#allocation18_spill] sm:$0xff]  ;;  %v9114_v61 = vld [vmem:[#allocation40_spill] sm:$0xff] }
 0x1c2   : > { %v2745_v40 = vadd.f32 %v9106_v38, %v9105_v59  ;;  %v2693_v41 = vadd.f32 %v9108_v54, %v9107_v12  ;;  %v1182_v45 = vperm.slane %v887_v33, %v5960_v37  ;;  %v1310_v47 = vsel %vm1279_vm4, %v1180_v0, %v1309_v2  ;;  %3160 = vmatmul.f32.gmra.mxu2 %v7483_v21  ;;  %v9115_v0 = vld [vmem:[#allocation39_spill] sm:$0xff]  ;;  %v9116_v2 = vld [vmem:[#allocation36_spill] sm:$0xff] }
 0x1c3   : > { %v2751_v23 = vadd.f32 %v9110_v29, %v9109_v46  ;;  %v9112_v15 = vrot.slane %v9111_v18, 2  ;;  %v2762_v6 = vrot.slane %v2761_v4, 2  ;;  %v2705_v20 = vadd.f32 %v2704_v10, %v2703_v58  ;;  %v7502_v58 = vpop.xlane.xlu0 %612  ;;  %v7504_v10 = vpop.xlane.xlu1 %632 }
 0x1c4   : > { %v1311_v44 = vsel %vm1281_vm5, %v1181_v14, %v1310_v47  ;;  %v2711_v49 = vadd.f32 %v2710_v25, %v2709_v5  ;;  %v2716_v55 = vrot.slane %v2715_v27, 1  ;;  %v2993_v33 = vsel %vm1273_vm1, %v9114_v61, %v9113_v22  ;;  %3235 = vmatmul.f32.gmra.mxu3 %v7403_v63 }
 0x1c5   : > { %v2757_v53 = vadd.f32 %v9112_v15, %v9111_v18  ;;  %v1312_v24 = vsel %vm1283_vm6, %v1182_v45, %v1311_v44  ;;  %v2740_v19 = vrot.slane %v9115_v0, 1  ;;  %v2994_v59 = vsel %vm1275_vm2, %v2693_v41, %v2993_v33 }
 0x1c6   : > { %1417 = vmatpush.msra.mxu0 %v1312_v24  ;;  %v2746_v38 = vrot.slane %v2745_v40, 1  ;;  %v2717_v14 = vadd.f32 %v2716_v55, %v2715_v27  ;;  %v2995_v12 = vsel %vm1277_vm3, %v2699_v7, %v2994_v59  ;;  %v2752_v54 = vrot.slane %v2751_v23, 1  ;;  %v653_v5 = vpop.xlane.xlu2 %652  ;;  %v3291_v27 = vld [vmem:[%s8741_s6 + $0x40] sm:$0xff]  ;;  %v9118_v24 = vld [vmem:[#allocation17_spill] sm:$0xff] }
 0x1c7   : > { %v2996_v25 = vsel %vm1279_vm4, %v2705_v20, %v2995_v12  ;;  %v9117_v43 = vrot.slane %v9116_v2, 1  ;;  %v2758_v29 = vrot.slane %v2757_v53, 1  ;;  %v2763_v45 = vadd.f32 %v2762_v6, %v2761_v4 }
 0x1c8   : > { %v2997_v41 = vsel %vm1281_vm5, %v2711_v49, %v2996_v25  ;;  %v2741_v47 = vadd.f32 %v2740_v19, %v9115_v0  ;;  %v2747_v18 = vadd.f32 %v2746_v38, %v2745_v40  ;;  %v2753_v15 = vadd.f32 %v2752_v54, %v2751_v23  ;;  %3366 = vperm.xlu2 %5167, %v3291_v27   ;;  %v3843_v19 = vld [vmem:[%s8743_s8 + $0x30] sm:$0xff] }
 0x1c9   : > { %v2735_v46 = vadd.f32 %v9117_v43, %v9116_v2  ;;  %v2998_v7 = vsel %vm1283_vm6, %v2717_v14, %v2997_v41  ;;  %v2759_v20 = vadd.f32 %v2758_v29, %v2757_v53  ;;  %v2764_v44 = vrot.slane %v2763_v45, 1 }
 0x1ca   : > { %3163 = vmatmul.f32.gmra.mxu2 %v2998_v7  ;;  %v874_v6 = vmul.f32 0.0078125, %v7222_v34  ;;  %v875_v40 = vmul.f32 0.0078125, %v7339_v17  ;;  %v876_v33 = vmul.f32 0.0078125, %v7388_v39  ;;  %v877_v34 = vmul.f32 0.0078125, %v7462_v62 }
 0x1cb   : > { %v3000_v4 = vsel %vm1273_vm1, %v2735_v46, %v9118_v24  ;;  %v7522_v49 = vpop.xlane.xlu1 %594  ;;  %v7524_v55 = vpop.xlane.xlu0 %592  ;;  %v2765_v22 = vadd.f32 %v2764_v44, %v2763_v45  ;;  %v878_v38 = vmul.f32 0.0078125, %v653_v5  ;;  %v864_v27 = vmul.f32 0.0078125, %v7293_v32  ;;  %v3846_v32 = vld [vmem:[%s8743_s8 + $0x48] sm:$0xff] }
 0x1cc   : > { %v3001_v63 = vsel %vm1275_vm2, %v2741_v47, %v3000_v4  ;;  %3238 = vmatmul.f32.gmra.mxu3 %v7446_v28  ;;  %v1169_v17 = vperm.slane %v874_v6, %v5960_v37  ;;  %v1170_v14 = vperm.slane %v875_v40, %v5960_v37  ;;  %v1171_v39 = vperm.slane %v876_v33, %v5960_v37 }
 0x1cd   : > { %v3002_v61 = vsel %vm1277_vm3, %v2747_v18, %v3001_v63  ;;  %v1172_v28 = vperm.slane %v877_v34, %v5960_v37  ;;  %v1173_v12 = vperm.slane %v878_v38, %v5960_v37  ;;  %v865_v18 = vmul.f32 0.0078125, %v7341_v9 }
 0x1ce   : > { %v7528_v23 = vpop.xlane.xlu2 %614  ;;  %v3003_v53 = vsel %vm1279_vm4, %v2753_v15, %v3002_v61  ;;  %v1300_v62 = vsel %vm1273_vm1, %v1169_v17, %v7185_v48  ;;  %v3294_v48 = vld [vmem:[%s8741_s6 + $0x58] sm:$0xff]  ;;  %v867_v44 = vmul.f32 0.0078125, %v7460_v51  ;;  %v868_v4 = vmul.f32 0.0078125, %v7504_v10 }
 0x1cf   : > { %v3004_v0 = vsel %vm1281_vm5, %v2759_v20, %v3003_v53  ;;  %v1301_v2 = vsel %vm1275_vm2, %v1170_v14, %v1300_v62  ;;  %v1159_v63 = vperm.slane %v864_v27, %v5960_v37  ;;  %v1160_v6 = vperm.slane %v865_v18, %v5960_v37 }
 0x1d0   : > { %v3005_v59 = vsel %vm1283_vm6, %v2765_v22, %v3004_v0  ;;  %3910 = vperm.xlu2 %5167, %v3843_v19   ;;  %v1302_v46 = vsel %vm1277_vm3, %v1171_v39, %v1301_v2  ;;  %v1162_v61 = vperm.slane %v867_v44, %v5960_v37  ;;  %v1163_v51 = vperm.slane %v868_v4, %v5960_v37 }
 0x1d1   : > { %v1303_v45 = vsel %vm1279_vm4, %v1172_v28, %v1302_v46  ;;  %v1292_v10 = vsel %vm1271_vm0, %v1160_v6, %v1159_v63  ;;  %v857_v53 = vmul.f32 0.0078125, %v7433_v60  ;;  %v856_v33 = vmul.f32 0.0078125, %v7429_v16 }
 0x1d2   : > { %3166 = vmatmul.f32.gmra.mxu2 %v3005_v59  ;;  %v1304_v41 = vsel %vm1281_vm5, %v1173_v12, %v1303_v45  ;;  %v858_v38 = vmul.f32 0.0078125, %v7502_v58  ;;  %v859_v62 = vmul.f32 0.0078125, %v7528_v23 }
 0x1d3   : > { %v655_v54 = vpop.xlane.xlu1 %654  ;;  %v635_v25 = vpop.xlane.xlu0 %634  ;;  %v1151_v58 = vperm.slane %v856_v33, %v5960_v37 }
 0x1d4   : > { %v879_v5 = vmul.f32 0.0078125, %v655_v54  ;;  %3241 = vmatmul.f32.gmra.mxu3 %v7483_v21  ;;  %v866_v21 = vmul.f32 0.0078125, %v7384_v1  ;;  %v869_v22 = vmul.f32 0.0078125, %v635_v25  ;;  %v3297_v54 = vld [vmem:[%s8741_s6 + $0x70] sm:$0xff]  ;;  %v1152_v25 = vperm.slane %v857_v53, %v5960_v37 }
 0x1d5   : > { %v1153_v46 = vperm.slane %v858_v38, %v5960_v37 }
 0x1d6   : > { %v7547_v43 = vpop.xlane.xlu2 %596  ;;  %v1174_v29 = vperm.slane %v879_v5, %v5960_v37  ;;  %v1161_v9 = vperm.slane %v866_v21, %v5960_v37 }
 0x1d8   : > { %v1305_v47 = vsel %vm1283_vm6, %v1174_v29, %v1304_v41  ;;  %3381 = vperm.xlu2 %5167, %v3294_v48   ;;  %v1293_v40 = vsel %vm1273_vm1, %v1161_v9, %v1292_v10  ;;  %v849_v29 = vmul.f32 0.0078125, %v7522_v49  ;;  %v1285_v48 = vsel %vm1271_vm0, %v1152_v25, %v1151_v58  ;;  %v3849_v9 = vld [vmem:[%s8743_s8 + $0x60] sm:$0xff] }
 0x1d9   : > { %1418 = vmatpush.msra.mxu0 %v1305_v47  ;;  %v1294_v17 = vsel %vm1275_vm2, %v1162_v61, %v1293_v40  ;;  %v848_v41 = vmul.f32 0.0078125, %v7524_v55  ;;  %v1286_v21 = vsel %vm1273_vm1, %v1153_v46, %v1285_v48  ;;  %v7631_v58 = vld [vmem:[%s8736_s1] sm:$0xff]  ;;  %v7646_v46 = vld [vmem:[%s8744_s9 + $0x70] sm:$0xff]  ;;  %v7669_v48 = vld [vmem:[%s8744_s9 + $0x58] sm:$0xff] }
 0x1da   : > { %v1295_v28 = vsel %vm1277_vm3, %v1163_v51, %v1294_v17  ;;  %v1144_v6 = vperm.slane %v849_v29, %v5960_v37 }
 0x1db   : > { %v637_v15 = vpop.xlane.xlu1 %636  ;;  %v617_v20 = vpop.xlane.xlu0 %616 }
 0x1dc   : > { %3244 = vmatmul.f32.gmra.mxu3 %v2998_v7  ;;  %v870_v1 = vmul.f32 0.0078125, %v637_v15  ;;  %v1164_v7 = vperm.slane %v869_v22, %v5960_v37  ;;  %v860_v12 = vmul.f32 0.0078125, %v617_v20  ;;  %v850_v15 = vmul.f32 0.0078125, %v7547_v43 }
 0x1de   : > { %v599_v24 = vpop.xlane.xlu2 %598  ;;  %v1165_v0 = vperm.slane %v870_v1, %v5960_v37  ;;  %v1296_v16 = vsel %vm1279_vm4, %v1164_v7, %v1295_v28  ;;  %v1155_v45 = vperm.slane %v860_v12, %v5960_v37  ;;  %v1143_v1 = vperm.slane %v848_v41, %v5960_v37  ;;  %v1001_v41 = vld [vmem:[%s8739_s4 + $0x48] sm:$0xff] }
 0x1df   : > { %v851_v63 = vmul.f32 0.0078125, %v599_v24  ;;  %v1145_v24 = vperm.slane %v850_v15, %v5960_v37 }
 0x1e0   : > { %3925 = vperm.xlu2 %5167, %v3846_v32   ;;  %v1297_v5 = vsel %vm1281_vm5, %v1165_v0, %v1296_v16  ;;  %v1272_v0 = vsel %vm1271_vm0, %v1144_v6, %v1143_v1  ;;  %v3838_v16 = vld [vmem:[%s8743_s8 + $0x8] sm:$0xff] }
 0x1e1   : > { %v1146_v40 = vperm.slane %v851_v63, %v5960_v37  ;;  %v1274_v38 = vsel %vm1273_vm1, %v1145_v24, %v1272_v0  ;;  %v3284_v63 = vld [vmem:[%s8741_s6 + $0x8] sm:$0xff] }
 0x1e2   : > { %v997_v24 = vld [vmem:[%s8739_s4 + $0x28] sm:$0xff] }
 0x1e3   : > { %v639_v34 = vpop.xlane.xlu1 %638  ;;  %v619_v19 = vpop.xlane.xlu0 %618  ;;  %v1276_v28 = vsel %vm1275_vm2, %v1146_v40, %v1274_v38  ;;  %v3289_v38 = vld [vmem:[%s8741_s6 + $0x30] sm:$0xff] }
 0x1e4   : > { %v871_v39 = vmul.f32 0.0078125, %v639_v34  ;;  %3247 = vmatmul.f32.gmra.mxu3 %v3005_v59  ;;  %v861_v2 = vmul.f32 0.0078125, %v619_v19  ;;  %v1154_v59 = vperm.slane %v859_v62, %v5960_v37 }
 0x1e6   : > { %v601_v14 = vpop.xlane.xlu2 %600  ;;  %v1166_v60 = vperm.slane %v871_v39, %v5960_v37  ;;  %v1156_v47 = vperm.slane %v861_v2, %v5960_v37  ;;  %v1287_v4 = vsel %vm1275_vm2, %v1154_v59, %v1286_v21  ;;  %v7655_v59 = vld [vmem:[%s8744_s9 + $0x68] sm:$0xff] }
 0x1e7   : > { %v1288_v22 = vsel %vm1277_vm3, %v1155_v45, %v1287_v4  ;;  %v852_v32 = vmul.f32 0.0078125, %v601_v14  ;;  %v7663_v45 = vld [vmem:[%s8744_s9 + $0x60] sm:$0xff]  ;;  %v9121_v21 = vld [vmem:[#allocation96_spill] sm:$0xff] }
 0x1e8   : > { %v1298_v23 = vsel %vm1283_vm6, %v1166_v60, %v1297_v5  ;;  %3396 = vperm.xlu2 %5167, %v3297_v54   ;;  %v1289_v51 = vsel %vm1279_vm4, %v1156_v47, %v1288_v22  ;;  %v9123_v22 = vld [vmem:[#allocation93_spill] sm:$0xff] }
 0x1e9   : > { %1419 = vmatpush.msra.mxu0 %v1298_v23  ;;  %v1147_v33 = vperm.slane %v852_v32, %v5960_v37  ;;  %v3852_v23 = vld [vmem:[%s8743_s8 + $0x78] sm:$0xff] }
 0x1eb   : > { %v603_v27 = vpop.xlane.xlu1 %602  ;;  %v621_v18 = vpop.xlane.xlu0 %620  ;;  %v1278_v62 = vsel %vm1277_vm3, %v1147_v33, %v1276_v28  ;;  %v3288_v33 = vld [vmem:[%s8741_s6 + $0x28] sm:$0xff]  ;;  %v3841_v28 = vld [vmem:[%s8743_s8 + $0x20] sm:$0xff] }
 0x1ec   : > { %v862_v44 = vmul.f32 0.0078125, %v621_v18  ;;  %v853_v61 = vmul.f32 0.0078125, %v603_v27  ;;  %v1004_v27 = vld [vmem:[%s8739_s4 + $0x60] sm:$0xff] }
 0x1ee   : > { %v623_v20 = vpop.xlane.xlu2 %622  ;;  %v1157_v55 = vperm.slane %v862_v44, %v5960_v37  ;;  %v7611_v7 = vpop.f32.mrf.mxu3  ;;  %v1148_v34 = vperm.slane %v853_v61, %v5960_v37  ;;  %v9122_v44 = vld [vmem:[#allocation92_spill] sm:$0xff] }
 0x1ef   : > { %v863_v49 = vmul.f32 0.0078125, %v623_v20  ;;  %v996_v20 = vld [vmem:[%s8739_s4 + $0x20] sm:$0xff] }
 0x1f0   : > { %v1290_v10 = vsel %vm1281_vm5, %v1157_v55, %v1289_v51  ;;  %3940 = vperm.xlu2 %5167, %v3849_v9   ;;  %v1280_v54 = vsel %vm1279_vm4, %v1148_v34, %v1278_v62  ;;  %v3286_v51 = vld [vmem:[%s8741_s6 + $0x18] sm:$0xff]  ;;  %v3287_v34 = vld [vmem:[%s8741_s6 + $0x20] sm:$0xff] }
 0x1f1   : > { %v1158_v43 = vperm.slane %v863_v49, %v5960_v37  ;;  %v992_v49 = vld [vmem:[%s8739_s4] sm:$0xff] }
 0x1f2   : > { %1433 = vperm.xlu0 %5168, %v992_v49  }
 0x1f3   : > { %v1291_v53 = vsel %vm1283_vm6, %v1158_v43, %v1290_v10  ;;  %v605_v19 = vpop.xlane.xlu0 %604  ;;  %v607_v17 = vpop.xlane.xlu1 %606 }
 0x1f4   : > { %1420 = vmatpush.msra.mxu0 %v1291_v53  ;;  %v854_v14 = vmul.f32 0.0078125, %v605_v19  ;;  %v855_v39 = vmul.f32 0.0078125, %v607_v17  ;;  %v3290_v17 = vld [vmem:[%s8741_s6 + $0x38] sm:$0xff] }
 0x1f6   : > { %v1149_v12 = vperm.slane %v854_v14, %v5960_v37  ;;  %v1150_v60 = vperm.slane %v855_v39, %v5960_v37  ;;  %v7633_v2 = vpop.f32.mrf.mxu3  ;;  %v7640_v37 = vld [vmem:[%s8744_s9 + $0x78] sm:$0xff]  ;;  %v3842_v39 = vld [vmem:[%s8743_s8 + $0x28] sm:$0xff] }
 0x1f7   : > { %4990 = vmatpush.xpose.msk.msrb.mxu2 %vm1511_vm7, %v7640_v37 }
 0x1f8   : > { %v1282_v25 = vsel %vm1281_vm5, %v1149_v12, %v1280_v54  ;;  %3885 = vperm.xlu2 %5167, %v3838_v16   ;;  %v7764_v12 = vpop.permute.xlu2 %1010  ;;  %v3293_v54 = vld [vmem:[%s8741_s6 + $0x50] sm:$0xff] }
 0x1f9   : > { %v1284_v5 = vsel %vm1283_vm6, %v1150_v60, %v1282_v25  ;;  %v3292_v25 = vld [vmem:[%s8741_s6 + $0x48] sm:$0xff] }
 0x1fa   : > { %1421 = vmatpush.msra.mxu0 %v1284_v5  ;;  %1458 = vperm.xlu0 %5168, %v997_v24   ;;  %v5374_v5 = vld [vmem:[%s8744_s9 + $0x50] sm:$0xff] }
 0x1fb   : > { %1422 = vmatmul.f32.vlgmr.msra.gmra.mxu0 %v7631_v58  ;;  %4991 = vmatpush.xpose.msk.msrb.mxu2 %vm1511_vm7, %v7646_v46 }
 0x1fc   : > { %3105 = vmatpush.msrb.mxu0 %v7640_v37 }
 0x1fe   : > { %3106 = vmatpush.msrb.mxu0 %v7646_v46  ;;  %v7658_v29 = vpop.f32.mrf.mxu3 }
 0x1ff   : > { %4992 = vmatpush.xpose.msk.msrb.mxu2 %vm1511_vm7, %v7655_v59 }
 0x200   : > { %3107 = vmatpush.msrb.mxu0 %v7655_v59  ;;  %3955 = vperm.xlu2 %5167, %v3852_v23   ;;  %v5375_v23 = vld [vmem:[%s8744_s9 + $0x48] sm:$0xff] }
 0x202   : > { %3108 = vmatpush.msrb.mxu0 %v7663_v45  ;;  %3346 = vperm.xlu0 %5168, %v3287_v34   ;;  %v5384_v34 = vld [vmem:[%s8744_s9] sm:$0xff] }
 0x203   : > { %4993 = vmatpush.xpose.msk.msrb.mxu2 %vm1511_vm7, %v7663_v45 }
 0x204   : > { %3109 = vmatpush.msrb.mxu0 %v7669_v48 }
 0x206   : > { %3110 = vmatpush.msrb.mxu0 %v7051_v50  ;;  %v7677_v47 = vpop.f32.mrf.mxu3 }
 0x207   : > { %4994 = vmatpush.xpose.msk.msrb.mxu2 %vm1511_vm7, %v7669_v48 }
 0x208   : > { %3111 = vmatpush.msrb.mxu0 %v7067_v31  ;;  %1478 = vperm.xlu2 %5167, %v1001_v41   ;;  %v1007_v31 = vld [vmem:[%s8739_s4 + $0x78] sm:$0xff]  ;;  %v3845_v41 = vld [vmem:[%s8743_s8 + $0x40] sm:$0xff] }
 0x20a   : > { %3112 = vmatpush.msrb.mxu0 %v7095_v26  ;;  %3356 = vperm.xlu0 %5168, %v3289_v38   ;;  %v3839_v38 = vld [vmem:[%s8743_s8 + $0x10] sm:$0xff] }
 0x20b   : > { %4995 = vmatpush.xpose.msk.msrb.mxu2 %vm1511_vm7, %v5374_v5 }
 0x20c   : > { %3113 = vmatpush.msrb.mxu0 %v7108_v3 }
 0x20e   : > { %3114 = vmatpush.msrb.mxu0 %v7129_v13  ;;  %v7687_v50 = vpop.f32.mrf.mxu3 }
 0x20f   : > { %4996 = vmatpush.xpose.msk.msrb.mxu2 %vm1511_vm7, %v5375_v23  ;;  %v3255_v24 = vmul.f32 0.015625, %v7687_v50  ;;  %v1003_v23 = vld [vmem:[%s8739_s4 + $0x58] sm:$0xff] }
 0x210   : > { %3115 = vmatpush.msrb.mxu0 %v7143_v8  ;;  %1493 = vperm.xlu2 %5167, %v1004_v27   ;;  %v3844_v27 = vld [vmem:[%s8743_s8 + $0x38] sm:$0xff] }
 0x212   : > { %3116 = vmatpush.msrb.mxu0 %v7159_v57  ;;  %3900 = vperm.xlu0 %5168, %v3841_v28   ;;  %v982_v28 = vld [vmem:[%s8738_s3 + $0x30] sm:$0xff] }
 0x214   : > { %3117 = vmatpush.msrb.mxu0 %v7176_v11 }
 0x216   : > { %3118 = vmatpush.msrb.mxu0 %v7193_v42  ;;  %v7697_v3 = vpop.f32.mrf.mxu3  ;;  %v9119_v42 = vld [vmem:[#allocation100_spill] sm:$0xff] }
 0x218   : > { %3119 = vmatpush.msrb.mxu0 %v7204_v30  ;;  %1508 = vperm.xlu2 %5167, %v1007_v31   ;;  %v5376_v31 = vld [vmem:[%s8744_s9 + $0x40] sm:$0xff] }
 0x219   : > { %4997 = vmatpush.xpose.msk.msrb.mxu2 %vm1511_vm7, %v5376_v31 }
 0x21a   : > { %3120 = vmatpush.msrb.mxu0 %v7227_v35  ;;  %v3146_v26 = vpop.f32.mrf.mxu2  ;;  %v9120_v35 = vld [vmem:[#allocation102_spill] sm:$0xff]  ;;  %3371 = vperm.xlu0 %5168, %v3292_v25  }
 0x21b   : > { %3121 = vmatmul.f32.vlgmr.msrb.gmra.mxu0 %v6923_v52  ;;  %v3178_v0 = vmul.f32 0.0078125, %v3146_v26 }
 0x21e   : > { %v7700_v8 = vpop.f32.mrf.mxu3 }
 0x222   : > { %3915 = vperm.xlu0 %5168, %v3844_v27   ;;  %v985_v27 = vld [vmem:[%s8738_s3 + $0x48] sm:$0xff] }
 0x223   : > { %3124 = vmatmul.f32.gmra.mxu0 %v6965_v36  ;;  %v3149_v13 = vpop.f32.mrf.mxu2  ;;  %v993_v36 = vld [vmem:[%s8739_s4 + $0x8] sm:$0xff] }
 0x224   : > { %1438 = vperm.xlu1 %5169, %v993_v36   ;;  %v3179_v53 = vmul.f32 0.0078125, %v3149_v13  ;;  %v3296_v36 = vld [vmem:[%s8741_s6 + $0x68] sm:$0xff] }
 0x227   : > { %v7703_v11 = vpop.f32.mrf.mxu3 }
 0x22b   : > { %3127 = vmatmul.f32.gmra.mxu0 %v7007_v56 }
 0x22c   : > { %v3152_v57 = vpop.f32.mrf.mxu2  ;;  %1453 = vperm.xlu1 %5169, %v996_v20  }
 0x22d   : > { %v3180_v40 = vmul.f32 0.0078125, %v3152_v57  ;;  %v976_v57 = vld [vmem:[%s8738_s3] sm:$0xff] }
 0x22f   : > { %v7706_v18 = vpop.f32.mrf.mxu3 }
 0x233   : > { %3130 = vmatmul.f32.gmra.mxu0 %v9119_v42 }
 0x234   : > { %v3155_v30 = vpop.f32.mrf.mxu2  ;;  %3331 = vperm.xlu1 %5169, %v3284_v63   ;;  %v5379_v63 = vld [vmem:[%s8744_s9 + $0x28] sm:$0xff] }
 0x235   : > { %v3181_v10 = vmul.f32 0.0078125, %v3155_v30  ;;  %v5377_v30 = vld [vmem:[%s8744_s9 + $0x38] sm:$0xff] }
 0x236   : > { %4998 = vmatpush.xpose.msk.msrb.mxu2 %vm1511_vm7, %v5377_v30  ;;  %v986_v30 = vld [vmem:[%s8738_s3 + $0x50] sm:$0xff] }
 0x237   : > { %v7713_v56 = vpop.f32.mrf.mxu3 }
 0x238   : > { %v3260_v49 = vmul.f32 0.015625, %v7713_v56  ;;  %v3258_v56 = vmul.f32 0.015625, %v7703_v11  ;;  %v3256_v11 = vmul.f32 0.015625, %v7697_v3  ;;  %v979_v3 = vld [vmem:[%s8738_s3 + $0x18] sm:$0xff] }
 0x23b   : > { %3133 = vmatmul.f32.gmra.mxu0 %v9120_v35 }
 0x23c   : > { %3341 = vperm.xlu1 %5169, %v3286_v51   ;;  %v5382_v51 = vld [vmem:[%s8744_s9 + $0x10] sm:$0xff] }
 0x23d   : > { %v3158_v52 = vpop.f32.mrf.mxu2 }
 0x23e   : > { %v3182_v43 = vmul.f32 0.0078125, %v3158_v52 }
 0x23f   : > { %v7725_v6 = vpop.f32.mrf.mxu3 }
 0x243   : > { %3136 = vmatmul.f32.gmra.mxu0 %v9121_v21  ;;  %v3295_v21 = vld [vmem:[%s8741_s6 + $0x60] sm:$0xff] }
 0x244   : > { %3351 = vperm.xlu1 %5169, %v3288_v33   ;;  %3386 = vperm.xlu0 %5168, %v3295_v21   ;;  %v3252_v33 = vmul.f32 0.015625, %v7633_v2  ;;  %v980_v2 = vld [vmem:[%s8738_s3 + $0x20] sm:$0xff] }
 0x245   : > { %v3161_v15 = vpop.f32.mrf.mxu2 }
 0x246   : > { %v3183_v1 = vmul.f32 0.0078125, %v3161_v15  ;;  %v5378_v15 = vld [vmem:[%s8744_s9 + $0x30] sm:$0xff] }
 0x247   : > { %v7728_v61 = vpop.f32.mrf.mxu3  ;;  %4999 = vmatpush.xpose.msk.msrb.mxu2 %vm1511_vm7, %v5378_v15 }
 0x248   : > { %v3262_v20 = vmul.f32 0.015625, %v7728_v61  ;;  %v3837_v61 = vld [vmem:[%s8743_s8] sm:$0xff] }
 0x24b   : > { %3139 = vmatmul.f32.gmra.mxu0 %v9122_v44  ;;  %v977_v44 = vld [vmem:[%s8738_s3 + $0x8] sm:$0xff]  ;;  %5000 = vmatpush.xpose.msk.msrb.mxu2 %vm1511_vm7, %v5379_v63 }
 0x24c   : > { %3361 = vperm.xlu1 %5169, %v3290_v17   ;;  %v999_v17 = vld [vmem:[%s8739_s4 + $0x38] sm:$0xff] }
 0x24d   : > { %v3164_v4 = vpop.f32.mrf.mxu2 }
 0x24e   : > { %v3184_v55 = vmul.f32 0.0078125, %v3164_v4  ;;  %v3261_v4 = vmul.f32 0.015625, %v7725_v6  ;;  %v3847_v6 = vld [vmem:[%s8743_s8 + $0x50] sm:$0xff] }
 0x24f   : > { %v3239_v19 = vpop.f32.mrf.mxu3  ;;  %3930 = vperm.xlu0 %5168, %v3847_v6  }
 0x250   : > { %v3263_v52 = vmul.f32 0.015625, %v3239_v19 }
 0x253   : > { %3142 = vmatmul.f32.gmra.mxu0 %v9123_v22  ;;  %v3259_v22 = vmul.f32 0.015625, %v7706_v18  ;;  %v978_v18 = vld [vmem:[%s8738_s3 + $0x10] sm:$0xff] }
 0x254   : > { %3905 = vperm.xlu1 %5169, %v3842_v39   ;;  %v1000_v39 = vld [vmem:[%s8739_s4 + $0x40] sm:$0xff] }
 0x255   : > { %v3167_v32 = vpop.f32.mrf.mxu2 }
 0x256   : > { %v3185_v9 = vmul.f32 0.0078125, %v3167_v32  ;;  %v3848_v32 = vld [vmem:[%s8743_s8 + $0x58] sm:$0xff] }
 0x257   : > { %v3242_v14 = vpop.f32.mrf.mxu3 }
 0x258   : > { %3299 = vmatpush.msra.mxu0 %v3185_v9  ;;  %v3264_v35 = vmul.f32 0.015625, %v3242_v14  ;;  %v3257_v9 = vmul.f32 0.015625, %v7700_v8  ;;  %v3298_v8 = vld [vmem:[%s8741_s6 + $0x78] sm:$0xff] }
 0x259   : > { %3401 = vperm.xlu0 %5168, %v3298_v8  }
 0x25a   : > { %3300 = vmatpush.msra.mxu0 %v3184_v55  ;;  %v5380_v55 = vld [vmem:[%s8744_s9 + $0x20] sm:$0xff] }
 0x25b   : > { %5001 = vmatpush.xpose.msk.msrb.mxu2 %vm1511_vm7, %v5380_v55  ;;  %v988_v55 = vld [vmem:[%s8738_s3 + $0x60] sm:$0xff] }
 0x25c   : > { %3301 = vmatpush.msra.mxu0 %v3183_v1  ;;  %3376 = vperm.xlu1 %5169, %v3293_v54   ;;  %v5381_v1 = vld [vmem:[%s8744_s9 + $0x18] sm:$0xff]  ;;  %v7905_v54 = vpop.permute.xlu2 %1443 }
 0x25e   : > { %3302 = vmatpush.msra.mxu0 %v3182_v43 }
 0x25f   : > { %v3245_v62 = vpop.f32.mrf.mxu3  ;;  %5002 = vmatpush.xpose.msk.msrb.mxu2 %vm1511_vm7, %v5381_v1  ;;  %v989_v1 = vld [vmem:[%s8738_s3 + $0x68] sm:$0xff] }
 0x260   : > { %3303 = vmatpush.msra.mxu0 %v3181_v10  ;;  %v3265_v42 = vmul.f32 0.015625, %v3245_v62  ;;  %v3254_v10 = vmul.f32 0.015625, %v7677_v47  ;;  %v3851_v47 = vld [vmem:[%s8743_s8 + $0x70] sm:$0xff] }
 0x262   : > { %3304 = vmatpush.msra.mxu0 %v3180_v40  ;;  %v5383_v40 = vld [vmem:[%s8744_s9 + $0x8] sm:$0xff] }
 0x263   : > { %5003 = vmatpush.xpose.msk.msrb.mxu2 %vm1511_vm7, %v5382_v51 }
 0x264   : > { %3305 = vmatpush.msra.mxu0 %v3179_v53  ;;  %3920 = vperm.xlu1 %5169, %v3845_v41   ;;  %v3253_v53 = vmul.f32 0.015625, %v7658_v29  ;;  %v3251_v29 = vmul.f32 0.015625, %v7611_v7  ;;  %v981_v7 = vld [vmem:[%s8738_s3 + $0x28] sm:$0xff]  ;;  %v1434_v41 = vpop.permute.xlu0 %1433 }
 0x266   : > { %3306 = vmatpush.msra.mxu0 %v3178_v0  ;;  %v3850_v0 = vld [vmem:[%s8743_s8 + $0x68] sm:$0xff] }
 0x267   : > { %v3248_v45 = vpop.f32.mrf.mxu3  ;;  %5004 = vmatpush.xpose.msk.msrb.mxu2 %vm1511_vm7, %v5383_v40  ;;  %3945 = vperm.xlu0 %5168, %v3850_v0  }
 0x268   : > { %v3266_v26 = vmul.f32 0.015625, %v3248_v45  ;;  %v7923_v45 = vpop.permute.xlu2 %1448 }
 0x26b   : > { %5005 = vmatpush.xpose.msk.msrb.mxu2 %vm1511_vm7, %v5384_v34 }
 0x26c   : > { %3391 = vperm.xlu1 %5169, %v3296_v36  }
 0x26f   : > { %3890 = vperm.xlu0 %5168, %v3839_v38  }
 0x274   : > { %3935 = vperm.xlu1 %5169, %v3848_v32  }
 0x277   : > { %1473 = vperm.xlu0 %5168, %v1000_v39  }
 0x278   : > { %v1423_v60 = vpop.f32.mrf.mxu0 }
 0x279   : > { %v1424_v16 = vadd.f32 %v1423_v60, %v7764_v12 }
 0x27b   : > { %v1426_v37 = vadd.f32 3.0, %v1424_v16 }
 0x27c   : > { %3880 = vperm.xlu1 %5169, %v3837_v61   ;;  %v990_v61 = vld [vmem:[%s8738_s3 + $0x70] sm:$0xff] }
 0x27d   : > { %v1427_v46 = vmax.f32 %v1426_v37, 0.0  ;;  %v1002_v37 = vld [vmem:[%s8739_s4 + $0x50] sm:$0xff] }
 0x27f   : > { %v1428_v59 = vmin.f32 %v1427_v46, 6.0  ;;  %v984_v46 = vld [vmem:[%s8738_s3 + $0x40] sm:$0xff]  ;;  %1488 = vperm.xlu0 %5168, %v1003_v23  }
 0x281   : > { %v1429_v48 = vmul.f32 0.16666667, %v1428_v59  ;;  %v1005_v59 = vld [vmem:[%s8739_s4 + $0x68] sm:$0xff] }
 0x283   : > { %v1430_v13 = vmul.f32 %v1429_v48, %v1424_v16  ;;  %v983_v16 = vld [vmem:[%s8738_s3 + $0x38] sm:$0xff] }
 0x284   : > { %3950 = vperm.xlu1 %5169, %v3851_v47  }
 0x285   : > { %1575 = vmatpush.msra.mxu1 %v1430_v13 }
 0x286   : > { %4894 = vmatmul.msk.f32.vlgmr.msra.gmra.mxu1 %vm1511_vm7, %v976_v57 }
 0x287   : > { %3853 = vmatpush.msrb.mxu1 %v3266_v26 }
 0x289   : > { %3854 = vmatpush.msrb.mxu1 %v3265_v42  ;;  %v7931_v42 = vpop.permute.xlu2 %3326 }
 0x28b   : > { %3855 = vmatpush.msrb.mxu1 %v3264_v35  ;;  %v7936_v35 = vpop.permute.xlu0 %1458 }
 0x28c   : > { %1468 = vperm.xlu1 %5169, %v999_v17  }
 0x28d   : > { %3856 = vmatpush.msrb.mxu1 %v3263_v52 }
 0x28e   : > { %4895 = vmatmul.msk.f32.gmra.mxu1 %vm1511_vm7, %v977_v44  ;;  %v987_v44 = vld [vmem:[%s8738_s3 + $0x58] sm:$0xff] }
 0x28f   : > { %3857 = vmatpush.msrb.mxu1 %v3262_v20 }
 0x291   : > { %3858 = vmatpush.msrb.mxu1 %v3261_v4  ;;  %v7944_v4 = vpop.permute.xlu2 %3336 }
 0x293   : > { %3859 = vmatpush.msrb.mxu1 %v3260_v49  ;;  %v7947_v49 = vpop.permute.xlu0 %3346 }
 0x294   : > { %1483 = vperm.xlu1 %5169, %v1002_v37  }
 0x295   : > { %3860 = vmatpush.msrb.mxu1 %v3259_v22  ;;  %v1006_v22 = vld [vmem:[%s8739_s4 + $0x70] sm:$0xff] }
 0x296   : > { %4896 = vmatmul.msk.f32.gmra.mxu1 %vm1511_vm7, %v978_v18  ;;  %v7900_v62 = vpop.permute.xlu1 %1438  ;;  %1503 = vperm.xlu0 %5168, %v1006_v22  }
 0x297   : > { %3861 = vmatpush.msrb.mxu1 %v3258_v56 }
 0x298   : > { %v7841_v43 = vpop.f32.mrf.mxu0 }
 0x299   : > { %3862 = vmatpush.msrb.mxu1 %v3257_v9  ;;  %v3170_v32 = vmul.f32 0.0078125, %v7841_v43  ;;  %v7960_v56 = vpop.permute.xlu2 %1463 }
 0x29b   : > { %3863 = vmatpush.msrb.mxu1 %v3256_v11  ;;  %v7963_v18 = vpop.permute.xlu0 %3356 }
 0x29c   : > { %1498 = vperm.xlu1 %5169, %v1005_v59  }
 0x29d   : > { %3864 = vmatpush.msrb.mxu1 %v3255_v24  ;;  %v991_v24 = vld [vmem:[%s8738_s3 + $0x78] sm:$0xff] }
 0x29e   : > { %4897 = vmatmul.msk.f32.gmra.mxu1 %vm1511_vm7, %v979_v3  ;;  %v7908_v5 = vpop.permute.xlu1 %1453 }
 0x29f   : > { %3865 = vmatpush.msrb.mxu1 %v3254_v10 }
 0x2a0   : > { %v7865_v50 = vpop.f32.mrf.mxu0 }
 0x2a1   : > { %3866 = vmatpush.msrb.mxu1 %v3253_v53  ;;  %v3171_v63 = vmul.f32 0.0078125, %v7865_v50  ;;  %v7971_v43 = vpop.permute.xlu2 %3895 }
 0x2a3   : > { %3867 = vmatpush.msrb.mxu1 %v3252_v33  ;;  %v7973_v11 = vpop.permute.xlu0 %3900 }
 0x2a5   : > { %3868 = vmatpush.msrb.mxu1 %v3251_v29 }
 0x2a6   : > { %4898 = vmatmul.msk.f32.gmra.mxu1 %vm1511_vm7, %v980_v2  ;;  %v7928_v31 = vpop.permute.xlu1 %3331 }
 0x2a8   : > { %v3128_v19 = vpop.f32.mrf.mxu0 }
 0x2a9   : > { %v3172_v20 = vmul.f32 0.0078125, %v3128_v19  ;;  %v7981_v51 = vpop.permute.xlu2 %3366 }
 0x2ab   : > { %v7986_v3 = vpop.permute.xlu0 %3371 }
 0x2ae   : > { %4899 = vmatmul.msk.f32.gmra.mxu1 %vm1511_vm7, %v981_v7  ;;  %v7938_v36 = vpop.permute.xlu1 %3341 }
 0x2b0   : > { %v3131_v14 = vpop.f32.mrf.mxu0 }
 0x2b1   : > { %v3173_v15 = vmul.f32 0.0078125, %v3131_v14  ;;  %v7991_v53 = vpop.permute.xlu2 %3910 }
 0x2b3   : > { %v7993_v33 = vpop.permute.xlu0 %3915 }
 0x2b6   : > { %4900 = vmatmul.msk.f32.gmra.mxu1 %vm1511_vm7, %v982_v28  ;;  %v7954_v6 = vpop.permute.xlu1 %3351 }
 0x2b8   : > { %v3134_v60 = vpop.f32.mrf.mxu0 }
 0x2b9   : > { %v3174_v21 = vmul.f32 0.0078125, %v3134_v60  ;;  %v7999_v19 = vpop.permute.xlu2 %3381 }
 0x2bb   : > { %v8001_v7 = vpop.permute.xlu0 %3386 }
 0x2be   : > { %4901 = vmatmul.msk.f32.gmra.mxu1 %vm1511_vm7, %v983_v16  ;;  %v7965_v9 = vpop.permute.xlu1 %3361 }
 0x2c0   : > { %v3137_v25 = vpop.f32.mrf.mxu0 }
 0x2c1   : > { %v3175_v52 = vmul.f32 0.0078125, %v3137_v25  ;;  %v8006_v37 = vpop.permute.xlu2 %3925 }
 0x2c6   : > { %4902 = vmatmul.msk.f32.gmra.mxu1 %vm1511_vm7, %v984_v46  ;;  %v7978_v8 = vpop.permute.xlu1 %3905  ;;  %v8008_v46 = vpop.permute.xlu0 %3930 }
 0x2c8   : > { %v3140_v48 = vpop.f32.mrf.mxu0 }
 0x2c9   : > { %v3176_v13 = vmul.f32 0.0078125, %v3140_v48  ;;  %v8013_v22 = vpop.permute.xlu2 %3396 }
 0x2ce   : > { %4903 = vmatmul.msk.f32.gmra.mxu1 %vm1511_vm7, %v985_v27  ;;  %v7988_v10 = vpop.permute.xlu1 %3376 }
 0x2d0   : > { %v3143_v26 = vpop.f32.mrf.mxu0 }
 0x2d1   : > { %v3177_v57 = vmul.f32 0.0078125, %v3143_v26 }
 0x2d3   : > { %3307 = vmatpush.msra.mxu0 %v3177_v57 }
 0x2d5   : > { %3308 = vmatpush.msra.mxu0 %v3176_v13 }
 0x2d6   : > { %4904 = vmatmul.msk.f32.gmra.mxu1 %vm1511_vm7, %v986_v30  ;;  %v7996_v0 = vpop.permute.xlu1 %3920 }
 0x2d7   : > { %3309 = vmatpush.msra.mxu0 %v3175_v52 }
 0x2d9   : > { %3310 = vmatpush.msra.mxu0 %v3174_v21 }
 0x2db   : > { %3311 = vmatpush.msra.mxu0 %v3173_v15 }
 0x2dd   : > { %3312 = vmatpush.msra.mxu0 %v3172_v20 }
 0x2de   : > { %4905 = vmatmul.msk.f32.gmra.mxu1 %vm1511_vm7, %v987_v44  ;;  %v8003_v14 = vpop.permute.xlu1 %3391 }
 0x2df   : > { %3313 = vmatpush.msra.mxu0 %v3171_v63 }
 0x2e1   : > { %3314 = vmatpush.msra.mxu0 %v3170_v32 }
 0x2e2   : > { %3315 = vmatmul.f32.vlgmr.msra.gmra.mxu0 %v7631_v58 }
 0x2e6   : > { %4906 = vmatmul.msk.f32.gmra.mxu1 %vm1511_vm7, %v988_v55 }
 0x2ee   : > { %4907 = vmatmul.msk.f32.gmra.mxu1 %vm1511_vm7, %v989_v1  ;;  %v8015_v1 = vpop.permute.xlu0 %3401 }
 0x2f6   : > { %4908 = vmatmul.msk.f32.gmra.mxu1 %vm1511_vm7, %v990_v61 }
 0x2fe   : > { %4909 = vmatmul.msk.f32.gmra.mxu1 %vm1511_vm7, %v991_v24 }
 0x303   : > { %v1577_v40 = vpop.f32.mrf.mxu1 }
 0x304   : > { %v1578_v50 = vadd.f32 %v1577_v40, %v1434_v41  ;;  %v8010_v41 = vpop.permute.xlu1 %3935 }
 0x306   : > { %v4910_v47 = vmul.f32 -1.442695, %v1578_v50  ;;  %3869 = vmatmul.f32.vlgmr.msrb.gmra.mxu1 %v7631_v58 }
 0x308   : > { %5170 = vpow2.f32 %v4910_v47 }
 0x30b   : > { %v1580_v34 = vpop.f32.mrf.mxu1 }
 0x30c   : > { %v1581_v29 = vadd.f32 %v1580_v34, %v7900_v62  ;;  %v8018_v50 = vpop.permute.xlu1 %3880 }
 0x30e   : > { %v5171_v2 = vpop.eup %5170  ;;  %v4911_v17 = vmul.f32 -1.442695, %v1581_v29 }
 0x30f   : > { %v1673_v38 = vadd.f32 1.0, %v5171_v2 }
 0x310   : > { %5172 = vpow2.f32 %v4911_v17 }
 0x311   : > { %5174 = vrcp.f32 %v1673_v38  ;;  %v1700_v48 = vand.u32 2147483648, %v1673_v38  ;;  %vm1694_vm9 = vweird.f32 %v1673_v38 }
 0x313   : > { %v1583_v39 = vpop.f32.mrf.mxu1  ;;  %v1701_v15 = vor.u32 1.1754944e-38, %v1700_v48  ;;  %v8023_v48 = vpop.permute.xlu0 %3945 }
 0x314   : > { %v1584_v58 = vadd.f32 %v1583_v39, %v7905_v54  ;;  %v1698_v54 = vand.u32 2147483647, %v1673_v38 }
 0x316   : > { %v5173_v28 = vpop.eup %5172  ;;  %v4912_v60 = vmul.f32 -1.442695, %v1584_v58  ;;  %vm1699_vm11 = vcmp.eq.f32.partialorder %v1698_v54, 8.507059e+37 }
 0x317   : > { %v5175_v16 = vpop.eup %5174  ;;  %v1674_v25 = vadd.f32 1.0, %v5173_v28 }
 0x318   : > { %5176 = vpow2.f32 %v4912_v60  ;;  %v1690_v62 = vmul.f32 %v5175_v16, %v1673_v38  ;;  %vm1695_vm8 = vweird.f32 %v5175_v16 }
 0x319   : > { %5178 = vrcp.f32 %v1674_v25  ;;  %vm1696_vm10 = vmor %vm1694_vm9, %vm1695_vm8  ;;  %v1715_v55 = vand.u32 2147483648, %v1674_v25  ;;  %v1713_v40 = vand.u32 2147483647, %v1674_v25  ;;  %vm1709_vm13 = vweird.f32 %v1674_v25 }
 0x31a   : > { %v1691_v23 = vsub.f32 1.0, %v1690_v62 }
 0x31b   : > { %v1586_v59 = vpop.f32.mrf.mxu1  ;;  %v1716_v38 = vor.u32 1.1754944e-38, %v1715_v55  ;;  %vm1714_vm15 = vcmp.eq.f32.partialorder %v1713_v40, 8.507059e+37 }
 0x31c   : > { %v1587_v27 = vadd.f32 %v1586_v59, %v7923_v45  ;;  %v1692_v26 = vmul.f32 %v5175_v16, %v1691_v23 }
 0x31e   : > { %v5177_v13 = vpop.eup %5176  ;;  %v4913_v57 = vmul.f32 -1.442695, %v1587_v27  ;;  %v1693_v30 = vadd.f32 %v5175_v16, %v1692_v26 }
 0x31f   : > { %v5179_v52 = vpop.eup %5178  ;;  %v1675_v21 = vadd.f32 1.0, %v5177_v13 }
 0x320   : > { %5180 = vpow2.f32 %v4913_v57  ;;  %v1697_v20 = vsel %vm1696_vm10, %v5175_v16, %v1693_v30  ;;  %v1705_v44 = vmul.f32 %v5179_v52, %v1674_v25  ;;  %vm1710_vm12 = vweird.f32 %v5179_v52  ;;  %v8021_v25 = vpop.permute.xlu2 %3940 }
 0x321   : > { %5182 = vrcp.f32 %v1675_v21  ;;  %v1702_v63 = vsel %vm1699_vm11, %v1701_v15, %v1697_v20  ;;  %vm1711_vm14 = vmor %vm1709_vm13, %vm1710_vm12  ;;  %v1730_v16 = vand.u32 2147483648, %v1675_v21  ;;  %v1728_v59 = vand.u32 2147483647, %v1675_v21 }
 0x322   : > { %1929 = vxpose.xlu1.b32.start [1/16] (narrow) %v1702_v63, 8  ;;  %v1706_v45 = vsub.f32 1.0, %v1705_v44  ;;  %vm1724_vm1 = vweird.f32 %v1675_v21 }
 0x323   : > { %v1589_v32 = vpop.f32.mrf.mxu1  ;;  %v1731_v30 = vor.u32 1.1754944e-38, %v1730_v16  ;;  %vm1729_vm3 = vcmp.eq.f32.partialorder %v1728_v59, 8.507059e+37 }
 0x324   : > { %v1590_v61 = vadd.f32 %v1589_v32, %v7908_v5  ;;  %v1707_v24 = vmul.f32 %v5179_v52, %v1706_v45 }
 0x326   : > { %v5181_v47 = vpop.eup %5180  ;;  %v4914_v34 = vmul.f32 -1.442695, %v1590_v61  ;;  %v1708_v29 = vadd.f32 %v5179_v52, %v1707_v24 }
 0x327   : > { %v5183_v2 = vpop.eup %5182  ;;  %v1676_v17 = vadd.f32 1.0, %v5181_v47 }
 0x328   : > { %5184 = vpow2.f32 %v4914_v34  ;;  %v1712_v39 = vsel %vm1711_vm14, %v5179_v52, %v1708_v29  ;;  %v1720_v58 = vmul.f32 %v5183_v2, %v1675_v21  ;;  %vm1725_vm0 = vweird.f32 %v5183_v2  ;;  %v8025_v52 = vpop.permute.xlu1 %3950  ;;  %v8028_v34 = vpop.permute.xlu2 %3885 }
 0x329   : > { %5186 = vrcp.f32 %v1676_v17  ;;  %v1717_v28 = vsel %vm1714_vm15, %v1716_v38, %v1712_v39  ;;  %vm1726_vm2 = vmor %vm1724_vm1, %vm1725_vm0  ;;  %v1745_v45 = vand.u32 2147483648, %v1676_v17  ;;  %v1743_v21 = vand.u32 2147483647, %v1676_v17  ;;  %v8030_v38 = vpop.permute.xlu0 %3890 }
 0x32a   : > { %1930 = vxpose.xlu1.b32.cont [2/16] (narrow) %v1717_v28, 8  ;;  %v1721_v5 = vsub.f32 1.0, %v1720_v58  ;;  %vm1739_vm5 = vweird.f32 %v1676_v17 }
 0x32b   : > { %v1592_v60 = vpop.f32.mrf.mxu1  ;;  %vm1744_vm8 = vcmp.eq.f32.partialorder %v1743_v21, 8.507059e+37 }
 0x32c   : > { %v1593_v62 = vadd.f32 %v1592_v60, %v7936_v35  ;;  %v1722_v23 = vmul.f32 %v5183_v2, %v1721_v5 }
 0x32e   : > { %v5185_v27 = vpop.eup %5184  ;;  %v4915_v26 = vmul.f32 -1.442695, %v1593_v62  ;;  %v1723_v54 = vadd.f32 %v5183_v2, %v1722_v23 }
 0x32f   : > { %v5187_v13 = vpop.eup %5186  ;;  %v1677_v57 = vadd.f32 1.0, %v5185_v27 }
 0x330   : > { %5188 = vpow2.f32 %v4915_v26  ;;  %v1727_v15 = vsel %vm1726_vm2, %v5183_v2, %v1723_v54  ;;  %v1735_v35 = vmul.f32 %v5187_v13, %v1676_v17  ;;  %vm1740_vm4 = vweird.f32 %v5187_v13  ;;  %v1469_v28 = vpop.permute.xlu1 %1468 }
 0x331   : > { %5190 = vrcp.f32 %v1677_v57  ;;  %v1732_v20 = vsel %vm1729_vm3, %v1731_v30, %v1727_v15  ;;  %vm1741_vm6 = vmor %vm1739_vm5, %vm1740_vm4  ;;  %v1746_v2 = vor.u32 1.1754944e-38, %v1745_v45  ;;  %v1760_v16 = vand.u32 2147483648, %v1677_v57 }
 0x332   : > { %1931 = vxpose.xlu1.b32.cont [3/16] (narrow) %v1732_v20, 8  ;;  %v1736_v44 = vsub.f32 1.0, %v1735_v35  ;;  %v1758_v23 = vand.u32 2147483647, %v1677_v57  ;;  %vm1754_vm10 = vweird.f32 %v1677_v57  ;;  %v8032_v20 = vpop.permute.xlu2 %3955 }
 0x333   : > { %v1595_v63 = vpop.f32.mrf.mxu1 }
 0x334   : > { %v1596_v32 = vadd.f32 %v1595_v63, %v7960_v56  ;;  %v1737_v55 = vmul.f32 %v5187_v13, %v1736_v44  ;;  %vm1759_vm12 = vcmp.eq.f32.partialorder %v1758_v23, 8.507059e+37  ;;  %v1474_v63 = vpop.permute.xlu0 %1473 }
 0x336   : > { %v5189_v61 = vpop.eup %5188  ;;  %v4916_v24 = vmul.f32 -1.442695, %v1596_v32  ;;  %v1738_v40 = vadd.f32 %v5187_v13, %v1737_v55 }
 0x337   : > { %v5191_v47 = vpop.eup %5190  ;;  %v1678_v29 = vadd.f32 1.0, %v5189_v61 }
 0x338   : > { %5192 = vpow2.f32 %v4916_v24  ;;  %v1742_v39 = vsel %vm1741_vm6, %v5187_v13, %v1738_v40  ;;  %v1750_v58 = vmul.f32 %v5191_v47, %v1677_v57  ;;  %vm1755_vm9 = vweird.f32 %v5191_v47 }
 0x339   : > { %5194 = vrcp.f32 %v1678_v29  ;;  %v1747_v56 = vsel %vm1744_vm8, %v1746_v2, %v1742_v39  ;;  %vm1756_vm11 = vmor %vm1754_vm10, %vm1755_vm9  ;;  %v1761_v13 = vor.u32 1.1754944e-38, %v1760_v16  ;;  %v1775_v55 = vand.u32 2147483648, %v1678_v29 }
 0x33a   : > { %1932 = vxpose.xlu1.b32.cont [4/16] (narrow) %v1747_v56, 8  ;;  %v1751_v5 = vsub.f32 1.0, %v1750_v58  ;;  %v1773_v57 = vand.u32 2147483647, %v1678_v29  ;;  %vm1769_vm14 = vweird.f32 %v1678_v29  ;;  %v1479_v16 = vpop.permute.xlu2 %1478 }
 0x33b   : > { %v1598_v60 = vpop.f32.mrf.mxu1  ;;  %v1776_v58 = vor.u32 1.1754944e-38, %v1775_v55 }
 0x33c   : > { %v1599_v17 = vadd.f32 %v1598_v60, %v1469_v28  ;;  %v1752_v62 = vmul.f32 %v5191_v47, %v1751_v5  ;;  %vm1774_vm0 = vcmp.eq.f32.partialorder %v1773_v57, 8.507059e+37 }
 0x33e   : > { %v5193_v59 = vpop.eup %5192  ;;  %v4917_v27 = vmul.f32 -1.442695, %v1599_v17  ;;  %v1753_v26 = vadd.f32 %v5191_v47, %v1752_v62 }
 0x33f   : > { %v5195_v54 = vpop.eup %5194  ;;  %v1679_v30 = vadd.f32 1.0, %v5193_v59 }
 0x340   : > { %5196 = vpow2.f32 %v4917_v27  ;;  %v1757_v15 = vsel %vm1756_vm11, %v5191_v47, %v1753_v26  ;;  %v1765_v35 = vmul.f32 %v5195_v54, %v1678_v29  ;;  %vm1770_vm13 = vweird.f32 %v5195_v54 }
 0x341   : > { %5198 = vrcp.f32 %v1679_v30  ;;  %v1762_v44 = vsel %vm1759_vm12, %v1761_v13, %v1757_v15  ;;  %vm1771_vm15 = vmor %vm1769_vm14, %vm1770_vm13  ;;  %v1790_v62 = vand.u32 2147483648, %v1679_v30  ;;  %v1788_v27 = vand.u32 2147483647, %v1679_v30 }
 0x342   : > { %1933 = vxpose.xlu1.b32.cont [5/16] (narrow) %v1762_v44, 8  ;;  %v1766_v45 = vsub.f32 1.0, %v1765_v35  ;;  %vm1784_vm2 = vweird.f32 %v1679_v30 }
 0x343   : > { %v1601_v32 = vpop.f32.mrf.mxu1  ;;  %vm1789_vm4 = vcmp.eq.f32.partialorder %v1788_v27, 8.507059e+37 }
 0x344   : > { %v1602_v21 = vadd.f32 %v1601_v32, %v1474_v63  ;;  %v1767_v61 = vmul.f32 %v5195_v54, %v1766_v45  ;;  %v1484_v32 = vpop.permute.xlu1 %1483 }
 0x346   : > { %v5197_v24 = vpop.eup %5196  ;;  %v4918_v40 = vmul.f32 -1.442695, %v1602_v21  ;;  %v1768_v2 = vadd.f32 %v5195_v54, %v1767_v61 }
 0x347   : > { %v5199_v47 = vpop.eup %5198  ;;  %v1680_v39 = vadd.f32 1.0, %v5197_v24 }
 0x348   : > { %5200 = vpow2.f32 %v4918_v40  ;;  %v1772_v56 = vsel %vm1771_vm15, %v5195_v54, %v1768_v2  ;;  %v1780_v28 = vmul.f32 %v5199_v47, %v1679_v30  ;;  %vm1785_vm1 = vweird.f32 %v5199_v47 }
 0x349   : > { %5202 = vrcp.f32 %v1680_v39  ;;  %v1777_v5 = vsel %vm1774_vm0, %v1776_v58, %v1772_v56  ;;  %vm1786_vm3 = vmor %vm1784_vm2, %vm1785_vm1  ;;  %v1791_v54 = vor.u32 1.1754944e-38, %v1790_v62  ;;  %v1805_v61 = vand.u32 2147483648, %v1680_v39 }
 0x34a   : > { %1934 = vxpose.xlu1.b32.cont [6/16] (narrow) %v1777_v5, 8  ;;  %v1781_v60 = vsub.f32 1.0, %v1780_v28  ;;  %v1803_v40 = vand.u32 2147483647, %v1680_v39  ;;  %vm1799_vm6 = vweird.f32 %v1680_v39 }
 0x34b   : > { %v1604_v17 = vpop.f32.mrf.mxu1 }
 0x34c   : > { %v1605_v23 = vadd.f32 %v1604_v17, %v1479_v16  ;;  %v1782_v59 = vmul.f32 %v5199_v47, %v1781_v60  ;;  %vm1804_vm9 = vcmp.eq.f32.partialorder %v1803_v40, 8.507059e+37  ;;  %v1489_v17 = vpop.permute.xlu0 %1488  ;;  %v1494_v40 = vpop.permute.xlu2 %1493 }
 0x34e   : > { %v5201_v29 = vpop.eup %5200  ;;  %v4919_v26 = vmul.f32 -1.442695, %v1605_v23  ;;  %v1783_v13 = vadd.f32 %v5199_v47, %v1782_v59 }
 0x34f   : > { %v5203_v15 = vpop.eup %5202  ;;  %v1681_v35 = vadd.f32 1.0, %v5201_v29 }
 0x350   : > { %5204 = vpow2.f32 %v4919_v26  ;;  %v1787_v44 = vsel %vm1786_vm3, %v5199_v47, %v1783_v13  ;;  %v1795_v63 = vmul.f32 %v5203_v15, %v1680_v39  ;;  %vm1800_vm5 = vweird.f32 %v5203_v15 }
 0x351   : > { %5206 = vrcp.f32 %v1681_v35  ;;  %v1792_v45 = vsel %vm1789_vm4, %v1791_v54, %v1787_v44  ;;  %vm1801_vm8 = vmor %vm1799_vm6, %vm1800_vm5  ;;  %v1806_v47 = vor.u32 1.1754944e-38, %v1805_v61  ;;  %v1818_v59 = vand.u32 2147483647, %v1681_v35 }
 0x352   : > { %1935 = vxpose.xlu1.b32.cont [7/16] (narrow) %v1792_v45, 8  ;;  %v1796_v55 = vsub.f32 1.0, %v1795_v63  ;;  %v1820_v27 = vand.u32 2147483648, %v1681_v35  ;;  %vm1814_vm11 = vweird.f32 %v1681_v35 }
 0x353   : > { %v1607_v21 = vpop.f32.mrf.mxu1  ;;  %vm1819_vm13 = vcmp.eq.f32.partialorder %v1818_v59, 8.507059e+37 }
 0x354   : > { %v1608_v57 = vadd.f32 %v1607_v21, %v1484_v32  ;;  %v1797_v24 = vmul.f32 %v5203_v15, %v1796_v55  ;;  %v1821_v45 = vor.u32 1.1754944e-38, %v1820_v27 }
 0x356   : > { %v5205_v30 = vpop.eup %5204  ;;  %v4920_v2 = vmul.f32 -1.442695, %v1608_v57  ;;  %v1798_v58 = vadd.f32 %v5203_v15, %v1797_v24 }
 0x357   : > { %v5207_v56 = vpop.eup %5206  ;;  %v1682_v28 = vadd.f32 1.0, %v5205_v30 }
 0x358   : > { %5208 = vpow2.f32 %v4920_v2  ;;  %v1802_v5 = vsel %vm1801_vm8, %v5203_v15, %v1798_v58  ;;  %v1810_v60 = vmul.f32 %v5207_v56, %v1681_v35  ;;  %vm1815_vm10 = vweird.f32 %v5207_v56 }
 0x359   : > { %5210 = vrcp.f32 %v1682_v28  ;;  %v1807_v16 = vsel %vm1804_vm9, %v1806_v47, %v1802_v5  ;;  %vm1816_vm12 = vmor %vm1814_vm11, %vm1815_vm10  ;;  %v1833_v2 = vand.u32 2147483647, %v1682_v28  ;;  %v1835_v35 = vand.u32 2147483648, %v1682_v28 }
 0x35a   : > { %1936 = vxpose.xlu1.b32.cont [8/16] (narrow) %v1807_v16, 8  ;;  %v1811_v62 = vsub.f32 1.0, %v1810_v60  ;;  %vm1829_vm15 = vweird.f32 %v1682_v28 }
 0x35b   : > { %v1610_v23 = vpop.f32.mrf.mxu1  ;;  %vm1834_vm1 = vcmp.eq.f32.partialorder %v1833_v2, 8.507059e+37  ;;  %v1836_v59 = vor.u32 1.1754944e-38, %v1835_v35 }
 0x35c   : > { %v1611_v29 = vadd.f32 %v1610_v23, %v1489_v17  ;;  %v1812_v26 = vmul.f32 %v5207_v56, %v1811_v62 }
 0x35e   : > { %v5209_v39 = vpop.eup %5208  ;;  %v4921_v13 = vmul.f32 -1.442695, %v1611_v29  ;;  %v1813_v54 = vadd.f32 %v5207_v56, %v1812_v26 }
 0x35f   : > { %v5211_v44 = vpop.eup %5210  ;;  %v1683_v63 = vadd.f32 1.0, %v5209_v39  ;;  %v3316_v15 = vpop.f32.mrf.mxu0 }
 0x360   : > { %5212 = vpow2.f32 %v4921_v13  ;;  %v3317_v32 = vadd.f32 %v3316_v15, %v7764_v12  ;;  %v1817_v55 = vsel %vm1816_vm12, %v5207_v56, %v1813_v54  ;;  %v1825_v21 = vmul.f32 %v5211_v44, %v1682_v28  ;;  %v1499_v13 = vpop.permute.xlu1 %1498  ;;  %v3267_v15 = vld [vmem:[%s8740_s5] sm:$0xff] }
 0x361   : > { %5214 = vrcp.f32 %v1683_v63  ;;  %v1822_v61 = vsel %vm1819_vm13, %v1821_v45, %v1817_v55  ;;  %vm1830_vm14 = vweird.f32 %v5211_v44  ;;  %v1850_v55 = vand.u32 2147483648, %v1683_v63 }
 0x362   : > { %v3319_v57 = vadd.f32 3.0, %v3317_v32  ;;  %1937 = vxpose.xlu1.b32.cont [9/16] (narrow) %v1822_v61, 8  ;;  %v1826_v24 = vsub.f32 1.0, %v1825_v21  ;;  %vm1831_vm0 = vmor %vm1829_vm15, %vm1830_vm14  ;;  %vm1844_vm3 = vweird.f32 %v1683_v63 }
 0x363   : > { %v1613_v30 = vpop.f32.mrf.mxu1  ;;  %v1851_v2 = vor.u32 1.1754944e-38, %v1850_v55  ;;  %v3269_v55 = vld [vmem:[%s8740_s5 + $0x10] sm:$0xff] }
 0x364   : > { %v3320_v58 = vmax.f32 %v3319_v57, 0.0  ;;  %v1614_v47 = vadd.f32 %v1613_v30, %v1494_v40  ;;  %v1827_v5 = vmul.f32 %v5211_v44, %v1826_v24  ;;  %v1848_v57 = vand.u32 2147483647, %v1683_v63 }
 0x366   : > { %v5213_v60 = vpop.eup %5212  ;;  %v3321_v16 = vmin.f32 %v3320_v58, 6.0  ;;  %v4922_v17 = vmul.f32 -1.442695, %v1614_v47  ;;  %v1828_v62 = vadd.f32 %v5211_v44, %v1827_v5  ;;  %vm1849_vm5 = vcmp.eq.f32.partialorder %v1848_v57, 8.507059e+37  ;;  %v1504_v5 = vpop.permute.xlu0 %1503 }
 0x367   : > { %v5215_v56 = vpop.eup %5214  ;;  %v1684_v23 = vadd.f32 1.0, %v5213_v60  ;;  %v3268_v60 = vld [vmem:[%s8740_s5 + $0x8] sm:$0xff] }
 0x368   : > { %v3322_v27 = vmul.f32 0.16666667, %v3321_v16  ;;  %5216 = vpow2.f32 %v4922_v17  ;;  %v1832_v29 = vsel %vm1831_vm0, %v5211_v44, %v1828_v62  ;;  %v1840_v26 = vmul.f32 %v5215_v56, %v1683_v63 }
 0x369   : > { %5218 = vrcp.f32 %v1684_v23  ;;  %v1837_v39 = vsel %vm1834_vm1, %v1836_v59, %v1832_v29  ;;  %vm1845_vm2 = vweird.f32 %v5215_v56  ;;  %v1865_v62 = vand.u32 2147483648, %v1684_v23 }
 0x36a   : > { %v3323_v54 = vmul.f32 %v3322_v27, %v3317_v32  ;;  %1938 = vxpose.xlu1.b32.cont [10/16] (narrow) %v1837_v39, 8  ;;  %v1841_v45 = vsub.f32 1.0, %v1840_v26  ;;  %vm1846_vm4 = vmor %vm1844_vm3, %vm1845_vm2  ;;  %v1863_v27 = vand.u32 2147483647, %v1684_v23  ;;  %vm1859_vm8 = vweird.f32 %v1684_v23 }
 0x36b   : > { %v1616_v28 = vpop.f32.mrf.mxu1 }
 0x36c   : > { %v1617_v21 = vadd.f32 %v1616_v28, %v1499_v13  ;;  %3467 = vmatpush.msrb.mxu0 %v3323_v54  ;;  %v1842_v61 = vmul.f32 %v5215_v56, %v1841_v45  ;;  %v1866_v54 = vor.u32 1.1754944e-38, %v1865_v62  ;;  %vm1864_vm10 = vcmp.eq.f32.partialorder %v1863_v27, 8.507059e+37  ;;  %v3270_v62 = vld [vmem:[%s8740_s5 + $0x18] sm:$0xff] }
 0x36d   : > { %4926 = vmatmul.msk.f32.vlgmr.msrb.gmra.mxu0 %vm1511_vm7, %v3267_v15 }
 0x36e   : > { %v5217_v44 = vpop.eup %5216  ;;  %v4923_v24 = vmul.f32 -1.442695, %v1617_v21  ;;  %v1843_v40 = vadd.f32 %v5215_v56, %v1842_v61  ;;  %v1509_v61 = vpop.permute.xlu2 %1508 }
 0x36f   : > { %v5219_v32 = vpop.eup %5218  ;;  %v1685_v30 = vadd.f32 1.0, %v5217_v44 }
 0x370   : > { %5220 = vpow2.f32 %v4923_v24  ;;  %v1847_v35 = vsel %vm1846_vm4, %v5215_v56, %v1843_v40  ;;  %v1855_v58 = vmul.f32 %v5219_v32, %v1684_v23  ;;  %vm1860_vm6 = vweird.f32 %v5219_v32 }
 0x371   : > { %5222 = vrcp.f32 %v1685_v30  ;;  %v1852_v47 = vsel %vm1849_vm5, %v1851_v2, %v1847_v35  ;;  %vm1861_vm9 = vmor %vm1859_vm8, %vm1860_vm6  ;;  %v1880_v44 = vand.u32 2147483648, %v1685_v30  ;;  %v1878_v40 = vand.u32 2147483647, %v1685_v30 }
 0x372   : > { %1939 = vxpose.xlu1.b32.cont [11/16] (narrow) %v1852_v47, 8  ;;  %v1856_v16 = vsub.f32 1.0, %v1855_v58  ;;  %vm1874_vm12 = vweird.f32 %v1685_v30 }
 0x373   : > { %v1619_v17 = vpop.f32.mrf.mxu1  ;;  %vm1879_vm14 = vcmp.eq.f32.partialorder %v1878_v40, 8.507059e+37 }
 0x374   : > { %v1620_v63 = vadd.f32 %v1619_v17, %v1504_v5  ;;  %v1857_v59 = vmul.f32 %v5219_v32, %v1856_v16  ;;  %v1881_v5 = vor.u32 1.1754944e-38, %v1880_v44  ;;  %v3271_v44 = vld [vmem:[%s8740_s5 + $0x20] sm:$0xff] }
 0x375   : > { %4927 = vmatmul.msk.f32.gmra.mxu0 %vm1511_vm7, %v3268_v60 }
 0x376   : > { %v5221_v56 = vpop.eup %5220  ;;  %v4924_v29 = vmul.f32 -1.442695, %v1620_v63  ;;  %v1858_v26 = vadd.f32 %v5219_v32, %v1857_v59 }
 0x377   : > { %v5223_v39 = vpop.eup %5222  ;;  %v1686_v13 = vadd.f32 1.0, %v5221_v56 }
 0x378   : > { %5224 = vpow2.f32 %v4924_v29  ;;  %v1862_v15 = vsel %vm1861_vm9, %v5219_v32, %v1858_v26  ;;  %v1870_v45 = vmul.f32 %v5223_v39, %v1685_v30  ;;  %vm1875_vm11 = vweird.f32 %v5223_v39 }
 0x379   : > { %5226 = vrcp.f32 %v1686_v13  ;;  %v1867_v28 = vsel %vm1864_vm10, %v1866_v54, %v1862_v15  ;;  %vm1876_vm13 = vmor %vm1874_vm12, %vm1875_vm11  ;;  %v1895_v27 = vand.u32 2147483648, %v1686_v13  ;;  %v1893_v29 = vand.u32 2147483647, %v1686_v13 }
 0x37a   : > { %1940 = vxpose.xlu1.b32.cont [12/16] (narrow) %v1867_v28, 8  ;;  %v1871_v21 = vsub.f32 1.0, %v1870_v45  ;;  %vm1889_vm0 = vweird.f32 %v1686_v13  ;;  %vm4536_vm12 = vcmask 130048  }
 0x37b   : > { %v1622_v57 = vpop.f32.mrf.mxu1  ;;  %v1896_v28 = vor.u32 1.1754944e-38, %v1895_v27  ;;  %vm1894_vm2 = vcmp.eq.f32.partialorder %v1893_v29, 8.507059e+37 }
 0x37c   : > { %v1623_v23 = vadd.f32 %v1622_v57, %v1509_v61  ;;  %v1872_v24 = vmul.f32 %v5223_v39, %v1871_v21 }
 0x37d   : > { %4928 = vmatmul.msk.f32.gmra.mxu0 %vm1511_vm7, %v3269_v55 }
 0x37e   : > { %v5225_v32 = vpop.eup %5224  ;;  %v4925_v2 = vmul.f32 -1.442695, %v1623_v23  ;;  %v1873_v35 = vadd.f32 %v5223_v39, %v1872_v24 }
 0x37f   : > { %v5227_v58 = vpop.eup %5226  ;;  %v1687_v47 = vadd.f32 1.0, %v5225_v32 }
 0x380   : > { %5228 = vpow2.f32 %v4925_v2  ;;  %v1877_v60 = vsel %vm1876_vm13, %v5223_v39, %v1873_v35  ;;  %v1885_v16 = vmul.f32 %v5227_v58, %v1686_v13  ;;  %vm1890_vm15 = vweird.f32 %v5227_v58  ;;  %v3821_v35 = vld [vmem:[%s8742_s7] sm:$0xff] }
 0x381   : > { %5230 = vrcp.f32 %v1687_v47  ;;  %v1882_v17 = vsel %vm1879_vm14, %v1881_v5, %v1877_v60  ;;  %vm1891_vm1 = vmor %vm1889_vm0, %vm1890_vm15  ;;  %v1910_v24 = vand.u32 2147483648, %v1687_v47  ;;  %v1908_v32 = vand.u32 2147483647, %v1687_v47 }
 0x382   : > { %1941 = vxpose.xlu1.b32.cont [13/16] (narrow) %v1882_v17, 8  ;;  %v1886_v63 = vsub.f32 1.0, %v1885_v16  ;;  %vm1904_vm4 = vweird.f32 %v1687_v47 }
 0x383   : > { %v3870_v59 = vpop.f32.mrf.mxu1  ;;  %v1911_v60 = vor.u32 1.1754944e-38, %v1910_v24  ;;  %vm1909_vm6 = vcmp.eq.f32.partialorder %v1908_v32, 8.507059e+37  ;;  %v5387_v24 = vld [vmem:[%s8745_s10 + $0x68] sm:$0xff]  ;;  %v3827_v32 = vld [vmem:[%s8742_s7 + $0x30] sm:$0xff] }
 0x384   : > { %v3871_v30 = vadd.f32 %v3870_v59, %v7764_v12  ;;  %v1887_v56 = vmul.f32 %v5227_v58, %v1886_v63  ;;  %v3272_v63 = vld [vmem:[%s8740_s5 + $0x28] sm:$0xff] }
 0x385   : > { %4929 = vmatmul.msk.f32.gmra.mxu0 %vm1511_vm7, %v3270_v62 }
 0x386   : > { %v5229_v26 = vpop.eup %5228  ;;  %v3873_v39 = vadd.f32 3.0, %v3871_v30  ;;  %v1888_v54 = vadd.f32 %v5227_v58, %v1887_v56  ;;  %v3822_v56 = vld [vmem:[%s8742_s7 + $0x8] sm:$0xff] }
 0x387   : > { %v5231_v15 = vpop.eup %5230  ;;  %v1688_v45 = vadd.f32 1.0, %v5229_v26 }
 0x388   : > { %v3874_v55 = vmax.f32 %v3873_v39, 0.0  ;;  %v1892_v21 = vsel %vm1891_vm1, %v5227_v58, %v1888_v54  ;;  %v1900_v61 = vmul.f32 %v5231_v15, %v1687_v47  ;;  %vm1905_vm3 = vweird.f32 %v5231_v15 }
 0x389   : > { %5232 = vrcp.f32 %v1688_v45  ;;  %v1897_v57 = vsel %vm1894_vm2, %v1896_v28, %v1892_v21  ;;  %vm1906_vm5 = vmor %vm1904_vm4, %vm1905_vm3  ;;  %v1925_v27 = vand.u32 2147483648, %v1688_v45  ;;  %v1923_v47 = vand.u32 2147483647, %v1688_v45  ;;  %v3823_v28 = vld [vmem:[%s8742_s7 + $0x10] sm:$0xff]  ;;  %v3275_v21 = vld [vmem:[%s8740_s5 + $0x40] sm:$0xff] }
 0x38a   : > { %v3875_v12 = vmin.f32 %v3874_v55, 6.0  ;;  %1942 = vxpose.xlu1.b32.cont [14/16] (narrow) %v1897_v57, 8  ;;  %v1901_v23 = vsub.f32 1.0, %v1900_v61  ;;  %vm1919_vm9 = vweird.f32 %v1688_v45  ;;  %v3824_v55 = vld [vmem:[%s8742_s7 + $0x18] sm:$0xff]  ;;  %v3825_v61 = vld [vmem:[%s8742_s7 + $0x20] sm:$0xff] }
 0x38b   : > { %v1926_v26 = vor.u32 1.1754944e-38, %v1925_v27  ;;  %vm1924_vm11 = vcmp.eq.f32.partialorder %v1923_v47, 8.507059e+37  ;;  %v5385_v57 = vld [vmem:[%s8745_s10 + $0x78] sm:$0xff]  ;;  %v5394_v27 = vld [vmem:[%s8745_s10 + $0x30] sm:$0xff]  ;;  %v5395_v47 = vld [vmem:[%s8745_s10 + $0x28] sm:$0xff] }
 0x38c   : > { %v3876_v40 = vmul.f32 0.16666667, %v3875_v12  ;;  %v1902_v13 = vmul.f32 %v5231_v15, %v1901_v23  ;;  %5079 = vmatpush.xpose.msk.msrb.mxu3 %vm4536_vm12, %v5385_v57  ;;  %5022 = vmatpush.xpose.msk.msra.mxu2 %vm4536_vm12, %v5385_v57  ;;  %v3276_v12 = vld [vmem:[%s8740_s5 + $0x48] sm:$0xff] }
 0x38d   : > { %4930 = vmatmul.msk.f32.gmra.mxu0 %vm1511_vm7, %v3271_v44  ;;  %v5386_v44 = vld [vmem:[%s8745_s10 + $0x70] sm:$0xff]  ;;  %v3826_v23 = vld [vmem:[%s8742_s7 + $0x28] sm:$0xff] }
 0x38e   : > { %v3877_v2 = vmul.f32 %v3876_v40, %v3871_v30  ;;  %v1903_v58 = vadd.f32 %v5231_v15, %v1902_v13  ;;  %v3277_v40 = vld [vmem:[%s8740_s5 + $0x50] sm:$0xff]  ;;  %v5388_v13 = vld [vmem:[%s8745_s10 + $0x60] sm:$0xff] }
 0x38f   : > { %v5233_v5 = vpop.eup %5232 }
 0x390   : > { %4021 = vmatpush.msra.mxu1 %v3877_v2  ;;  %v1907_v16 = vsel %vm1906_vm5, %v5231_v15, %v1903_v58  ;;  %v1915_v17 = vmul.f32 %v5233_v5, %v1688_v45  ;;  %vm1920_vm8 = vweird.f32 %v5233_v5  ;;  %v3273_v15 = vld [vmem:[%s8740_s5 + $0x30] sm:$0xff]  ;;  %v3274_v45 = vld [vmem:[%s8740_s5 + $0x38] sm:$0xff]  ;;  %5080 = vmatpush.xpose.msk.msrb.mxu3 %vm4536_vm12, %v5386_v44 }
 0x391   : > { %4958 = vmatmul.msk.f32.vlgmr.msra.gmra.mxu1 %vm1511_vm7, %v3821_v35  ;;  %v1912_v62 = vsel %vm1909_vm6, %v1911_v60, %v1907_v16  ;;  %vm1921_vm10 = vmor %vm1919_vm9, %vm1920_vm8  ;;  %5023 = vmatpush.xpose.msk.msra.mxu2 %vm4536_vm12, %v5386_v44  ;;  %v5389_v2 = vld [vmem:[%s8745_s10 + $0x58] sm:$0xff]  ;;  %v5390_v58 = vld [vmem:[%s8745_s10 + $0x50] sm:$0xff] }
 0x392   : > { %1943 = vxpose.xlu1.b32.cont [15/16] (narrow) %v1912_v62, 8  ;;  %v1916_v59 = vsub.f32 1.0, %v1915_v17  ;;  %v3278_v35 = vld [vmem:[%s8740_s5 + $0x58] sm:$0xff]  ;;  %v5391_v60 = vld [vmem:[%s8745_s10 + $0x48] sm:$0xff]  ;;  %v3279_v16 = vld [vmem:[%s8740_s5 + $0x60] sm:$0xff] }
 0x393   : > { %v5392_v17 = vld [vmem:[%s8745_s10 + $0x40] sm:$0xff] }
 0x394   : > { %v1917_v30 = vmul.f32 %v5233_v5, %v1916_v59  ;;  %5081 = vmatpush.xpose.msk.msrb.mxu3 %vm4536_vm12, %v5387_v24  ;;  %v3829_v62 = vld [vmem:[%s8742_s7 + $0x40] sm:$0xff]  ;;  %v3280_v59 = vld [vmem:[%s8740_s5 + $0x68] sm:$0xff] }
 0x395   : > { %4931 = vmatmul.msk.f32.gmra.mxu0 %vm1511_vm7, %v3272_v63  ;;  %5024 = vmatpush.xpose.msk.msra.mxu2 %vm4536_vm12, %v5387_v24  ;;  %v5393_v63 = vld [vmem:[%s8745_s10 + $0x38] sm:$0xff] }
 0x396   : > { %v1918_v29 = vadd.f32 %v5233_v5, %v1917_v30  ;;  %v3830_v30 = vld [vmem:[%s8742_s7 + $0x48] sm:$0xff] }
 0x398   : > { %v1922_v39 = vsel %vm1921_vm10, %v5233_v5, %v1918_v29  ;;  %5082 = vmatpush.xpose.msk.msrb.mxu3 %vm4536_vm12, %v5388_v13  ;;  %v3828_v5 = vld [vmem:[%s8742_s7 + $0x38] sm:$0xff]  ;;  %v5396_v29 = vld [vmem:[%s8745_s10 + $0x20] sm:$0xff] }
 0x399   : > { %4959 = vmatmul.msk.f32.gmra.mxu1 %vm1511_vm7, %v3822_v56  ;;  %v1927_v54 = vsel %vm1924_vm11, %v1926_v26, %v1922_v39  ;;  %5025 = vmatpush.xpose.msk.msra.mxu2 %vm4536_vm12, %v5388_v13  ;;  %v3281_v56 = vld [vmem:[%s8740_s5 + $0x70] sm:$0xff]  ;;  %v5397_v39 = vld [vmem:[%s8745_s10 + $0x18] sm:$0xff] }
 0x39a   : > { %1944 = vxpose.xlu1.b32.end [16/16] (narrow) %v1927_v54, 8  ;;  %v3831_v26 = vld [vmem:[%s8742_s7 + $0x50] sm:$0xff]  ;;  %v3282_v54 = vld [vmem:[%s8740_s5 + $0x78] sm:$0xff] }
 0x39c   : > { %5083 = vmatpush.xpose.msk.msrb.mxu3 %vm4536_vm12, %v5389_v2 }
 0x39d   : > { %4932 = vmatmul.msk.f32.gmra.mxu0 %vm1511_vm7, %v3273_v15  ;;  %5026 = vmatpush.xpose.msk.msra.mxu2 %vm4536_vm12, %v5389_v2  ;;  %v5398_v15 = vld [vmem:[%s8745_s10 + $0x10] sm:$0xff] }
 0x3a0   : > { %5084 = vmatpush.xpose.msk.msrb.mxu3 %vm4536_vm12, %v5390_v58 }
 0x3a1   : > { %4960 = vmatmul.msk.f32.gmra.mxu1 %vm1511_vm7, %v3823_v28  ;;  %5027 = vmatpush.xpose.msk.msra.mxu2 %vm4536_vm12, %v5390_v58  ;;  %v3832_v28 = vld [vmem:[%s8742_s7 + $0x58] sm:$0xff] }
 0x3a4   : > { %5085 = vmatpush.xpose.msk.msrb.mxu3 %vm4536_vm12, %v5391_v60 }
 0x3a5   : > { %4933 = vmatmul.msk.f32.gmra.mxu0 %vm1511_vm7, %v3274_v45  ;;  %5028 = vmatpush.xpose.msk.msra.mxu2 %vm4536_vm12, %v5391_v60  ;;  %v5399_v45 = vld [vmem:[%s8745_s10 + $0x8] sm:$0xff] }
 0x3a8   : > { %5086 = vmatpush.xpose.msk.msrb.mxu3 %vm4536_vm12, %v5392_v17 }
 0x3a9   : > { %4961 = vmatmul.msk.f32.gmra.mxu1 %vm1511_vm7, %v3824_v55  ;;  %5029 = vmatpush.xpose.msk.msra.mxu2 %vm4536_vm12, %v5392_v17 }
 0x3ac   : > { %5087 = vmatpush.xpose.msk.msrb.mxu3 %vm4536_vm12, %v5393_v63 }
 0x3ad   : > { %4934 = vmatmul.msk.f32.gmra.mxu0 %vm1511_vm7, %v3275_v21  ;;  %5030 = vmatpush.xpose.msk.msra.mxu2 %vm4536_vm12, %v5393_v63  ;;  %v5400_v21 = vld [vmem:[%s8745_s10] sm:$0xff] }
 0x3b0   : > { %5088 = vmatpush.xpose.msk.msrb.mxu3 %vm4536_vm12, %v5394_v27 }
 0x3b1   : > { %4962 = vmatmul.msk.f32.gmra.mxu1 %vm1511_vm7, %v3825_v61  ;;  %5031 = vmatpush.xpose.msk.msra.mxu2 %vm4536_vm12, %v5394_v27 }
 0x3b4   : > { %5089 = vmatpush.xpose.msk.msrb.mxu3 %vm4536_vm12, %v5395_v47 }
 0x3b5   : > { %4935 = vmatmul.msk.f32.gmra.mxu0 %vm1511_vm7, %v3276_v12  ;;  %5032 = vmatpush.xpose.msk.msra.mxu2 %vm4536_vm12, %v5395_v47  ;;  %v3833_v12 = vld [vmem:[%s8742_s7 + $0x60] sm:$0xff] }
 0x3b8   : > { %5090 = vmatpush.xpose.msk.msrb.mxu3 %vm4536_vm12, %v5396_v29 }
 0x3b9   : > { %4963 = vmatmul.msk.f32.gmra.mxu1 %vm1511_vm7, %v3826_v23  ;;  %5033 = vmatpush.xpose.msk.msra.mxu2 %vm4536_vm12, %v5396_v29 }
 0x3bc   : > { %5091 = vmatpush.xpose.msk.msrb.mxu3 %vm4536_vm12, %v5397_v39 }
 0x3bd   : > { %4936 = vmatmul.msk.f32.gmra.mxu0 %vm1511_vm7, %v3277_v40  ;;  %5034 = vmatpush.xpose.msk.msra.mxu2 %vm4536_vm12, %v5397_v39 }
 0x3c0   : > { %5092 = vmatpush.xpose.msk.msrb.mxu3 %vm4536_vm12, %v5398_v15 }
 0x3c1   : > { %4964 = vmatmul.msk.f32.gmra.mxu1 %vm1511_vm7, %v3827_v32  ;;  %5035 = vmatpush.xpose.msk.msra.mxu2 %vm4536_vm12, %v5398_v15  ;;  %v3834_v32 = vld [vmem:[%s8742_s7 + $0x68] sm:$0xff] }
 0x3c4   : > { %5093 = vmatpush.xpose.msk.msrb.mxu3 %vm4536_vm12, %v5399_v45 }
 0x3c5   : > { %4937 = vmatmul.msk.f32.gmra.mxu0 %vm1511_vm7, %v3278_v35  ;;  %5036 = vmatpush.xpose.msk.msra.mxu2 %vm4536_vm12, %v5399_v45 }
 0x3c8   : > { %5094 = vmatpush.xpose.msk.msrb.mxu3 %vm4536_vm12, %v5400_v21 }
 0x3c9   : > { %4965 = vmatmul.msk.f32.gmra.mxu1 %vm1511_vm7, %v3828_v5  ;;  %5037 = vmatpush.xpose.msk.msra.mxu2 %vm4536_vm12, %v5400_v21 }
 0x3cd   : > { %4938 = vmatmul.msk.f32.gmra.mxu0 %vm1511_vm7, %v3279_v16 }
 0x3d1   : > { %4966 = vmatmul.msk.f32.gmra.mxu1 %vm1511_vm7, %v3829_v62 }
 0x3d5   : > { %4939 = vmatmul.msk.f32.gmra.mxu0 %vm1511_vm7, %v3280_v59 }
 0x3d9   : > { %4967 = vmatmul.msk.f32.gmra.mxu1 %vm1511_vm7, %v3830_v30 }
 0x3dd   : > { %4940 = vmatmul.msk.f32.gmra.mxu0 %vm1511_vm7, %v3281_v56 }
 0x3e1   : > { %4968 = vmatmul.msk.f32.gmra.mxu1 %vm1511_vm7, %v3831_v26 }
 0x3e5   : > { %4941 = vmatmul.msk.f32.gmra.mxu0 %vm1511_vm7, %v3282_v54  ;;  %v3836_v54 = vld [vmem:[%s8742_s7 + $0x78] sm:$0xff] }
 0x3e9   : > { %4969 = vmatmul.msk.f32.gmra.mxu1 %vm1511_vm7, %v3832_v28 }
 0x3ea   : > { %v3469_v55 = vpop.f32.mrf.mxu0 }
 0x3eb   : > { %v3470_v61 = vadd.f32 %v3469_v55, %v7931_v42 }
 0x3ed   : > { %v4942_v57 = vmul.f32 -1.442695, %v3470_v61 }
 0x3ef   : > { %5234 = vpow2.f32 %v4942_v57 }
 0x3f1   : > { %4970 = vmatmul.msk.f32.gmra.mxu1 %vm1511_vm7, %v3833_v12 }
 0x3f2   : > { %v3472_v44 = vpop.f32.mrf.mxu0 }
 0x3f3   : > { %v3473_v23 = vadd.f32 %v3472_v44, %v7928_v31  ;;  %v3835_v31 = vld [vmem:[%s8742_s7 + $0x70] sm:$0xff] }
 0x3f5   : > { %v5235_v24 = vpop.eup %5234  ;;  %v4943_v40 = vmul.f32 -1.442695, %v3473_v23 }
 0x3f6   : > { %v3565_v13 = vadd.f32 1.0, %v5235_v24 }
 0x3f7   : > { %5236 = vpow2.f32 %v4943_v40 }
 0x3f8   : > { %5238 = vrcp.f32 %v3565_v13  ;;  %v3592_v63 = vand.u32 2147483648, %v3565_v13  ;;  %vm3586_vm14 = vweird.f32 %v3565_v13 }
 0x3f9   : > { %4971 = vmatmul.msk.f32.gmra.mxu1 %vm1511_vm7, %v3834_v32 }
 0x3fa   : > { %v3475_v42 = vpop.f32.mrf.mxu0  ;;  %v3593_v39 = vor.u32 1.1754944e-38, %v3592_v63 }
 0x3fb   : > { %v3476_v2 = vadd.f32 %v3475_v42, %v7944_v4  ;;  %v3590_v4 = vand.u32 2147483647, %v3565_v13 }
 0x3fd   : > { %v5237_v35 = vpop.eup %5236  ;;  %v4944_v58 = vmul.f32 -1.442695, %v3476_v2  ;;  %vm3591_vm0 = vcmp.eq.f32.partialorder %v3590_v4, 8.507059e+37 }
 0x3fe   : > { %v5239_v5 = vpop.eup %5238  ;;  %v3566_v60 = vadd.f32 1.0, %v5237_v35 }
 0x3ff   : > { %5240 = vpow2.f32 %v4944_v58  ;;  %v3582_v16 = vmul.f32 %v5239_v5, %v3565_v13  ;;  %vm3587_vm13 = vweird.f32 %v5239_v5 }
 0x400   : > { %5242 = vrcp.f32 %v3566_v60  ;;  %vm3588_vm15 = vmor %vm3586_vm14, %vm3587_vm13  ;;  %v3607_v21 = vand.u32 2147483648, %v3566_v60  ;;  %v3605_v12 = vand.u32 2147483647, %v3566_v60  ;;  %vm3601_vm2 = vweird.f32 %v3566_v60 }
 0x401   : > { %4972 = vmatmul.msk.f32.gmra.mxu1 %vm1511_vm7, %v3835_v31  ;;  %v3583_v17 = vsub.f32 1.0, %v3582_v16 }
 0x402   : > { %v3478_v62 = vpop.f32.mrf.mxu0  ;;  %v3608_v42 = vor.u32 1.1754944e-38, %v3607_v21  ;;  %vm3606_vm4 = vcmp.eq.f32.partialorder %v3605_v12, 8.507059e+37 }
 0x403   : > { %v3479_v59 = vadd.f32 %v3478_v62, %v7938_v36  ;;  %v3584_v27 = vmul.f32 %v5239_v5, %v3583_v17 }
 0x405   : > { %v5241_v30 = vpop.eup %5240  ;;  %v4945_v47 = vmul.f32 -1.442695, %v3479_v59  ;;  %v3585_v56 = vadd.f32 %v5239_v5, %v3584_v27 }
 0x406   : > { %v5243_v29 = vpop.eup %5242  ;;  %v3567_v26 = vadd.f32 1.0, %v5241_v30 }
 0x407   : > { %5244 = vpow2.f32 %v4945_v47  ;;  %v3589_v15 = vsel %vm3588_vm15, %v5239_v5, %v3585_v56  ;;  %v3597_v28 = vmul.f32 %v5243_v29, %v3566_v60  ;;  %vm3602_vm1 = vweird.f32 %v5243_v29 }
 0x408   : > { %5246 = vrcp.f32 %v3567_v26  ;;  %v3594_v36 = vsel %vm3591_vm0, %v3593_v39, %v3589_v15  ;;  %vm3603_vm3 = vmor %vm3601_vm2, %vm3602_vm1  ;;  %v3622_v31 = vand.u32 2147483648, %v3567_v26  ;;  %v3620_v60 = vand.u32 2147483647, %v3567_v26 }
 0x409   : > { %5006 = vmatmul.msk.f32.vlgmr.msrb.gmra.mxu2 %vm1511_vm7, %v3594_v36  ;;  %4973 = vmatmul.msk.f32.gmra.mxu1 %vm1511_vm7, %v3836_v54  ;;  %v3598_v45 = vsub.f32 1.0, %v3597_v28  ;;  %vm3616_vm6 = vweird.f32 %v3567_v26 }
 0x40a   : > { %v3481_v55 = vpop.f32.mrf.mxu0  ;;  %v3623_v56 = vor.u32 1.1754944e-38, %v3622_v31  ;;  %vm3621_vm9 = vcmp.eq.f32.partialorder %v3620_v60, 8.507059e+37 }
 0x40b   : > { %v3482_v61 = vadd.f32 %v3481_v55, %v7947_v49  ;;  %v3599_v57 = vmul.f32 %v5243_v29, %v3598_v45 }
 0x40d   : > { %v5245_v44 = vpop.eup %5244  ;;  %v4946_v23 = vmul.f32 -1.442695, %v3482_v61  ;;  %v3600_v24 = vadd.f32 %v5243_v29, %v3599_v57 }
 0x40e   : > { %v5247_v40 = vpop.eup %5246  ;;  %v3568_v13 = vadd.f32 1.0, %v5245_v44  ;;  %v4023_v32 = vpop.f32.mrf.mxu1 }
 0x40f   : > { %5248 = vpow2.f32 %v4946_v23  ;;  %v3604_v2 = vsel %vm3603_vm3, %v5243_v29, %v3600_v24  ;;  %v3612_v35 = vmul.f32 %v5247_v40, %v3567_v26  ;;  %vm3617_vm5 = vweird.f32 %v5247_v40 }
 0x410   : > { %5250 = vrcp.f32 %v3568_v13  ;;  %v3609_v58 = vsel %vm3606_vm4, %v3608_v42, %v3604_v2  ;;  %v4024_v63 = vadd.f32 %v4023_v32, %v8018_v50  ;;  %vm3618_vm8 = vmor %vm3616_vm6, %vm3617_vm5  ;;  %v3637_v50 = vand.u32 2147483648, %v3568_v13 }
 0x411   : > { %5007 = vmatmul.msk.f32.gmra.mxu2 %vm1511_vm7, %v3609_v58  ;;  %v3613_v49 = vsub.f32 1.0, %v3612_v35  ;;  %v3635_v45 = vand.u32 2147483647, %v3568_v13  ;;  %vm3631_vm11 = vweird.f32 %v3568_v13 }
 0x412   : > { %v3484_v5 = vpop.f32.mrf.mxu0  ;;  %v4974_v54 = vmul.f32 -1.442695, %v4024_v63  ;;  %v3638_v24 = vor.u32 1.1754944e-38, %v3637_v50 }
 0x413   : > { %v3485_v16 = vadd.f32 %v3484_v5, %v7954_v6  ;;  %v3614_v17 = vmul.f32 %v5247_v40, %v3613_v49  ;;  %vm3636_vm14 = vcmp.eq.f32.partialorder %v3635_v45, 8.507059e+37 }
 0x415   : > { %v5249_v62 = vpop.eup %5248  ;;  %v4947_v59 = vmul.f32 -1.442695, %v3485_v16  ;;  %v3615_v27 = vadd.f32 %v5247_v40, %v3614_v17 }
 0x416   : > { %v5251_v4 = vpop.eup %5250  ;;  %v3569_v30 = vadd.f32 1.0, %v5249_v62  ;;  %v4026_v47 = vpop.f32.mrf.mxu1 }
 0x417   : > { %5252 = vpow2.f32 %v4947_v59  ;;  %v3619_v29 = vsel %vm3618_vm8, %v5247_v40, %v3615_v27  ;;  %v3627_v39 = vmul.f32 %v5251_v4, %v3568_v13  ;;  %vm3632_vm10 = vweird.f32 %v5251_v4 }
 0x418   : > { %5254 = vrcp.f32 %v3569_v30  ;;  %v3624_v6 = vsel %vm3621_vm9, %v3623_v56, %v3619_v29  ;;  %v4027_v21 = vadd.f32 %v4026_v47, %v8028_v34  ;;  %vm3633_vm13 = vmor %vm3631_vm11, %vm3632_vm10  ;;  %v3650_v35 = vand.u32 2147483647, %v3569_v30 }
 0x419   : > { %5008 = vmatmul.msk.f32.gmra.mxu2 %vm1511_vm7, %v3624_v6  ;;  %v3628_v15 = vsub.f32 1.0, %v3627_v39  ;;  %5256 = vpow2.f32 %v4974_v54  ;;  %v3652_v34 = vand.u32 2147483648, %v3569_v30  ;;  %vm3646_vm0 = vweird.f32 %v3569_v30 }
 0x41a   : > { %v3487_v28 = vpop.f32.mrf.mxu0  ;;  %v4975_v42 = vmul.f32 -1.442695, %v4027_v21  ;;  %vm3651_vm2 = vcmp.eq.f32.partialorder %v3650_v35, 8.507059e+37 }
 0x41b   : > { %v3488_v36 = vadd.f32 %v3487_v28, %v7963_v18  ;;  %v3629_v26 = vmul.f32 %v5251_v4, %v3628_v15  ;;  %v3653_v27 = vor.u32 1.1754944e-38, %v3652_v34 }
 0x41d   : > { %v5253_v55 = vpop.eup %5252  ;;  %v4948_v61 = vmul.f32 -1.442695, %v3488_v36  ;;  %v3630_v57 = vadd.f32 %v5251_v4, %v3629_v26 }
 0x41e   : > { %v5255_v12 = vpop.eup %5254  ;;  %v3570_v44 = vadd.f32 1.0, %v5253_v55  ;;  %v4029_v23 = vpop.f32.mrf.mxu1 }
 0x41f   : > { %5258 = vpow2.f32 %v4948_v61  ;;  %v3634_v40 = vsel %vm3633_vm13, %v5251_v4, %v3630_v57  ;;  %v3642_v32 = vmul.f32 %v5255_v12, %v3569_v30  ;;  %v5257_v58 = vpop.eup %5256  ;;  %vm3647_vm15 = vweird.f32 %v5255_v12 }
 0x420   : > { %5260 = vrcp.f32 %v3570_v44  ;;  %v3639_v18 = vsel %vm3636_vm14, %v3638_v24, %v3634_v40  ;;  %v8258_v62 = vadd.f32 1.0, %v5257_v58  ;;  %vm3648_vm1 = vmor %vm3646_vm0, %vm3647_vm15  ;;  %v4030_v29 = vadd.f32 %v4029_v23, %v8030_v38 }
 0x421   : > { %5009 = vmatmul.msk.f32.gmra.mxu2 %vm1511_vm7, %v3639_v18  ;;  %v3643_v13 = vsub.f32 1.0, %v3642_v32  ;;  %5262 = vpow2.f32 %v4975_v42  ;;  %v3665_v54 = vand.u32 2147483647, %v3570_v44  ;;  %v3667_v15 = vand.u32 2147483648, %v3570_v44 }
 0x422   : > { %v3490_v2 = vpop.f32.mrf.mxu0  ;;  %v4976_v26 = vmul.f32 -1.442695, %v4030_v29  ;;  %vm3661_vm4 = vweird.f32 %v3570_v44 }
 0x423   : > { %v3491_v49 = vadd.f32 %v3490_v2, %v7965_v9  ;;  %v3644_v5 = vmul.f32 %v5255_v12, %v3643_v13  ;;  %vm3666_vm6 = vcmp.eq.f32.partialorder %v3665_v54, 8.507059e+37 }
 0x425   : > { %v5259_v31 = vpop.eup %5258  ;;  %v4949_v16 = vmul.f32 -1.442695, %v3491_v49  ;;  %v3645_v17 = vadd.f32 %v5255_v12, %v3644_v5 }
 0x426   : > { %v5261_v60 = vpop.eup %5260  ;;  %v8260_v63 = vadd.f32 1.0, %v5259_v31  ;;  %v4032_v59 = vpop.f32.mrf.mxu1 }
 0x427   : > { %5264 = vpow2.f32 %v4949_v16  ;;  %v4033_v4 = vadd.f32 %v4032_v59, %v7971_v43  ;;  %v3649_v9 = vsel %vm3648_vm1, %v5255_v12, %v3645_v17  ;;  %v3657_v47 = vmul.f32 %v5261_v60, %v3570_v44  ;;  %v5263_v28 = vpop.eup %5262 }
 0x428   : > { %5266 = vrcp.f32 %v8260_v63  ;;  %v3654_v56 = vsel %vm3651_vm2, %v3653_v27, %v3649_v9  ;;  %vm3662_vm3 = vweird.f32 %v5261_v60  ;;  %v8268_v21 = vadd.f32 1.0, %v5263_v28 }
 0x429   : > { %v4977_v30 = vmul.f32 -1.442695, %v4033_v4  ;;  %5010 = vmatmul.msk.f32.gmra.mxu2 %vm1511_vm7, %v3654_v56  ;;  %v3658_v39 = vsub.f32 1.0, %v3657_v47  ;;  %5268 = vrcp.f32 %v8258_v62  ;;  %vm3663_vm5 = vmor %vm3661_vm4, %vm3662_vm3  ;;  %v3668_v12 = vor.u32 1.1754944e-38, %v3667_v15 }
 0x42a   : > { %v3493_v6 = vpop.f32.mrf.mxu0  ;;  %v3682_v35 = vand.u32 2147483648, %v8260_v63  ;;  %vm3676_vm9 = vweird.f32 %v8260_v63 }
 0x42b   : > { %5270 = vpow2.f32 %v4977_v30  ;;  %v3494_v43 = vadd.f32 %v3493_v6, %v7981_v51  ;;  %v3659_v50 = vmul.f32 %v5261_v60, %v3658_v39 }
 0x42d   : > { %v5265_v36 = vpop.eup %5264  ;;  %v4950_v45 = vmul.f32 -1.442695, %v3494_v43  ;;  %v3660_v55 = vadd.f32 %v5261_v60, %v3659_v50 }
 0x42e   : > { %v5267_v38 = vpop.eup %5266  ;;  %v8270_v61 = vadd.f32 1.0, %v5265_v36  ;;  %v4035_v57 = vpop.f32.mrf.mxu1 }
 0x42f   : > { %5272 = vpow2.f32 %v4950_v45  ;;  %v4036_v23 = vadd.f32 %v4035_v57, %v7973_v11  ;;  %v3664_v51 = vsel %vm3663_vm5, %v5261_v60, %v3660_v55  ;;  %v3672_v24 = vmul.f32 %v5267_v38, %v8260_v63  ;;  %v8274_v40 = vpop.eup %5268 }
 0x430   : > { %5274 = vrcp.f32 %v8270_v61  ;;  %v3669_v44 = vsel %vm3666_vm6, %v3668_v12, %v3664_v51  ;;  %v3680_v11 = vand.u32 2147483647, %v8260_v63  ;;  %vm3677_vm8 = vweird.f32 %v5267_v38 }
 0x431   : > { %v5271_v32 = vpop.eup %5270  ;;  %5276 = vpow2.f32 %v4976_v26  ;;  %v4978_v18 = vmul.f32 -1.442695, %v4036_v23  ;;  %5011 = vmatmul.msk.f32.gmra.mxu2 %vm1511_vm7, %v3669_v44  ;;  %v3673_v42 = vsub.f32 1.0, %v3672_v24  ;;  %v8286_v49 = vmul.f32 %v8274_v40, %v8258_v62  ;;  %vm3678_vm10 = vmor %vm3676_vm9, %vm3677_vm8 }
 0x432   : > { %5278 = vrcp.f32 %v8268_v21  ;;  %v8279_v13 = vadd.f32 1.0, %v5271_v32  ;;  %v3496_v2 = vpop.f32.mrf.mxu0  ;;  %v3695_v17 = vand.u32 2147483647, %v8270_v61  ;;  %vm3681_vm11 = vcmp.eq.f32.partialorder %v3680_v11, 8.507059e+37 }
 0x433   : > { %5280 = vpow2.f32 %v4978_v18  ;;  %v3497_v34 = vadd.f32 %v3496_v2, %v7986_v3  ;;  %v3674_v58 = vmul.f32 %v5267_v38, %v3673_v42  ;;  %v3683_v3 = vor.u32 1.1754944e-38, %v3682_v35 }
 0x434   : > { %5282 = vrcp.f32 %v8279_v13  ;;  %v3697_v4 = vand.u32 2147483648, %v8270_v61  ;;  %v4189_v39 = vand.u32 2147483647, %v8279_v13  ;;  %v4191_v6 = vand.u32 2147483648, %v8279_v13 }
 0x435   : > { %v5273_v5 = vpop.eup %5272  ;;  %v4951_v31 = vmul.f32 -1.442695, %v3497_v34  ;;  %v3675_v16 = vadd.f32 %v5267_v38, %v3674_v58  ;;  %vm3691_vm13 = vweird.f32 %v8270_v61  ;;  %vm8305_vm14 = vcmp.eq.f32.partialorder %v3695_v17, 8.507059e+37 }
 0x436   : > { %v5275_v60 = vpop.eup %5274  ;;  %v8291_v59 = vadd.f32 1.0, %v5273_v5  ;;  %v4038_v27 = vpop.f32.mrf.mxu1  ;;  %v3698_v26 = vor.u32 1.1754944e-38, %v3697_v4  ;;  %vm4185_vm0 = vweird.f32 %v8279_v13  ;;  %vm8315_vm1 = vcmp.eq.f32.partialorder %v4189_v39, 8.507059e+37 }
 0x437   : > { %v8294_v9 = vpop.eup %5276  ;;  %5284 = vpow2.f32 %v4951_v31  ;;  %v4039_v47 = vadd.f32 %v4038_v27, %v7978_v8  ;;  %v3679_v56 = vsel %vm3678_vm10, %v5267_v38, %v3675_v16  ;;  %v3687_v29 = vmul.f32 %v5275_v60, %v8270_v61 }
 0x438   : > { %v8298_v63 = vpop.eup %5278  ;;  %5286 = vrcp.f32 %v8291_v59  ;;  %v3684_v30 = vsel %vm3681_vm11, %v3683_v3, %v3679_v56  ;;  %vm3692_vm15 = vweird.f32 %v5275_v60  ;;  %v4192_v12 = vor.u32 1.1754944e-38, %v4191_v6 }
 0x439   : > { %v5281_v54 = vpop.eup %5280  ;;  %v4979_v15 = vmul.f32 -1.442695, %v4039_v47  ;;  %5012 = vmatmul.msk.f32.gmra.mxu2 %vm1511_vm7, %v3684_v30  ;;  %v3688_v28 = vsub.f32 1.0, %v3687_v29  ;;  %v3710_v23 = vand.u32 2147483647, %v8291_v59  ;;  %v3712_v18 = vand.u32 2147483648, %v8291_v59  ;;  %vm3693_vm2 = vmor %vm3691_vm13, %vm3692_vm15 }
 0x43a   : > { %v5283_v43 = vpop.eup %5282  ;;  %v8309_v50 = vadd.f32 1.0, %v5281_v54  ;;  %v3499_v36 = vpop.f32.mrf.mxu0  ;;  %vm3706_vm4 = vweird.f32 %v8291_v59 }
 0x43b   : > { %5288 = vpow2.f32 %v4979_v15  ;;  %v3500_v45 = vadd.f32 %v3499_v36, %v7988_v10  ;;  %v3689_v55 = vmul.f32 %v5275_v60, %v3688_v28  ;;  %v4181_v38 = vmul.f32 %v5283_v43, %v8279_v13 }
 0x43c   : > { %5290 = vrcp.f32 %v8309_v50  ;;  %vm4186_vm3 = vweird.f32 %v5283_v43  ;;  %v4204_v11 = vand.u32 2147483647, %v8309_v50  ;;  %vm8333_vm5 = vcmp.eq.f32.partialorder %v3710_v23, 8.507059e+37 }
 0x43d   : > { %v5285_v51 = vpop.eup %5284  ;;  %v4952_v24 = vmul.f32 -1.442695, %v3500_v45  ;;  %v3690_v44 = vadd.f32 %v5275_v60, %v3689_v55  ;;  %v4182_v32 = vsub.f32 1.0, %v4181_v38  ;;  %v3713_v3 = vor.u32 1.1754944e-38, %v3712_v18  ;;  %vm4187_vm6 = vmor %vm4185_vm0, %vm4186_vm3 }
 0x43e   : > { %v5287_v42 = vpop.eup %5286  ;;  %v8321_v10 = vadd.f32 1.0, %v5285_v51  ;;  %v4041_v2 = vpop.f32.mrf.mxu1  ;;  %vm4200_vm9 = vweird.f32 %v8309_v50  ;;  %vm8347_vm10 = vcmp.eq.f32.partialorder %v4204_v11, 8.507059e+37 }
 0x43f   : > { %5292 = vpow2.f32 %v4952_v24  ;;  %v4042_v35 = vadd.f32 %v4041_v2, %v7991_v53  ;;  %v3694_v34 = vsel %vm3693_vm2, %v5275_v60, %v3690_v44  ;;  %v4183_v58 = vmul.f32 %v5283_v43, %v4182_v32 }
 0x440   : > { %5294 = vrcp.f32 %v8321_v10  ;;  %v3699_v5 = vsel %vm8305_vm14, %v3698_v26, %v3694_v34  ;;  %v3702_v31 = vmul.f32 %v5287_v42, %v8291_v59  ;;  %v4206_v53 = vand.u32 2147483648, %v8309_v50 }
 0x441   : > { %v5289_v16 = vpop.eup %5288  ;;  %v4980_v17 = vmul.f32 -1.442695, %v4042_v35  ;;  %5013 = vmatmul.msk.f32.gmra.mxu2 %vm1511_vm7, %v3699_v5  ;;  %v4184_v27 = vadd.f32 %v5283_v43, %v4183_v58  ;;  %vm3707_vm8 = vweird.f32 %v5287_v42  ;;  %v3725_v15 = vand.u32 2147483647, %v8321_v10 }
 0x442   : > { %v5291_v60 = vpop.eup %5290  ;;  %v8339_v4 = vadd.f32 1.0, %v5289_v16  ;;  %v3502_v47 = vpop.f32.mrf.mxu0  ;;  %v3703_v56 = vsub.f32 1.0, %v3702_v31  ;;  %vm3721_vm11 = vweird.f32 %v8321_v10  ;;  %v3727_v38 = vand.u32 2147483648, %v8321_v10  ;;  %vm3708_vm14 = vmor %vm3706_vm4, %vm3707_vm8 }
 0x443   : > { %5296 = vpow2.f32 %v4980_v17  ;;  %v3503_v29 = vadd.f32 %v3502_v47, %v7999_v19  ;;  %v4188_v30 = vsel %vm4187_vm6, %v5283_v43, %v4184_v27  ;;  %v4196_v39 = vmul.f32 %v5291_v60, %v8309_v50 }
 0x444   : > { %5298 = vrcp.f32 %v8339_v4  ;;  %v4193_v13 = vsel %vm8315_vm1, %v4192_v12, %v4188_v30  ;;  %v3704_v54 = vmul.f32 %v5287_v42, %v3703_v56  ;;  %v4207_v43 = vor.u32 1.1754944e-38, %v4206_v53 }
 0x445   : > { %v5293_v28 = vpop.eup %5292  ;;  %v4953_v8 = vmul.f32 -1.442695, %v3503_v29  ;;  %5041 = vmatmul.msk.f32.vlgmr.msrb.gmra.mxu3 %vm4536_vm12, %v4193_v13  ;;  %v4197_v19 = vsub.f32 1.0, %v4196_v39  ;;  %vm4201_vm13 = vweird.f32 %v5291_v60  ;;  %vm8366_vm15 = vcmp.eq.f32.partialorder %v3725_v15, 8.507059e+37 }
 0x446   : > { %v5295_v36 = vpop.eup %5294  ;;  %v8357_v26 = vadd.f32 1.0, %v5293_v28  ;;  %v4044_v45 = vpop.f32.mrf.mxu1  ;;  %v3705_v55 = vadd.f32 %v5287_v42, %v3704_v54  ;;  %v4219_v44 = vand.u32 2147483647, %v8339_v4  ;;  %vm4202_vm0 = vmor %vm4200_vm9, %vm4201_vm13  ;;  %v3728_v34 = vor.u32 1.1754944e-38, %v3727_v38 }
 0x447   : > { %5300 = vpow2.f32 %v4953_v8  ;;  %v4045_v57 = vadd.f32 %v4044_v45, %v7993_v33  ;;  %v4198_v12 = vmul.f32 %v5291_v60, %v4197_v19  ;;  %v3717_v23 = vmul.f32 %v5295_v36, %v8321_v10 }
 0x448   : > { %5302 = vrcp.f32 %v8357_v26  ;;  %v3709_v51 = vsel %vm3708_vm14, %v5287_v42, %v3705_v55  ;;  %vm3722_vm1 = vweird.f32 %v5295_v36  ;;  %vm4215_vm2 = vweird.f32 %v8339_v4 }
 0x449   : > { %v5297_v32 = vpop.eup %5296  ;;  %v4981_v18 = vmul.f32 -1.442695, %v4045_v57  ;;  %v3714_v33 = vsel %vm8333_vm5, %v3713_v3, %v3709_v51  ;;  %v4199_v2 = vadd.f32 %v5291_v60, %v4198_v12  ;;  %v3718_v59 = vsub.f32 1.0, %v3717_v23  ;;  %vm3723_vm5 = vmor %vm3721_vm11, %vm3722_vm1 }
 0x44a   : > { %v8373_v11 = vpop.eup %5298  ;;  %v8375_v35 = vadd.f32 1.0, %v5297_v32  ;;  %5014 = vmatmul.msk.f32.gmra.mxu2 %vm1511_vm7, %v3714_v33  ;;  %v3505_v42 = vpop.f32.mrf.mxu0  ;;  %v4221_v58 = vand.u32 2147483648, %v8339_v4  ;;  %vm8389_vm3 = vcmp.eq.f32.partialorder %v4219_v44, 8.507059e+37  ;;  %vm3736_vm4 = vweird.f32 %v8357_v26 }
 0x44b   : > { %5304 = vpow2.f32 %v4981_v18  ;;  %v3506_v5 = vadd.f32 %v3505_v42, %v8001_v7  ;;  %v4203_v31 = vsel %vm4202_vm0, %v5291_v60, %v4199_v2  ;;  %v3719_v61 = vmul.f32 %v5295_v36, %v3718_v59 }
 0x44c   : > { %5306 = vrcp.f32 %v8375_v35  ;;  %v4208_v16 = vsel %vm8347_vm10, %v4207_v43, %v4203_v31  ;;  %v4211_v50 = vmul.f32 %v8373_v11, %v8339_v4  ;;  %v3740_v7 = vand.u32 2147483647, %v8357_v26 }
 0x44d   : > { %v5301_v27 = vpop.eup %5300  ;;  %v4954_v3 = vmul.f32 -1.442695, %v3506_v5  ;;  %5042 = vmatmul.msk.f32.gmra.mxu3 %vm4536_vm12, %v4208_v16  ;;  %v3720_v53 = vadd.f32 %v5295_v36, %v3719_v61  ;;  %vm4216_vm6 = vweird.f32 %v8373_v11  ;;  %v4222_v30 = vor.u32 1.1754944e-38, %v4221_v58 }
 0x44e   : > { %v5303_v60 = vpop.eup %5302  ;;  %v8396_v47 = vadd.f32 1.0, %v5301_v27  ;;  %v4047_v56 = vpop.f32.mrf.mxu1  ;;  %v4212_v29 = vsub.f32 1.0, %v4211_v50  ;;  %v3742_v10 = vand.u32 2147483648, %v8357_v26  ;;  %vm8409_vm9 = vcmp.eq.f32.partialorder %v3740_v7, 8.507059e+37  ;;  %vm4217_vm11 = vmor %vm4215_vm2, %vm4216_vm6 }
 0x44f   : > { %5308 = vpow2.f32 %v4954_v3  ;;  %v4048_v39 = vadd.f32 %v4047_v56, %v7996_v0  ;;  %v3724_v6 = vsel %vm3723_vm5, %v5295_v36, %v3720_v53  ;;  %v3732_v13 = vmul.f32 %v5303_v60, %v8357_v26 }
 0x450   : > { %5310 = vrcp.f32 %v8396_v47  ;;  %v3729_v54 = vsel %vm8366_vm15, %v3728_v34, %v3724_v6  ;;  %v4213_v15 = vmul.f32 %v8373_v11, %v4212_v29  ;;  %vm3737_vm8 = vweird.f32 %v5303_v60 }
 0x451   : > { %v5305_v28 = vpop.eup %5304  ;;  %v4982_v8 = vmul.f32 -1.442695, %v4048_v39  ;;  %v3733_v19 = vsub.f32 1.0, %v3732_v13  ;;  %vm4230_vm10 = vweird.f32 %v8375_v35  ;;  %v4234_v38 = vand.u32 2147483647, %v8375_v35  ;;  %vm3738_vm14 = vmor %vm3736_vm4, %vm3737_vm8 }
 0x452   : > { %v5307_v0 = vpop.eup %5306  ;;  %v8414_v36 = vadd.f32 1.0, %v5305_v28  ;;  %5015 = vmatmul.msk.f32.gmra.mxu2 %vm1511_vm7, %v3729_v54  ;;  %v3508_v45 = vpop.f32.mrf.mxu0  ;;  %v4214_v55 = vadd.f32 %v8373_v11, %v4213_v15  ;;  %v4236_v57 = vand.u32 2147483648, %v8375_v35  ;;  %v3743_v44 = vor.u32 1.1754944e-38, %v3742_v10 }
 0x453   : > { %5312 = vpow2.f32 %v4982_v8  ;;  %v3509_v12 = vadd.f32 %v3508_v45, %v8003_v14  ;;  %v3734_v23 = vmul.f32 %v5303_v60, %v3733_v19  ;;  %v4226_v51 = vmul.f32 %v5307_v0, %v8375_v35 }
 0x454   : > { %5314 = vrcp.f32 %v8414_v36  ;;  %v4218_v24 = vsel %vm4217_vm11, %v8373_v11, %v4214_v55  ;;  %vm4231_vm13 = vweird.f32 %v5307_v0  ;;  %vm8436_vm15 = vcmp.eq.f32.partialorder %v4234_v38, 8.507059e+37 }
 0x455   : > { %v5309_v32 = vpop.eup %5308  ;;  %v4955_v18 = vmul.f32 -1.442695, %v3509_v12  ;;  %v4223_v33 = vsel %vm8389_vm3, %v4222_v30, %v4218_v24  ;;  %v3735_v14 = vadd.f32 %v5303_v60, %v3734_v23  ;;  %v4227_v2 = vsub.f32 1.0, %v4226_v51  ;;  %vm4232_vm2 = vmor %vm4230_vm10, %vm4231_vm13 }
 0x456   : > { %v5311_v59 = vpop.eup %5310  ;;  %v8430_v42 = vadd.f32 1.0, %v5309_v32  ;;  %5043 = vmatmul.msk.f32.gmra.mxu3 %vm4536_vm12, %v4223_v33  ;;  %v4050_v4 = vpop.f32.mrf.mxu1  ;;  %v4237_v34 = vor.u32 1.1754944e-38, %v4236_v57  ;;  %v3755_v58 = vand.u32 2147483647, %v8396_v47  ;;  %vm3751_vm0 = vweird.f32 %v8396_v47 }
 0x457   : > { %5316 = vpow2.f32 %v4955_v18  ;;  %v4051_v5 = vadd.f32 %v4050_v4, %v8006_v37  ;;  %v3739_v31 = vsel %vm3738_vm14, %v5303_v60, %v3735_v14  ;;  %v4228_v61 = vmul.f32 %v5307_v0, %v4227_v2 }
 0x458   : > { %5318 = vrcp.f32 %v8430_v42  ;;  %v3744_v16 = vsel %vm8409_vm9, %v3743_v44, %v3739_v31  ;;  %v3747_v26 = vmul.f32 %v5311_v59, %v8396_v47  ;;  %vm3752_vm1 = vweird.f32 %v5311_v59 }
 0x459   : > { %v5313_v50 = vpop.eup %5312  ;;  %v4983_v17 = vmul.f32 -1.442695, %v4051_v5  ;;  %v4229_v27 = vadd.f32 %v5307_v0, %v4228_v61  ;;  %v3757_v3 = vand.u32 2147483648, %v8396_v47  ;;  %vm8454_vm3 = vcmp.eq.f32.partialorder %v3755_v58, 8.507059e+37  ;;  %vm3753_vm8 = vmor %vm3751_vm0, %vm3752_vm1 }
 0x45a   : > { %v5315_v53 = vpop.eup %5314  ;;  %v8448_v7 = vadd.f32 1.0, %v5313_v50  ;;  %5016 = vmatmul.msk.f32.gmra.mxu2 %vm1511_vm7, %v3744_v16  ;;  %v3511_v37 = vpop.f32.mrf.mxu0  ;;  %v3748_v60 = vsub.f32 1.0, %v3747_v26  ;;  %v4249_v29 = vand.u32 2147483647, %v8414_v36  ;;  %vm4245_vm4 = vweird.f32 %v8414_v36 }
 0x45b   : > { %5320 = vpow2.f32 %v4983_v17  ;;  %v3512_v30 = vadd.f32 %v3511_v37, %v8013_v22  ;;  %v4233_v39 = vsel %vm4232_vm2, %v5307_v0, %v4229_v27  ;;  %v4241_v13 = vmul.f32 %v5315_v53, %v8414_v36 }
 0x45c   : > { %5322 = vrcp.f32 %v8448_v7  ;;  %v4238_v6 = vsel %vm8436_vm15, %v4237_v34, %v4233_v39  ;;  %v3749_v35 = vmul.f32 %v5311_v59, %v3748_v60  ;;  %v3758_v10 = vor.u32 1.1754944e-38, %v3757_v3 }
 0x45d   : > { %v5317_v54 = vpop.eup %5316  ;;  %v4956_v15 = vmul.f32 -1.442695, %v3512_v30  ;;  %vm4246_vm5 = vweird.f32 %v5315_v53  ;;  %v4251_v28 = vand.u32 2147483648, %v8414_v36  ;;  %v4242_v0 = vsub.f32 1.0, %v4241_v13 }
 0x45e   : > { %v5319_v8 = vpop.eup %5318  ;;  %v8466_v19 = vadd.f32 1.0, %v5317_v54  ;;  %5044 = vmatmul.msk.f32.gmra.mxu3 %vm4536_vm12, %v4238_v6  ;;  %v4053_v22 = vpop.f32.mrf.mxu1  ;;  %v3750_v43 = vadd.f32 %v5311_v59, %v3749_v35  ;;  %vm8469_vm6 = vcmp.eq.f32.partialorder %v4249_v29, 8.507059e+37  ;;  %vm3766_vm9 = vweird.f32 %v8430_v42  ;;  %vm4247_vm11 = vmor %vm4245_vm4, %vm4246_vm5 }
 0x45f   : > { %5324 = vpow2.f32 %v4956_v15  ;;  %v4054_v55 = vadd.f32 %v4053_v22, %v8008_v46  ;;  %v3762_v38 = vmul.f32 %v5319_v8, %v8430_v42  ;;  %v4243_v12 = vmul.f32 %v5315_v53, %v4242_v0 }
 0x460   : > { %5326 = vrcp.f32 %v8466_v19  ;;  %v3754_v57 = vsel %vm3753_vm8, %v5311_v59, %v3750_v43  ;;  %v4252_v23 = vor.u32 1.1754944e-38, %v4251_v28  ;;  %v3770_v46 = vand.u32 2147483647, %v8430_v42 }
 0x461   : > { %v5321_v51 = vpop.eup %5320  ;;  %v4984_v24 = vmul.f32 -1.442695, %v4054_v55  ;;  %v3759_v44 = vsel %vm8454_vm3, %v3758_v10, %v3754_v57  ;;  %v3763_v32 = vsub.f32 1.0, %v3762_v38  ;;  %v4244_v14 = vadd.f32 %v5315_v53, %v4243_v12 }
 0x462   : > { %v5323_v18 = vpop.eup %5322  ;;  %v8483_v47 = vadd.f32 1.0, %v5321_v51  ;;  %5017 = vmatmul.msk.f32.gmra.mxu2 %vm1511_vm7, %v3759_v44  ;;  %v3514_v33 = vpop.f32.mrf.mxu0  ;;  %vm3767_vm10 = vweird.f32 %v5319_v8  ;;  %v3772_v2 = vand.u32 2147483648, %v8430_v42  ;;  %vm4260_vm13 = vweird.f32 %v8448_v7 }
 0x463   : > { %5328 = vpow2.f32 %v4984_v24  ;;  %v3515_v59 = vadd.f32 %v3514_v33, %v8015_v1  ;;  %v3764_v4 = vmul.f32 %v5319_v8, %v3763_v32  ;;  %v4248_v11 = vsel %vm4247_vm11, %v5315_v53, %v4244_v14  ;;  %vm3768_vm15 = vmor %vm3766_vm9, %vm3767_vm10 }
 0x464   : > { %5330 = vrcp.f32 %v8483_v47  ;;  %vm8493_vm14 = vcmp.eq.f32.partialorder %v3770_v46, 8.507059e+37  ;;  %v4256_v58 = vmul.f32 %v5323_v18, %v8448_v7  ;;  %v4253_v1 = vsel %vm8469_vm6, %v4252_v23, %v4248_v11 }
 0x465   : > { %v5325_v5 = vpop.eup %5324  ;;  %v4957_v31 = vmul.f32 -1.442695, %v3515_v59  ;;  %v3765_v61 = vadd.f32 %v5319_v8, %v3764_v4  ;;  %v3773_v36 = vor.u32 1.1754944e-38, %v3772_v2  ;;  %v4264_v27 = vand.u32 2147483647, %v8448_v7 }
 0x466   : > { %v5327_v16 = vpop.eup %5326  ;;  %v8500_v26 = vadd.f32 1.0, %v5325_v5  ;;  %5045 = vmatmul.msk.f32.gmra.mxu3 %vm4536_vm12, %v4253_v1  ;;  %v4056_v50 = vpop.f32.mrf.mxu1  ;;  %v4257_v17 = vsub.f32 1.0, %v4256_v58  ;;  %v4266_v3 = vand.u32 2147483648, %v8448_v7  ;;  %vm4261_vm0 = vweird.f32 %v5323_v18 }
 0x467   : > { %5332 = vpow2.f32 %v4957_v31  ;;  %v4057_v53 = vadd.f32 %v4056_v50, %v8010_v41  ;;  %v3769_v37 = vsel %vm3768_vm15, %v5319_v8, %v3765_v61  ;;  %v3777_v60 = vmul.f32 %v5327_v16, %v8466_v19  ;;  %vm4262_vm3 = vmor %vm4260_vm13, %vm4261_vm0 }
 0x468   : > { %5334 = vrcp.f32 %v8500_v26  ;;  %v3774_v56 = vsel %vm8493_vm14, %v3773_v36, %v3769_v37  ;;  %v4258_v29 = vmul.f32 %v5323_v18, %v4257_v17  ;;  %vm8513_vm1 = vcmp.eq.f32.partialorder %v4264_v27, 8.507059e+37 }
 0x469   : > { %v5329_v42 = vpop.eup %5328  ;;  %v4985_v30 = vmul.f32 -1.442695, %v4057_v53  ;;  %v4267_v6 = vor.u32 1.1754944e-38, %v4266_v3  ;;  %v3778_v35 = vsub.f32 1.0, %v3777_v60  ;;  %vm3782_vm2 = vweird.f32 %v5327_v16 }
 0x46a   : > { %v5331_v13 = vpop.eup %5330  ;;  %v8517_v41 = vadd.f32 1.0, %v5329_v42  ;;  %5018 = vmatmul.msk.f32.gmra.mxu2 %vm1511_vm7, %v3774_v56  ;;  %v4259_v54 = vadd.f32 %v5323_v18, %v4258_v29  ;;  %v3785_v15 = vand.u32 2147483647, %v8466_v19  ;;  %v3787_v28 = vand.u32 2147483648, %v8466_v19 }
 0x46b   : > { %5336 = vpow2.f32 %v4985_v30  ;;  %v3779_v10 = vmul.f32 %v5327_v16, %v3778_v35  ;;  %v4271_v8 = vmul.f32 %v5331_v13, %v8483_v47  ;;  %vm3781_vm4 = vweird.f32 %v8466_v19 }
 0x46c   : > { %5338 = vrcp.f32 %v8517_v41  ;;  %v4263_v22 = vsel %vm4262_vm3, %v5323_v18, %v4259_v54  ;;  %vm8527_vm5 = vcmp.eq.f32.partialorder %v3785_v15, 8.507059e+37  ;;  %v3788_v55 = vor.u32 1.1754944e-38, %v3787_v28  ;;  %vm3783_vm6 = vmor %vm3781_vm4, %vm3782_vm2 }
 0x46d   : > { %v5333_v0 = vpop.eup %5332  ;;  %v4268_v45 = vsel %vm8513_vm1, %v4267_v6, %v4263_v22  ;;  %v3780_v7 = vadd.f32 %v5327_v16, %v3779_v10  ;;  %v4272_v38 = vsub.f32 1.0, %v4271_v8  ;;  %vm4276_vm8 = vweird.f32 %v5331_v13 }
 0x46e   : > { %v5335_v57 = vpop.eup %5334  ;;  %v8533_v12 = vadd.f32 1.0, %v5333_v0  ;;  %5046 = vmatmul.msk.f32.gmra.mxu3 %vm4536_vm12, %v4268_v45  ;;  %v4059_v23 = vpop.f32.mrf.mxu1  ;;  %v4279_v19 = vand.u32 2147483647, %v8483_v47  ;;  %v4281_v51 = vand.u32 2147483648, %v8483_v47  ;;  %vm4275_vm9 = vweird.f32 %v8483_v47 }
 0x46f   : > { %v4060_v24 = vadd.f32 %v4059_v23, %v8021_v25  ;;  %v3784_v44 = vsel %vm3783_vm6, %v5327_v16, %v3780_v7  ;;  %v4273_v32 = vmul.f32 %v5331_v13, %v4272_v38  ;;  %v3792_v46 = vmul.f32 %v5335_v57, %v8500_v26  ;;  %vm4277_vm11 = vmor %vm4275_vm9, %vm4276_vm8 }
 0x470   : > { %5340 = vrcp.f32 %v8533_v12  ;;  %v3789_v18 = vsel %vm8527_vm5, %v3788_v55, %v3784_v44  ;;  %vm8545_vm10 = vcmp.eq.f32.partialorder %v4279_v19, 8.507059e+37  ;;  %v4282_v4 = vor.u32 1.1754944e-38, %v4281_v51 }
 0x471   : > { %v5337_v14 = vpop.eup %5336  ;;  %v4986_v2 = vmul.f32 -1.442695, %v4060_v24  ;;  %v4274_v59 = vadd.f32 %v5331_v13, %v4273_v32  ;;  %v3793_v25 = vsub.f32 1.0, %v3792_v46  ;;  %vm3797_vm13 = vweird.f32 %v5335_v57 }
 0x472   : > { %v5339_v11 = vpop.eup %5338  ;;  %v8549_v34 = vadd.f32 1.0, %v5337_v14  ;;  %5019 = vmatmul.msk.f32.gmra.mxu2 %vm1511_vm7, %v3789_v18  ;;  %v3800_v58 = vand.u32 2147483647, %v8500_v26  ;;  %v3802_v47 = vand.u32 2147483648, %v8500_v26  ;;  %v4137_v61 = vsub.f32 1.0, %v8286_v49 }
 0x473   : > { %5342 = vpow2.f32 %v4986_v2  ;;  %v4278_v5 = vsel %vm4277_vm11, %v5331_v13, %v4274_v59  ;;  %v3794_v31 = vmul.f32 %v5335_v57, %v3793_v25  ;;  %v4286_v1 = vmul.f32 %v5339_v11, %v8517_v41 }
 0x474   : > { %v8558_v36 = vadd.f32 1.0, %v8294_v9  ;;  %5344 = vrcp.f32 %v8549_v34  ;;  %v4283_v16 = vsel %vm8545_vm10, %v4282_v4, %v4278_v5  ;;  %vm3796_vm14 = vweird.f32 %v8500_v26 }
 0x475   : > { %v3795_v50 = vadd.f32 %v5335_v57, %v3794_v31  ;;  %vm3801_vm15 = vcmp.eq.f32.partialorder %v3800_v58, 8.507059e+37  ;;  %v4287_v17 = vsub.f32 1.0, %v4286_v1  ;;  %vm3798_vm0 = vmor %vm3796_vm14, %vm3797_vm13  ;;  %v3803_v49 = vor.u32 1.1754944e-38, %v3802_v47 }
 0x476   : > { %v5341_v27 = vpop.eup %5340  ;;  %5047 = vmatmul.msk.f32.gmra.mxu3 %vm4536_vm12, %v4283_v16  ;;  %v4062_v3 = vpop.f32.mrf.mxu1  ;;  %vm4291_vm1 = vweird.f32 %v5339_v11  ;;  %v4294_v9 = vand.u32 2147483647, %v8517_v41  ;;  %v4296_v53 = vand.u32 2147483648, %v8517_v41  ;;  %5346 = vrcp.f32 %v8558_v36 }
 0x477   : > { %v4063_v37 = vadd.f32 %v4062_v3, %v8023_v48  ;;  %v3799_v60 = vsel %vm3798_vm0, %v5335_v57, %v3795_v50  ;;  %v4288_v56 = vmul.f32 %v5339_v11, %v4287_v17  ;;  %v3807_v26 = vmul.f32 %v5341_v27, %v8533_v12 }
 0x478   : > { %v3804_v29 = vsel %vm3801_vm15, %v3803_v49, %v3799_v60  ;;  %vm4290_vm2 = vweird.f32 %v8517_v41  ;;  %v3815_v42 = vand.u32 2147483647, %v8533_v12  ;;  %vm4295_vm3 = vcmp.eq.f32.partialorder %v4294_v9, 8.507059e+37 }
 0x479   : > { %v5343_v30 = vpop.eup %5342  ;;  %v4987_v39 = vmul.f32 -1.442695, %v4063_v37  ;;  %v4289_v6 = vadd.f32 %v5339_v11, %v4288_v56  ;;  %v3808_v35 = vsub.f32 1.0, %v3807_v26  ;;  %vm4292_vm4 = vmor %vm4290_vm2, %vm4291_vm1  ;;  %v4297_v48 = vor.u32 1.1754944e-38, %v4296_v53 }
 0x47a   : > { %v5345_v13 = vpop.eup %5344  ;;  %v8573_v54 = vadd.f32 1.0, %v5343_v30  ;;  %5020 = vmatmul.msk.f32.gmra.mxu2 %vm1511_vm7, %v3804_v29  ;;  %vm3812_vm5 = vweird.f32 %v5341_v27  ;;  %v3817_v15 = vand.u32 2147483648, %v8533_v12  ;;  %v4138_v22 = vmul.f32 %v8274_v40, %v4137_v61 }
 0x47b   : > { %5348 = vpow2.f32 %v4987_v39  ;;  %v4293_v41 = vsel %vm4292_vm4, %v5339_v11, %v4289_v6  ;;  %v3809_v10 = vmul.f32 %v5341_v27, %v3808_v35  ;;  %v4301_v28 = vmul.f32 %v5345_v13, %v8549_v34 }
 0x47c   : > { %5350 = vrcp.f32 %v8573_v54  ;;  %v4298_v8 = vsel %vm4295_vm3, %v4297_v48, %v4293_v41  ;;  %vm3811_vm6 = vweird.f32 %v8533_v12  ;;  %v4151_v45 = vmul.f32 %v8298_v63, %v8268_v21  ;;  %v8584_v7 = vpop.eup %5346 }
 0x47d   : > { %v3810_v43 = vadd.f32 %v5341_v27, %v3809_v10  ;;  %v4302_v0 = vsub.f32 1.0, %v4301_v28  ;;  %vm3813_vm8 = vmor %vm3811_vm6, %vm3812_vm5  ;;  %vm3816_vm9 = vcmp.eq.f32.partialorder %v3815_v42, 8.507059e+37  ;;  %v3818_v38 = vor.u32 1.1754944e-38, %v3817_v15 }
 0x47e   : > { %5048 = vmatmul.msk.f32.gmra.mxu3 %vm4536_vm12, %v4298_v8  ;;  %v4065_v55 = vpop.f32.mrf.mxu1  ;;  %v4309_v57 = vand.u32 2147483647, %v8549_v34  ;;  %v4311_v23 = vand.u32 2147483648, %v8549_v34  ;;  %vm4306_vm10 = vweird.f32 %v5345_v13  ;;  %v4146_v44 = vand.u32 2147483648, %v8258_v62 }
 0x47f   : > { %v4066_v19 = vadd.f32 %v4065_v55, %v8025_v52  ;;  %v3814_v12 = vsel %vm3813_vm8, %v5341_v27, %v3810_v43  ;;  %v4303_v51 = vmul.f32 %v5345_v13, %v4302_v0  ;;  %vm4305_vm11 = vweird.f32 %v8549_v34 }
 0x480   : > { %v3819_v24 = vsel %vm3816_vm9, %v3818_v38, %v3814_v12  ;;  %vm4141_vm13 = vweird.f32 %v8274_v40  ;;  %vm4307_vm14 = vmor %vm4305_vm11, %vm4306_vm10  ;;  %v4312_v52 = vor.u32 1.1754944e-38, %v4311_v23  ;;  %v4139_v2 = vadd.f32 %v8274_v40, %v4138_v22 }
 0x481   : > { %v5349_v32 = vpop.eup %5348  ;;  %v4988_v46 = vmul.f32 -1.442695, %v4066_v19  ;;  %v4304_v18 = vadd.f32 %v5345_v13, %v4303_v51  ;;  %v4152_v59 = vsub.f32 1.0, %v4151_v45  ;;  %vm4310_vm15 = vcmp.eq.f32.partialorder %v4309_v57, 8.507059e+37 }
 0x482   : > { %v5351_v33 = vpop.eup %5350  ;;  %v8594_v14 = vadd.f32 1.0, %v5349_v32  ;;  %5021 = vmatmul.msk.f32.gmra.mxu2 %vm1511_vm7, %v3819_v24  ;;  %vm4140_vm0 = vweird.f32 %v8258_v62  ;;  %v4144_v34 = vand.u32 2147483647, %v8258_v62  ;;  %v4147_v47 = vor.u32 1.1754944e-38, %v4146_v44 }
 0x483   : > { %5352 = vpow2.f32 %v4988_v46  ;;  %v4308_v4 = vsel %vm4307_vm14, %v5345_v13, %v4304_v18  ;;  %v4316_v25 = vmul.f32 %v5351_v33, %v8573_v54  ;;  %vm8604_vm7 = vmor %vm4140_vm0, %vm4141_vm13  ;;  %v4326_v61 = vand.u32 2147483648, %v8573_v54 }
 0x484   : > { %5354 = vrcp.f32 %v8594_v14  ;;  %v4313_v11 = vsel %vm4310_vm15, %v4312_v52, %v4308_v4  ;;  %v4143_v1 = vsel %vm8604_vm7, %v8274_v40, %v4139_v2  ;;  %v4153_v16 = vmul.f32 %v8298_v63, %v4152_v59 }
 0x485   : > { %v4317_v5 = vsub.f32 1.0, %v4316_v25  ;;  %v4166_v62 = vmul.f32 %v8584_v7, %v8558_v36  ;;  %vm4321_vm1 = vweird.f32 %v5351_v33  ;;  %v4324_v27 = vand.u32 2147483647, %v8573_v54 }
 0x486   : > { %5049 = vmatmul.msk.f32.gmra.mxu3 %vm4536_vm12, %v4313_v11  ;;  %v4068_v31 = vpop.f32.mrf.mxu1  ;;  %vm4145_vm2 = vcmp.eq.f32.partialorder %v4144_v34, 8.507059e+37  ;;  %vm4156_vm3 = vweird.f32 %v8298_v63  ;;  %v4161_v3 = vand.u32 2147483648, %v8268_v21  ;;  %vm4320_vm4 = vweird.f32 %v8573_v54 }
 0x487   : > { %v4069_v50 = vadd.f32 %v4068_v31, %v8032_v20  ;;  %v4318_v17 = vmul.f32 %v5351_v33, %v4317_v5  ;;  %v4148_v9 = vsel %vm4145_vm2, %v4147_v47, %v4143_v1  ;;  %vm4322_vm5 = vmor %vm4320_vm4, %vm4321_vm1  ;;  %v4327_v20 = vor.u32 1.1754944e-38, %v4326_v61 }
 0x488   : > { %v4154_v56 = vadd.f32 %v8298_v63, %v4153_v16  ;;  %v4167_v26 = vsub.f32 1.0, %v4166_v62  ;;  %vm4325_vm6 = vcmp.eq.f32.partialorder %v4324_v27, 8.507059e+37  ;;  %vm4155_vm8 = vweird.f32 %v8268_v21 }
 0x489   : > { %v5353_v49 = vpop.eup %5352  ;;  %v4989_v40 = vmul.f32 -1.442695, %v4069_v50  ;;  %v4319_v53 = vadd.f32 %v5351_v33, %v4318_v17  ;;  %v4159_v6 = vand.u32 2147483647, %v8268_v21  ;;  %vm4157_vm9 = vmor %vm4155_vm8, %vm4156_vm3  ;;  %v4341_v54 = vand.u32 2147483648, %v8594_v14 }
 0x48a   : > { %v5355_v37 = vpop.eup %5354  ;;  %v8621_v60 = vadd.f32 1.0, %v5353_v49  ;;  %5038 = vmatmul.msk.f32.vlgmr.msra.gmra.mxu2 %vm4536_vm12, %v4148_v9  ;;  %v4158_v13 = vsel %vm4157_vm9, %v8298_v63, %v4154_v56  ;;  %v4168_v48 = vmul.f32 %v8584_v7, %v4167_v26  ;;  %v4162_v15 = vor.u32 1.1754944e-38, %v4161_v3 }
 0x48b   : > { %5356 = vpow2.f32 %v4989_v40  ;;  %v4323_v29 = vsel %vm4322_vm5, %v5351_v33, %v4319_v53  ;;  %v4331_v42 = vmul.f32 %v5355_v37, %v8594_v14  ;;  %vm4336_vm10 = vweird.f32 %v5355_v37 }
 0x48c   : > { %5358 = vrcp.f32 %v8621_v60  ;;  %v8627_v30 = vpop.f32.mrf.mxu2  ;;  %v4328_v39 = vsel %vm4325_vm6, %v4327_v20, %v4323_v29  ;;  %v4339_v10 = vand.u32 2147483647, %v8594_v14  ;;  %vm4160_vm11 = vcmp.eq.f32.partialorder %v4159_v6, 8.507059e+37 }
 0x48d   : > { %v4332_v35 = vsub.f32 1.0, %v4331_v42  ;;  %v4163_v21 = vsel %vm4160_vm11, %v4162_v15, %v4158_v13  ;;  %vm4335_vm13 = vweird.f32 %v8594_v14  ;;  %v4342_v63 = vor.u32 1.1754944e-38, %v4341_v54 }
 0x48e   : > { %5050 = vmatmul.msk.f32.gmra.mxu3 %vm4536_vm12, %v4328_v39  ;;  %vm4337_vm14 = vmor %vm4335_vm13, %vm4336_vm10  ;;  %v4169_v0 = vadd.f32 %v8584_v7, %v4168_v48  ;;  %vm4171_vm15 = vweird.f32 %v8584_v7  ;;  %vm4340_vm0 = vcmp.eq.f32.partialorder %v4339_v10, 8.507059e+37  ;;  %v4176_v55 = vand.u32 2147483648, %v8558_v36 }
 0x48f   : > { %v4333_v41 = vmul.f32 %v5355_v37, %v4332_v35  ;;  %vm4170_vm7 = vweird.f32 %v8558_v36  ;;  %v4174_v19 = vand.u32 2147483647, %v8558_v36  ;;  %v4356_v24 = vand.u32 2147483648, %v8621_v60 }
 0x490   : > { %vm4172_vm1 = vmor %vm4170_vm7, %vm4171_vm15  ;;  %v4177_v44 = vor.u32 1.1754944e-38, %v4176_v55  ;;  %v4354_v46 = vand.u32 2147483647, %v8621_v60  ;;  %vm4350_vm4 = vweird.f32 %v8621_v60 }
 0x491   : > { %v5357_v28 = vpop.eup %5356  ;;  %v4334_v8 = vadd.f32 %v5355_v37, %v4333_v41  ;;  %v4173_v51 = vsel %vm4172_vm1, %v8584_v7, %v4169_v0  ;;  %vm4175_vm3 = vcmp.eq.f32.partialorder %v4174_v19, 8.507059e+37  ;;  %v4357_v36 = vor.u32 1.1754944e-38, %v4356_v24 }
 0x492   : > { %v5359_v22 = vpop.eup %5358  ;;  %v4134_v43 = vadd.f32 1.0, %v5357_v28  ;;  %5039 = vmatmul.msk.f32.gmra.mxu2 %vm4536_vm12, %v4163_v21  ;;  %v4178_v18 = vsel %vm4175_vm3, %v4177_v44, %v4173_v51  ;;  %vm4355_vm6 = vcmp.eq.f32.partialorder %v4354_v46, 8.507059e+37 }
 0x493   : > { %v4338_v45 = vsel %vm4337_vm14, %v5355_v37, %v4334_v8  ;;  %v4346_v38 = vmul.f32 %v5359_v22, %v8621_v60  ;;  %vm4351_vm2 = vweird.f32 %v5359_v22 }
 0x494   : > { %5360 = vrcp.f32 %v4134_v43  ;;  %v8644_v57 = vpop.f32.mrf.mxu2  ;;  %v4343_v23 = vsel %vm4340_vm0, %v4342_v63, %v4338_v45  ;;  %vm4352_vm5 = vmor %vm4350_vm4, %vm4351_vm2  ;;  %v4371_v25 = vand.u32 2147483648, %v4134_v43  ;;  %v4369_v34 = vand.u32 2147483647, %v4134_v43 }
 0x495   : > { %v4347_v12 = vsub.f32 1.0, %v4346_v38  ;;  %vm4365_vm9 = vweird.f32 %v4134_v43 }
 0x496   : > { %5051 = vmatmul.msk.f32.gmra.mxu3 %vm4536_vm12, %v4343_v23  ;;  %v4372_v47 = vor.u32 1.1754944e-38, %v4371_v25  ;;  %vm4370_vm11 = vcmp.eq.f32.partialorder %v4369_v34, 8.507059e+37 }
 0x497   : > { %v4348_v32 = vmul.f32 %v5359_v22, %v4347_v12 }
 0x499   : > { %v4349_v33 = vadd.f32 %v5359_v22, %v4348_v32 }
 0x49a   : > { %v5361_v14 = vpop.eup %5360  ;;  %5040 = vmatmul.msk.f32.gmra.mxu2 %vm4536_vm12, %v4178_v18 }
 0x49b   : > { %v4353_v52 = vsel %vm4352_vm5, %v5359_v22, %v4349_v33  ;;  %v4361_v7 = vmul.f32 %v5361_v14, %v4134_v43  ;;  %vm4366_vm8 = vweird.f32 %v5361_v14  ;;  %v1945_v22 = vpop.trf.xlu1 }
 0x49c   : > { %v8654_v2 = vpop.f32.mrf.mxu2  ;;  %v4358_v59 = vsel %vm4355_vm6, %v4357_v36, %v4353_v52  ;;  %vm4367_vm10 = vmor %vm4365_vm9, %vm4366_vm8  ;;  %1961 = vst [vmem:[%s454_s15] sm:$0xff] %v1945_v22 }
 0x49d   : > { %v4362_v4 = vsub.f32 1.0, %v4361_v7 }
 0x49e   : > { %5052 = vmatmul.msk.f32.gmra.mxu3 %vm4536_vm12, %v4358_v59 }
 0x49f   : > { %v4363_v11 = vmul.f32 %v5361_v14, %v4362_v4 }
 0x4a1   : > { %v4364_v58 = vadd.f32 %v5361_v14, %v4363_v11 }
 0x4a3   : > { %v4368_v5 = vsel %vm4367_vm10, %v5361_v14, %v4364_v58 }
 0x4a4   : > { %v4497_v31 = vpop.f32.mrf.mxu2  ;;  %v4373_v1 = vsel %vm4370_vm11, %v4372_v47, %v4368_v5 }
 0x4a6   : > { %5053 = vmatmul.msk.f32.gmra.mxu3 %vm4536_vm12, %v4373_v1 }
 0x4ac   : > { %v4500_v61 = vpop.f32.mrf.mxu2 }
 0x4b4   : > { %v4503_v16 = vpop.f32.mrf.mxu2 }
 0x4bc   : > { %v4506_v62 = vpop.f32.mrf.mxu2 }
 0x4c4   : > { %v4509_v50 = vpop.f32.mrf.mxu2 }
 0x4c8   : > { %v4659_v17 = vpop.f32.mrf.mxu3 }
 0x4c9   : > { %v4701_v27 = vmul.f32 %v4659_v17, %v4497_v31 }
 0x4cb   : > { %4717 = vst [vmem:[%s8659_s14 + $0x18] sm:$0xff] %v4701_v27 }
 0x4cd   : > { %v4512_v3 = vpop.f32.mrf.mxu2 }
 0x4d0   : > { %v4662_v49 = vpop.f32.mrf.mxu3 }
 0x4d1   : > { %v4702_v40 = vmul.f32 %v4662_v49, %v4500_v61 }
 0x4d3   : > { %4718 = vst [vmem:[%s8659_s14 + $0x20] sm:$0xff] %v4702_v40 }
 0x4d5   : > { %v4515_v9 = vpop.f32.mrf.mxu2 }
 0x4d9   : > { %v4665_v53 = vpop.f32.mrf.mxu3 }
 0x4da   : > { %v4703_v37 = vmul.f32 %v4665_v53, %v4503_v16 }
 0x4dc   : > { %4719 = vst [vmem:[%s8659_s14 + $0x28] sm:$0xff] %v4703_v37 }
 0x4dd   : > { %v4518_v60 = vpop.f32.mrf.mxu2 }
 0x4e1   : > { %v4668_v20 = vpop.f32.mrf.mxu3 }
 0x4e2   : > { %v4704_v56 = vmul.f32 %v4668_v20, %v4506_v62 }
 0x4e4   : > { %4720 = vst [vmem:[%s8659_s14 + $0x30] sm:$0xff] %v4704_v56 }
 0x4e5   : > { %v4521_v26 = vpop.f32.mrf.mxu2 }
 0x4e9   : > { %v4671_v29 = vpop.f32.mrf.mxu3 }
 0x4ea   : > { %v4705_v42 = vmul.f32 %v4671_v29, %v4509_v50 }
 0x4ec   : > { %4721 = vst [vmem:[%s8659_s14 + $0x38] sm:$0xff] %v4705_v42 }
 0x4ed   : > { %v4524_v39 = vpop.f32.mrf.mxu2 }
 0x4f1   : > { %v4674_v6 = vpop.f32.mrf.mxu3 }
 0x4f2   : > { %v4706_v35 = vmul.f32 %v4674_v6, %v4512_v3 }
 0x4f4   : > { %4722 = vst [vmem:[%s8659_s14 + $0x40] sm:$0xff] %v4706_v35 }
 0x4f5   : > { %v4527_v13 = vpop.f32.mrf.mxu2 }
 0x4f9   : > { %v4677_v54 = vpop.f32.mrf.mxu3 }
 0x4fa   : > { %v4707_v48 = vmul.f32 %v4677_v54, %v4515_v9 }
 0x4fc   : > { %4723 = vst [vmem:[%s8659_s14 + $0x48] sm:$0xff] %v4707_v48 }
 0x4fd   : > { %v4530_v15 = vpop.f32.mrf.mxu2 }
 0x501   : > { %v4680_v41 = vpop.f32.mrf.mxu3 }
 0x502   : > { %v4708_v10 = vmul.f32 %v4680_v41, %v4518_v60 }
 0x504   : > { %4724 = vst [vmem:[%s8659_s14 + $0x50] sm:$0xff] %v4708_v10 }
 0x505   : > { %v4533_v28 = vpop.f32.mrf.mxu2 }
 0x509   : > { %v4683_v21 = vpop.f32.mrf.mxu3 }
 0x50a   : > { %v4709_v8 = vmul.f32 %v4683_v21, %v4521_v26 }
 0x50c   : > { %4725 = vst [vmem:[%s8659_s14 + $0x58] sm:$0xff] %v4709_v8 }
 0x50d   : > { %v4650_v43 = vpop.f32.mrf.mxu2 }
 0x50e   : > { %v4698_v63 = vmul.f32 %v4650_v43, %v8627_v30 }
 0x50f   : > { %5458 = shalt.err (!%p5455_p13)
}
 0x510   : > { %5097 = dma.vmem_to_hbm [thread:$0]  (%p5668_p9), %s4750_s16, 128, %s4752_s19, %s4731_s20   ;;  %4714 = vst [vmem:[%s8659_s14] sm:$0xff] %v4698_v63 }
 0x511   : > { %v4686_v30 = vpop.f32.mrf.mxu3  ;;  %s5062_s0 = sshll.u32 %s5537_s24, 7  ;;  %s9157_s16 = sld [smem:[#allocation107_spill]] }
 0x512   : > { %v4710_v0 = vmul.f32 %v4686_v30, %v4524_v39  ;;  %s4763_s20 = sshll.u32 %s8659_s14, 4  ;;  %s4736_s28 = scalar_lea.sflag [#allocation8], %s5691_s25  ;;  %s4764_s20 = int_to_ptr.vmem [resolvable:$true] %s4763_s20 }
 0x514   : > { %4726 = vst [vmem:[%s8659_s14 + $0x60] sm:$0xff] %v4710_v0 }
 0x515   : > { %v4653_v45 = vpop.f32.mrf.mxu2 }
 0x516   : > { %v4699_v55 = vmul.f32 %v4653_v45, %v8644_v57 }
 0x517   : > { %s4762_s19 = scalar_lea.hbm %s9157_s16, %s5062_s0  ;;  %s5479_s21 = scalar_lea.hbm %s9157_s16, 256 }
 0x518   : > { %4715 = vst [vmem:[%s8659_s14 + $0x8] sm:$0xff] %v4699_v55  ;;  %s4765_s27 = sshll.u32 %s4762_s19, 4  ;;  %s4766_s27 = int_to_ptr.hbm [resolvable:$true] %s4765_s27 }
 0x519   : > { %v4689_v38 = vpop.f32.mrf.mxu3  ;;  %s5473_s30 = sshra.s32 %s4766_s27, 4  ;;  %s5474_s30 = int_to_ptr.hbm [resolvable:$true] %s5473_s30 }
 0x51a   : > { %v4711_v23 = vmul.f32 %v4689_v38, %v4527_v13  ;;  %s5475_s29 = scalar_lea.hbm %s5474_s30, 128  ;;  %p5480_p3 = scmp.lt.s32.totalorder %s5474_s30, %s9157_s16 }
 0x51b   : > { %p5476_p0 = scmp.ne.s32.totalorder %s5474_s30, %s5475_s29  ;;  %p5481_p4 = scmp.lt.s32.totalorder %s5479_s21, %s5475_s29 }
 0x51c   : > { %4727 = vst [vmem:[%s8659_s14 + $0x68] sm:$0xff] %v4711_v23 }
 0x51d   : > { %v4656_v19 = vpop.f32.mrf.mxu2  ;;  %p5477_p1 = pnand %p5476_p0, %p5668_p9  ;;  %p5482_p5 = por %p5481_p4, %p5480_p3 }
 0x51e   : > { %v4700_v12 = vmul.f32 %v4656_v19, %v8654_v2 }
 0x51f   : > { %p5478_p2 = pneg %p5477_p1 }
 0x520   : > { %4716 = vst [vmem:[%s8659_s14 + $0x10] sm:$0xff] %v4700_v12 }
 0x521   : > { %v4692_v51 = vpop.f32.mrf.mxu3  ;;  %p5483_p6 = pnand %p5482_p5, %p5478_p2 }
 0x522   : > { %v4712_v24 = vmul.f32 %v4692_v51, %v4530_v15 }
 0x524   : > { %4728 = vst [vmem:[%s8659_s14 + $0x70] sm:$0xff] %v4712_v24 }
 0x529   : > { %v4695_v57 = vpop.f32.mrf.mxu3 }
 0x52a   : > { %v4713_v44 = vmul.f32 %v4695_v57, %v4533_v28 }
 0x52c   : > { %4729 = vst [vmem:[%s8659_s14 + $0x78] sm:$0xff] %v4713_v44 }
 0x52d   : > { %5486 = shalt.err (!%p5483_p6)
}
 0x52e   : > { %s5550_s25 = smov 128   ;;  %s5551_s14 = smov 8  }
 0x52f   : > { %5098 = dma.vmem_to_hbm [thread:$0]  (%p5668_p9), %s4764_s20, 2048, %s4766_s27, %s4736_s28, %s5550_s25, %s5550_s25, %s5551_s14  }
 0x530 PF: > { %s9158_s15 = sld [smem:[#allocation12_spill]]  ;;  %p5106_p7 = pnand %p4886_p12, %p5675_p11 }
 0x532   : > { %p5107_p8 = pneg %p5106_p7 }
 0x536   : > { %s4780_s19 = sand.u32 1, %s9158_s15  }
 0x537   : > { %s4781_s24 = scalar_lea.sflag [#allocation5], %s4780_s19 }
 0x538   : > { %5516 = dma.done.wait (%p5107_p8), %s4781_s24, 128  }
 0x539   : > { %5518 = vsyncadd (%p5107_p8), %s4781_s24, 4294967168  ;;  %s4791_s30 = scalar_lea.sflag [#allocation8], %s4780_s19 }
 0x53a   : > { %5520 = dma.done.wait (%p5107_p8), %s4791_s30, 2048  }
 0x53b   : > { %5522 = vsyncadd (%p5107_p8), %s4791_s30, 4294965248  ;;  %s32_s26 = sadd.s32 1, %s5545_s26   ;;  %s9159_s17 = sld [smem:[#allocation16_spill]] }
 0x53c   : > { %p29_p10 = scmp.ge.s32.totalorder %s32_s26, 4   ;;  %s9160_s24 = sld [smem:[#allocation13_spill]] }
 0x53d   : > { %s9161_s25 = sld [smem:[#allocation14_spill]]  ;;  %s9162_s21 = smov %s5529_s22 }
 0x53e   : > { %s9163_s22 = smov %s5533_s23  ;;  %31 = sbr.rel (!%p29_p10) target bundleno = 12 (0xc), region = 134 }
 0x541   : > { %s9164_s23 = smov %s9159_s17 }
 0x543   :  { %4797 = vsyncpa [#allocation4], 1 }
 0x544   :  { %4799 = vsyncpa [#allocation4 + $0x1], 1 }
 0x545   :  { %4800 = vsyncpa [#allocation5], 1 }
 0x546   :  { %4802 = vsyncpa [#allocation5 + $0x1], 1 }
 0x547   :  { %4803 = vsyncpa [#allocation8], 1 }
 0x548   :  { %4805 = vsyncpa [#allocation8 + $0x1], 1 }

</bundles_post_ra>
